<compile_context>
chip_gen: v5e
topology: v5e:2x2
jax: 0.10.0
libtpu: 0.0.40
codegen_flags: <defaults>
</compile_context>

<pallas_src>
import math
from functools import partial

import jax
import jax.numpy as jnp
from jax import lax
from jax.experimental import pallas as pl
from jax.experimental.pallas import tpu as pltpu


def _layernorm(x):
    # torch.std_mean(dim=-1, unbiased=False): population std
    mean = jnp.mean(x, axis=-1, keepdims=True)
    var = jnp.mean((x - mean) ** 2, axis=-1, keepdims=True)
    return (x - mean) / (jnp.sqrt(var) + 0.001)


def _gelu_exact(x):
    # matches torch.nn.functional.gelu (erf-based, non-approximate)
    return 0.5 * x * (1.0 + lax.erf(x / jnp.sqrt(2.0).astype(x.dtype)))


def encoder_layer_kernel(
    x_ref,        # (1, L, D)     f32
    wq_ref,       # (D, D)        bf16  folded WQ_comb @ WQ[i], head-major columns
    wk_ref,       # (D, D)        bf16
    wv_ref,       # (D, D)        bf16
    wo_ref,       # (H, d_k, D)   bf16  WO pre-split per head (row block i == head i)
    wo_bias_ref,  # (1, D)        f32
    w1_ref,       # (D, d_ff)     bf16
    w2_ref,       # (d_ff, D)     bf16
    out_ref,      # (1, L, D)     f32
    *, n_head, d_k, dff_tile, num_ff_tiles,
):
    f32, bf16 = jnp.float32, jnp.bfloat16
    L = x_ref.shape[1]
    D = x_ref.shape[2]

    # ---- layerNorm #1: only the bf16 copy stays live through attention ----
    norm_bf = _layernorm(x_ref[0]).astype(bf16)                         # (L, D)

    # ---- folded Q/K/V projections: one full-width MXU matmul each ----
    q_all = jnp.dot(norm_bf, wq_ref[...], preferred_element_type=f32).astype(bf16)
    k_all = jnp.dot(norm_bf, wk_ref[...], preferred_element_type=f32).astype(bf16)
    v_all = jnp.dot(norm_bf, wv_ref[...], preferred_element_type=f32).astype(bf16)

    # ---- all heads batched into single dot_generals ----
    def split_heads(a):                                                 # (L, D) -> (H, L, d_k)
        return jnp.stack([a[:, i * d_k:(i + 1) * d_k] for i in range(n_head)], axis=0)

    qh, kh, vh = split_heads(q_all), split_heads(k_all), split_heads(v_all)

    inv_sqrt_dk = jnp.float32(1.0 / math.sqrt(d_k))
    s = jnp.einsum("hqd,hkd->hqk", qh, kh,
                   preferred_element_type=f32) * inv_sqrt_dk            # (H, L, L) f32

    # softmax over the *query* axis (axis 1), faithful to the PyTorch softmax(dim=1)
    e = jnp.exp(s - jnp.max(s, axis=1, keepdims=True))
    attn = e * pl.reciprocal(jnp.sum(e, axis=1, keepdims=True), approx=True)

    heads = jnp.einsum("hqk,hkd->hqd", attn.astype(bf16), vh,
                       preferred_element_type=f32)                      # (H, L, d_k) f32

    # ---- WO folded into the batched head computation ----
    # att = sum_h heads[h] @ WO[h*d_k:(h+1)*d_k, :] + bias.
    # No concat, no scratch slab, no masked column stores.  The (H, L, D) f32 partials
    # are tiny at these shapes; at production L accumulate head-by-head instead.
    att = jnp.sum(
        jnp.einsum("hqd,hde->hqe", heads.astype(bf16), wo_ref[...],
                   preferred_element_type=f32),
        axis=0,
    ) + wo_bias_ref[0]                                                  # (L, D) f32

    # ---- residual 1 (dropout=0 -> identity) + layerNorm #2 ----
    # layerNorm #1 recomputed from the resident x block (cheap VPU reductions) so the
    # f32 norm slab is not live across the whole attention section.
    res1 = att + _layernorm(x_ref[0])
    ann_norm = _layernorm(res1)
    ann_bf = ann_norm.astype(bf16)

    # ---- feed-forward, fori_loop over d_ff tiles (bounded live ranges) ----
    def ffn_body(t, acc):
        fs = pl.multiple_of(t * dff_tile, dff_tile)
        h1 = _gelu_exact(jnp.dot(ann_bf, w1_ref[:, pl.ds(fs, dff_tile)],
                                 preferred_element_type=f32))
        return acc + jnp.dot(h1.astype(bf16), w2_ref[pl.ds(fs, dff_tile), :],
                             preferred_element_type=f32)

    ann_val = lax.fori_loop(0, num_ff_tiles, ffn_body, jnp.zeros((L, D), f32))

    out_ref[0] = (ann_val + ann_norm).astype(out_ref.dtype)


def _tpu_vmem_capacity_bytes():
    try:
        return int(pltpu.get_tpu_info().vmem_capacity_bytes)
    except Exception:
        return 64 * 1024 * 1024        # conservative default (v7x per-TensorCore)


def _build_call(B, L, D, d_ff, *, n_head, d_k, dff_tile, vmem_limit, single_buffer_weights):
    def wspec(shape):
        n = len(shape)

        def idx(b):
            return (0,) * n

        if single_buffer_weights:
            # Constant index map -> the block never changes; single-buffer it so the
            # weights are not held twice in VMEM (matters at production D / d_ff,
            # especially within v7x's 64 MiB/TC VMEM).
            return pl.BlockSpec(shape, idx, pipeline_mode=pl.Buffered(1))
        return pl.BlockSpec(shape, idx)

    kernel = partial(encoder_layer_kernel, n_head=n_head, d_k=d_k,
                     dff_tile=dff_tile, num_ff_tiles=d_ff // dff_tile)

    return pl.pallas_call(
        kernel,
        out_shape=jax.ShapeDtypeStruct((B, L, D), jnp.float32),
        grid_spec=pltpu.PrefetchScalarGridSpec(
            num_scalar_prefetch=0,
            grid=(B,),
            in_specs=[
                pl.BlockSpec((1, L, D), lambda b: (b, 0, 0)),
                wspec((D, D)),
                wspec((D, D)),
                wspec((D, D)),
                wspec((n_head, d_k, D)),
                wspec((1, D)),
                wspec((D, d_ff)),
                wspec((d_ff, D)),
            ],
            out_specs=pl.BlockSpec((1, L, D), lambda b: (b, 0, 0)),
        ),
        compiler_params=pltpu.CompilerParams(
            dimension_semantics=("parallel",),   # batch steps independent (2 TCs on v7x)
            vmem_limit_bytes=vmem_limit,
        ),
    )


def encoder_layer_pallas(x, fw, *, n_head):
    """fw: folded + bf16-cast weights (see fold_and_cast_params)."""
    B, L, D = x.shape
    d_k = D // n_head
    d_ff = fw["w1"].shape[1]

    vmem_cap = _tpu_vmem_capacity_bytes()
    # ~48 MiB on v7x (64 MiB/TC), ~96 MiB on v5e/v6e (128 MiB) -- leave compiler headroom.
    vmem_limit = int(min(vmem_cap * 3 // 4, 100 * 1024 * 1024))
    dff_tile = min(d_ff, 512 if vmem_cap >= (96 << 20) else 256)
    assert d_ff % dff_tile == 0, "TODO(synk): ragged d_ff tail not handled"

    args = (x, fw["wq"], fw["wk"], fw["wv"], fw["wo"], fw["wo_bias"], fw["w1"], fw["w2"])
    err = None
    # Try single-buffered constant weights first; fall back to default double-buffering
    # if pipeline_mode / Buffered(1) is not supported by this JAX/Mosaic build.
    for single in (True, False):
        try:
            call = _build_call(B, L, D, d_ff, n_head=n_head, d_k=d_k, dff_tile=dff_tile,
                               vmem_limit=vmem_limit, single_buffer_weights=single)
            return call(*args)
        except Exception as e:   # noqa: BLE001 - deliberate fallback path
            err = e
    raise err


def fold_and_cast_params(params, *, n_head):
    """Fold WQ_comb @ WQ[i] (etc.) into one (D, D) effective weight per Q/K/V (head-major
    columns), pre-split WO into (n_head, d_k, D) for the in-kernel per-head fold, and cast
    matmul weights to bf16 once (the kernel accumulates in f32)."""
    D = params["wq_comb"].shape[0]
    d_k = D // n_head
    bf = jnp.bfloat16

    def fold(comb, per_head):
        # [d, h*d_k + m] = sum_k comb[d, k] * per_head[h, k, m]
        return jnp.einsum("dk,hkm->dhm", comb, per_head).reshape(D, n_head * d_k)

    return {
        "wq": fold(params["wq_comb"], params["wq"]).astype(bf),
        "wk": fold(params["wk_comb"], params["wk"]).astype(bf),
        "wv": fold(params["wv_comb"], params["wv"]).astype(bf),
        "wo": params["wo"].reshape(n_head, d_k, D).astype(bf),
        "wo_bias": params["wo_bias"].astype(jnp.float32),
        "w1": params["w1"].astype(bf),
        "w2": params["w2"].astype(bf),
    }


def encoder_layer_ref_f32(x, params, *, n_head):
    """Pure-JAX f32 reference with the original (unfolded) math, coarse semantics check."""
    B, L, D = x.shape
    d_k = D // n_head
    norm_val = _layernorm(x)
    qc = norm_val @ params["wq_comb"]
    kc = norm_val @ params["wk_comb"]
    vc = norm_val @ params["wv_comb"]
    heads = []
    for i in range(n_head):
        q = qc @ params["wq"][i]
        k = kc @ params["wk"][i]
        v = vc @ params["wv"][i]
        scores = jnp.einsum("bld,bmd->blm", q, k) * (1.0 / math.sqrt(d_k))
        attn = jax.nn.softmax(scores, axis=1)  # dim=1 as in the PyTorch code
        heads.append(jnp.einsum("blm,bmd->bld", attn, v))
    att = jnp.concatenate(heads, axis=2) @ params["wo"] + params["wo_bias"][0]
    res1 = att + norm_val
    ann_norm = _layernorm(res1)
    ann_val = _gelu_exact(ann_norm @ params["w1"]) @ params["w2"]
    return ann_val + ann_norm


def encoder_layer_ref_bf16(x, fw, *, n_head):
    """Pure-JAX reference mirroring the kernel's precision policy (bf16 matmul operands,
    f32 accumulation), for a tight numerical check."""
    B, L, D = x.shape
    d_k = D // n_head
    bf, f32 = jnp.bfloat16, jnp.float32
    wo2 = fw["wo"].reshape(D, D)
    norm = _layernorm(x.astype(f32))
    nb = norm.astype(bf)
    q = jnp.einsum("bld,de->ble", nb, fw["wq"], preferred_element_type=f32).astype(bf)
    k = jnp.einsum("bld,de->ble", nb, fw["wk"], preferred_element_type=f32).astype(bf)
    v = jnp.einsum("bld,de->ble", nb, fw["wv"], preferred_element_type=f32).astype(bf)
    heads = []
    for i in range(n_head):
        c0, c1 = i * d_k, (i + 1) * d_k
        s = jnp.einsum("bld,bmd->blm", q[..., c0:c1], k[..., c0:c1],
                       preferred_element_type=f32) * (1.0 / math.sqrt(d_k))
        attn = jax.nn.softmax(s, axis=1)
        heads.append(jnp.einsum("blm,bmd->bld", attn.astype(bf), v[..., c0:c1],
                                preferred_element_type=f32))
    concat = jnp.concatenate(heads, axis=-1)
    att = jnp.einsum("bld,de->ble", concat.astype(bf), wo2,
                     preferred_element_type=f32) + fw["wo_bias"][0]
    res1 = att + norm
    ann_norm = _layernorm(res1)
    h1 = _gelu_exact(jnp.einsum("bld,df->blf", ann_norm.astype(bf), fw["w1"],
                                preferred_element_type=f32))
    ann = jnp.einsum("blf,fd->bld", h1.astype(bf), fw["w2"], preferred_element_type=f32)
    return ann + ann_norm


def init_params(key, d_model, n_head, d_ff):
    d_k = d_model // n_head
    keys = jax.random.split(key, 11)
    std_xu = lambda fan_in, fan_out: math.sqrt(2.0 / (fan_in + fan_out))
    std_kn = lambda fan_in: math.sqrt(2.0 / fan_in)
    return {
        "wq_comb": jax.random.normal(keys[0], (d_model, d_k), jnp.float32) * std_xu(d_model, d_k),
        "wk_comb": jax.random.normal(keys[1], (d_model, d_k), jnp.float32) * std_xu(d_model, d_k),
        "wv_comb": jax.random.normal(keys[2], (d_model, d_k), jnp.float32) * std_xu(d_model, d_k),
        "wq": jax.random.normal(keys[3], (n_head, d_k, d_k), jnp.float32) * std_xu(d_k, d_k),
        "wk": jax.random.normal(keys[4], (n_head, d_k, d_k), jnp.float32) * std_xu(d_k, d_k),
        "wv": jax.random.normal(keys[5], (n_head, d_k, d_k), jnp.float32) * std_xu(d_k, d_k),
        "wo": jax.random.normal(keys[6], (d_k * n_head, d_model), jnp.float32) * std_xu(d_k * n_head, d_model),
        "wo_bias": jnp.zeros((1, d_model), jnp.float32),
        "w1": jax.random.normal(keys[7], (d_model, d_ff), jnp.float32) * std_kn(d_model),
        "w2": jax.random.normal(keys[8], (d_ff, d_model), jnp.float32) * std_kn(d_ff),
    }


if __name__ == "__main__":
    # Small but lane-dense demo shapes (D multiple of 128 keeps every store unmasked).
    B, L, D = 2, 16, 128      # batch, seq, d_model
    n_head = 4                # d_k = 32
    d_ff = 256

    key = jax.random.PRNGKey(0)
    kx, kp = jax.random.split(key)
    x = jax.random.normal(kx, (B, L, D), jnp.float32)
    params = init_params(kp, D, n_head, d_ff)
    fw = fold_and_cast_params(params, n_head=n_head)

    out = encoder_layer_pallas(x, fw, n_head=n_head)
    out = jax.block_until_ready(out)
    assert out.shape == (B, L, D)

    # Tight check vs a reference that mirrors the kernel's bf16 matmul / f32 accumulate policy.
    ref_bf = encoder_layer_ref_bf16(x, fw, n_head=n_head)
    assert jnp.allclose(out, ref_bf, atol=3e-2, rtol=3e-2), float(jnp.max(jnp.abs(out - ref_bf)))

    # Coarse semantics check vs the exact f32 (unfolded) math; tolerance sized for bf16 matmuls.
    ref32 = encoder_layer_ref_f32(x, params, n_head=n_head)
    assert jnp.allclose(out, ref32, atol=2e-1, rtol=2e-1), float(jnp.max(jnp.abs(out - ref32)))

    print("KERNEL_OK")
</pallas_src>

<mosaic_0001>
module attributes {stable_mosaic.version = 11 : i64} {
  func.func @encoder_layer_kernel(%arg0: i32, %arg1: memref<1x16x128xf32, #tpu.memory_space<vmem>>, %arg2: memref<128x128xbf16, #tpu.memory_space<vmem>>, %arg3: memref<128x128xbf16, #tpu.memory_space<vmem>>, %arg4: memref<128x128xbf16, #tpu.memory_space<vmem>>, %arg5: memref<4x32x128xbf16, #tpu.memory_space<vmem>>, %arg6: memref<1x128xf32, #tpu.memory_space<vmem>>, %arg7: memref<128x256xbf16, #tpu.memory_space<vmem>>, %arg8: memref<256x128xbf16, #tpu.memory_space<vmem>>, %arg9: memref<1x16x128xf32, #tpu.memory_space<vmem>>) attributes {dimension_semantics = [#tpu.dimension_semantics<parallel>], iteration_bounds = array<i64: 2>, scalar_prefetch = 0 : i64, scratch_operands = 0 : i64, tpu.core_type = #tpu.core_type<tc>, window_params = [{transform_indices = @transform_0, window_bounds = array<i64: 1, 16, 128>}, {pipeline_mode = #tpu.pipeline_mode<synchronous>, transform_indices = @transform_1, window_bounds = array<i64: 128, 128>}, {pipeline_mode = #tpu.pipeline_mode<synchronous>, transform_indices = @transform_2, window_bounds = array<i64: 128, 128>}, {pipeline_mode = #tpu.pipeline_mode<synchronous>, transform_indices = @transform_3, window_bounds = array<i64: 128, 128>}, {pipeline_mode = #tpu.pipeline_mode<synchronous>, transform_indices = @transform_4, window_bounds = array<i64: 4, 32, 128>}, {pipeline_mode = #tpu.pipeline_mode<synchronous>, transform_indices = @transform_5, window_bounds = array<i64: 1, 128>}, {pipeline_mode = #tpu.pipeline_mode<synchronous>, transform_indices = @transform_6, window_bounds = array<i64: 128, 256>}, {pipeline_mode = #tpu.pipeline_mode<synchronous>, transform_indices = @transform_7, window_bounds = array<i64: 256, 128>}, {transform_indices = @transform_8, window_bounds = array<i64: 1, 16, 128>}]} {
    %c0 = arith.constant 0 : index
    %c0_0 = arith.constant 0 : index
    %c0_1 = arith.constant 0 : index
    %0 = vector.load %arg1[%c0, %c0_0, %c0_1] : memref<1x16x128xf32, #tpu.memory_space<vmem>>, vector<1x16x128xf32>
    %1 = vector.shape_cast %0 : vector<1x16x128xf32> to vector<16x128xf32>
    %cst = arith.constant dense<0.000000e+00> : vector<16xf32>
    %2 = vector.multi_reduction <add>, %1, %cst [1] : vector<16x128xf32> to vector<16xf32>
    %3 = vector.shape_cast %2 : vector<16xf32> to vector<16x1xf32>
    %cst_2 = arith.constant 1.280000e+02 : f32
    %4 = vector.broadcast %cst_2 : f32 to vector<16x1xf32>
    %5 = arith.divf %3, %4 : vector<16x1xf32>
    %6 = vector.broadcast %5 : vector<16x1xf32> to vector<16x128xf32>
    %7 = arith.subf %1, %6 : vector<16x128xf32>
    %8 = arith.mulf %7, %7 : vector<16x128xf32>
    %cst_3 = arith.constant dense<0.000000e+00> : vector<16xf32>
    %9 = vector.multi_reduction <add>, %8, %cst_3 [1] : vector<16x128xf32> to vector<16xf32>
    %10 = vector.shape_cast %9 : vector<16xf32> to vector<16x1xf32>
    %cst_4 = arith.constant 1.280000e+02 : f32
    %11 = vector.broadcast %cst_4 : f32 to vector<16x1xf32>
    %12 = arith.divf %10, %11 : vector<16x1xf32>
    %13 = vector.broadcast %5 : vector<16x1xf32> to vector<16x128xf32>
    %14 = arith.subf %1, %13 : vector<16x128xf32>
    %15 = math.sqrt %12 : vector<16x1xf32>
    %cst_5 = arith.constant 1.000000e-03 : f32
    %16 = vector.broadcast %cst_5 : f32 to vector<16x1xf32>
    %17 = arith.addf %15, %16 : vector<16x1xf32>
    %18 = vector.broadcast %17 : vector<16x1xf32> to vector<16x128xf32>
    %19 = arith.divf %14, %18 : vector<16x128xf32>
    %20 = arith.truncf %19 : vector<16x128xf32> to vector<16x128xbf16>
    %c0_6 = arith.constant 0 : index
    %c0_7 = arith.constant 0 : index
    %21 = vector.load %arg2[%c0_6, %c0_7] : memref<128x128xbf16, #tpu.memory_space<vmem>>, vector<128x128xbf16>
    %cst_8 = arith.constant dense<0.000000e+00> : vector<16x128xf32>
    %22 = tpu.matmul %20, %21, %cst_8 {dimension_numbers = #tpu.dot_dimension_numbers<[1], [0], [0], [1], [0, 0, 1, 1], [], []>} : vector<16x128xbf16>, vector<128x128xbf16>, vector<16x128xf32> -> vector<16x128xf32>
    %23 = arith.truncf %22 : vector<16x128xf32> to vector<16x128xbf16>
    %c0_9 = arith.constant 0 : index
    %c0_10 = arith.constant 0 : index
    %24 = vector.load %arg3[%c0_9, %c0_10] : memref<128x128xbf16, #tpu.memory_space<vmem>>, vector<128x128xbf16>
    %cst_11 = arith.constant dense<0.000000e+00> : vector<16x128xf32>
    %25 = tpu.matmul %20, %24, %cst_11 {dimension_numbers = #tpu.dot_dimension_numbers<[1], [0], [0], [1], [0, 0, 1, 1], [], []>} : vector<16x128xbf16>, vector<128x128xbf16>, vector<16x128xf32> -> vector<16x128xf32>
    %26 = arith.truncf %25 : vector<16x128xf32> to vector<16x128xbf16>
    %c0_12 = arith.constant 0 : index
    %c0_13 = arith.constant 0 : index
    %27 = vector.load %arg4[%c0_12, %c0_13] : memref<128x128xbf16, #tpu.memory_space<vmem>>, vector<128x128xbf16>
    %cst_14 = arith.constant dense<0.000000e+00> : vector<16x128xf32>
    %28 = tpu.matmul %20, %27, %cst_14 {dimension_numbers = #tpu.dot_dimension_numbers<[1], [0], [0], [1], [0, 0, 1, 1], [], []>} : vector<16x128xbf16>, vector<128x128xbf16>, vector<16x128xf32> -> vector<16x128xf32>
    %29 = arith.truncf %28 : vector<16x128xf32> to vector<16x128xbf16>
    %30 = vector.extract_strided_slice %23 {offsets = [0, 0], sizes = [16, 32], strides = [1, 1]} : vector<16x128xbf16> to vector<16x32xbf16>
    %31 = vector.extract_strided_slice %23 {offsets = [0, 32], sizes = [16, 32], strides = [1, 1]} : vector<16x128xbf16> to vector<16x32xbf16>
    %32 = vector.extract_strided_slice %23 {offsets = [0, 64], sizes = [16, 32], strides = [1, 1]} : vector<16x128xbf16> to vector<16x32xbf16>
    %33 = vector.extract_strided_slice %23 {offsets = [0, 96], sizes = [16, 32], strides = [1, 1]} : vector<16x128xbf16> to vector<16x32xbf16>
    %34 = vector.shape_cast %30 : vector<16x32xbf16> to vector<1x16x32xbf16>
    %35 = vector.shape_cast %31 : vector<16x32xbf16> to vector<1x16x32xbf16>
    %36 = vector.shape_cast %32 : vector<16x32xbf16> to vector<1x16x32xbf16>
    %37 = vector.shape_cast %33 : vector<16x32xbf16> to vector<1x16x32xbf16>
    %38 = tpu.concatenate %34, %35, %36, %37 in 0 : vector<1x16x32xbf16>, vector<1x16x32xbf16>, vector<1x16x32xbf16>, vector<1x16x32xbf16> -> vector<4x16x32xbf16>
    %39 = vector.extract_strided_slice %26 {offsets = [0, 0], sizes = [16, 32], strides = [1, 1]} : vector<16x128xbf16> to vector<16x32xbf16>
    %40 = vector.extract_strided_slice %26 {offsets = [0, 32], sizes = [16, 32], strides = [1, 1]} : vector<16x128xbf16> to vector<16x32xbf16>
    %41 = vector.extract_strided_slice %26 {offsets = [0, 64], sizes = [16, 32], strides = [1, 1]} : vector<16x128xbf16> to vector<16x32xbf16>
    %42 = vector.extract_strided_slice %26 {offsets = [0, 96], sizes = [16, 32], strides = [1, 1]} : vector<16x128xbf16> to vector<16x32xbf16>
    %43 = vector.shape_cast %39 : vector<16x32xbf16> to vector<1x16x32xbf16>
    %44 = vector.shape_cast %40 : vector<16x32xbf16> to vector<1x16x32xbf16>
    %45 = vector.shape_cast %41 : vector<16x32xbf16> to vector<1x16x32xbf16>
    %46 = vector.shape_cast %42 : vector<16x32xbf16> to vector<1x16x32xbf16>
    %47 = tpu.concatenate %43, %44, %45, %46 in 0 : vector<1x16x32xbf16>, vector<1x16x32xbf16>, vector<1x16x32xbf16>, vector<1x16x32xbf16> -> vector<4x16x32xbf16>
    %48 = vector.extract_strided_slice %29 {offsets = [0, 0], sizes = [16, 32], strides = [1, 1]} : vector<16x128xbf16> to vector<16x32xbf16>
    %49 = vector.extract_strided_slice %29 {offsets = [0, 32], sizes = [16, 32], strides = [1, 1]} : vector<16x128xbf16> to vector<16x32xbf16>
    %50 = vector.extract_strided_slice %29 {offsets = [0, 64], sizes = [16, 32], strides = [1, 1]} : vector<16x128xbf16> to vector<16x32xbf16>
    %51 = vector.extract_strided_slice %29 {offsets = [0, 96], sizes = [16, 32], strides = [1, 1]} : vector<16x128xbf16> to vector<16x32xbf16>
    %52 = vector.shape_cast %48 : vector<16x32xbf16> to vector<1x16x32xbf16>
    %53 = vector.shape_cast %49 : vector<16x32xbf16> to vector<1x16x32xbf16>
    %54 = vector.shape_cast %50 : vector<16x32xbf16> to vector<1x16x32xbf16>
    %55 = vector.shape_cast %51 : vector<16x32xbf16> to vector<1x16x32xbf16>
    %56 = tpu.concatenate %52, %53, %54, %55 in 0 : vector<1x16x32xbf16>, vector<1x16x32xbf16>, vector<1x16x32xbf16>, vector<1x16x32xbf16> -> vector<4x16x32xbf16>
    "tpu.trace_start"() <{level = 10 : i32, message = "hqd,hkd->hqk"}> : () -> ()
    %cst_15 = arith.constant dense<0.000000e+00> : vector<4x16x16xf32>
    %57 = tpu.matmul %38, %47, %cst_15 {dimension_numbers = #tpu.dot_dimension_numbers<[2], [2], [1], [1], [0, 0, 0, 1, 1, 1], [0], [0]>} : vector<4x16x32xbf16>, vector<4x16x32xbf16>, vector<4x16x16xf32> -> vector<4x16x16xf32>
    "tpu.trace_stop"() : () -> ()
    %cst_16 = arith.constant 0.176776692 : f32
    %58 = vector.broadcast %cst_16 : f32 to vector<4x16x16xf32>
    %59 = arith.mulf %57, %58 : vector<4x16x16xf32>
    %cst_17 = arith.constant dense<0xFF800000> : vector<4x16xf32>
    %60 = vector.multi_reduction <maximumf>, %59, %cst_17 [1] : vector<4x16x16xf32> to vector<4x16xf32>
    %61 = vector.shape_cast %60 : vector<4x16xf32> to vector<4x1x16xf32>
    %62 = vector.broadcast %61 : vector<4x1x16xf32> to vector<4x16x16xf32>
    %63 = arith.subf %59, %62 : vector<4x16x16xf32>
    %64 = math.exp %63 : vector<4x16x16xf32>
    %cst_18 = arith.constant dense<0.000000e+00> : vector<4x16xf32>
    %65 = vector.multi_reduction <add>, %64, %cst_18 [1] : vector<4x16x16xf32> to vector<4x16xf32>
    %66 = vector.shape_cast %65 : vector<4x16xf32> to vector<4x1x16xf32>
    %67 = tpu.reciprocal %66 {approx = true} : vector<4x1x16xf32> -> vector<4x1x16xf32>
    %68 = vector.broadcast %67 : vector<4x1x16xf32> to vector<4x16x16xf32>
    %69 = arith.mulf %64, %68 : vector<4x16x16xf32>
    %70 = arith.truncf %69 : vector<4x16x16xf32> to vector<4x16x16xbf16>
    "tpu.trace_start"() <{level = 10 : i32, message = "hqk,hkd->hqd"}> : () -> ()
    %cst_19 = arith.constant dense<0.000000e+00> : vector<4x16x32xf32>
    %71 = tpu.matmul %70, %56, %cst_19 {dimension_numbers = #tpu.dot_dimension_numbers<[2], [1], [1], [2], [0, 0, 0, 1, 1, 2], [0], [0]>} : vector<4x16x16xbf16>, vector<4x16x32xbf16>, vector<4x16x32xf32> -> vector<4x16x32xf32>
    "tpu.trace_stop"() : () -> ()
    %72 = arith.truncf %71 : vector<4x16x32xf32> to vector<4x16x32xbf16>
    %c0_20 = arith.constant 0 : index
    %c0_21 = arith.constant 0 : index
    %c0_22 = arith.constant 0 : index
    %73 = vector.load %arg5[%c0_20, %c0_21, %c0_22] : memref<4x32x128xbf16, #tpu.memory_space<vmem>>, vector<4x32x128xbf16>
    "tpu.trace_start"() <{level = 10 : i32, message = "hqd,hde->hqe"}> : () -> ()
    %cst_23 = arith.constant dense<0.000000e+00> : vector<4x16x128xf32>
    %74 = tpu.matmul %72, %73, %cst_23 {dimension_numbers = #tpu.dot_dimension_numbers<[2], [1], [1], [2], [0, 0, 0, 1, 1, 2], [0], [0]>} : vector<4x16x32xbf16>, vector<4x32x128xbf16>, vector<4x16x128xf32> -> vector<4x16x128xf32>
    "tpu.trace_stop"() : () -> ()
    %cst_24 = arith.constant dense<0.000000e+00> : vector<16x128xf32>
    %75 = vector.multi_reduction <add>, %74, %cst_24 [0] : vector<4x16x128xf32> to vector<16x128xf32>
    %c0_25 = arith.constant 0 : index
    %c0_26 = arith.constant 0 : index
    %76 = vector.load %arg6[%c0_25, %c0_26] : memref<1x128xf32, #tpu.memory_space<vmem>>, vector<1x128xf32>
    %77 = vector.shape_cast %76 : vector<1x128xf32> to vector<128xf32>
    %78 = vector.shape_cast %77 : vector<128xf32> to vector<1x128xf32>
    %79 = vector.broadcast %78 : vector<1x128xf32> to vector<16x128xf32>
    %80 = arith.addf %75, %79 : vector<16x128xf32>
    %c0_27 = arith.constant 0 : index
    %c0_28 = arith.constant 0 : index
    %c0_29 = arith.constant 0 : index
    %81 = vector.load %arg1[%c0_27, %c0_28, %c0_29] : memref<1x16x128xf32, #tpu.memory_space<vmem>>, vector<1x16x128xf32>
    %82 = vector.shape_cast %81 : vector<1x16x128xf32> to vector<16x128xf32>
    %cst_30 = arith.constant dense<0.000000e+00> : vector<16xf32>
    %83 = vector.multi_reduction <add>, %82, %cst_30 [1] : vector<16x128xf32> to vector<16xf32>
    %84 = vector.shape_cast %83 : vector<16xf32> to vector<16x1xf32>
    %cst_31 = arith.constant 1.280000e+02 : f32
    %85 = vector.broadcast %cst_31 : f32 to vector<16x1xf32>
    %86 = arith.divf %84, %85 : vector<16x1xf32>
    %87 = vector.broadcast %86 : vector<16x1xf32> to vector<16x128xf32>
    %88 = arith.subf %82, %87 : vector<16x128xf32>
    %89 = arith.mulf %88, %88 : vector<16x128xf32>
    %cst_32 = arith.constant dense<0.000000e+00> : vector<16xf32>
    %90 = vector.multi_reduction <add>, %89, %cst_32 [1] : vector<16x128xf32> to vector<16xf32>
    %91 = vector.shape_cast %90 : vector<16xf32> to vector<16x1xf32>
    %cst_33 = arith.constant 1.280000e+02 : f32
    %92 = vector.broadcast %cst_33 : f32 to vector<16x1xf32>
    %93 = arith.divf %91, %92 : vector<16x1xf32>
    %94 = vector.broadcast %86 : vector<16x1xf32> to vector<16x128xf32>
    %95 = arith.subf %82, %94 : vector<16x128xf32>
    %96 = math.sqrt %93 : vector<16x1xf32>
    %cst_34 = arith.constant 1.000000e-03 : f32
    %97 = vector.broadcast %cst_34 : f32 to vector<16x1xf32>
    %98 = arith.addf %96, %97 : vector<16x1xf32>
    %99 = vector.broadcast %98 : vector<16x1xf32> to vector<16x128xf32>
    %100 = arith.divf %95, %99 : vector<16x128xf32>
    %101 = arith.addf %80, %100 : vector<16x128xf32>
    %cst_35 = arith.constant dense<0.000000e+00> : vector<16xf32>
    %102 = vector.multi_reduction <add>, %101, %cst_35 [1] : vector<16x128xf32> to vector<16xf32>
    %103 = vector.shape_cast %102 : vector<16xf32> to vector<16x1xf32>
    %cst_36 = arith.constant 1.280000e+02 : f32
    %104 = vector.broadcast %cst_36 : f32 to vector<16x1xf32>
    %105 = arith.divf %103, %104 : vector<16x1xf32>
    %106 = vector.broadcast %105 : vector<16x1xf32> to vector<16x128xf32>
    %107 = arith.subf %101, %106 : vector<16x128xf32>
    %108 = arith.mulf %107, %107 : vector<16x128xf32>
    %cst_37 = arith.constant dense<0.000000e+00> : vector<16xf32>
    %109 = vector.multi_reduction <add>, %108, %cst_37 [1] : vector<16x128xf32> to vector<16xf32>
    %110 = vector.shape_cast %109 : vector<16xf32> to vector<16x1xf32>
    %cst_38 = arith.constant 1.280000e+02 : f32
    %111 = vector.broadcast %cst_38 : f32 to vector<16x1xf32>
    %112 = arith.divf %110, %111 : vector<16x1xf32>
    %113 = vector.broadcast %105 : vector<16x1xf32> to vector<16x128xf32>
    %114 = arith.subf %101, %113 : vector<16x128xf32>
    %115 = math.sqrt %112 : vector<16x1xf32>
    %cst_39 = arith.constant 1.000000e-03 : f32
    %116 = vector.broadcast %cst_39 : f32 to vector<16x1xf32>
    %117 = arith.addf %115, %116 : vector<16x1xf32>
    %118 = vector.broadcast %117 : vector<16x1xf32> to vector<16x128xf32>
    %119 = arith.divf %114, %118 : vector<16x128xf32>
    %120 = arith.truncf %119 : vector<16x128xf32> to vector<16x128xbf16>
    %cst_40 = arith.constant 0.000000e+00 : f32
    %121 = vector.broadcast %cst_40 : f32 to vector<16x128xf32>
    %c0_i32 = arith.constant 0 : i32
    %c256_i32 = arith.constant 256 : i32
    %122 = arith.muli %c0_i32, %c256_i32 : i32
    %123 = tpu.assume_multiple %122, 256 : i32
    %c0_41 = arith.constant 0 : index
    %124 = arith.index_cast %123 : i32 to index
    %125 = vector.load %arg7[%c0_41, %124] : memref<128x256xbf16, #tpu.memory_space<vmem>>, vector<128x256xbf16>
    %cst_42 = arith.constant dense<0.000000e+00> : vector<16x256xf32>
    %126 = tpu.matmul %120, %125, %cst_42 {dimension_numbers = #tpu.dot_dimension_numbers<[1], [0], [0], [1], [0, 0, 1, 1], [], []>} : vector<16x128xbf16>, vector<128x256xbf16>, vector<16x256xf32> -> vector<16x256xf32>
    %cst_43 = arith.constant 5.000000e-01 : f32
    %127 = vector.broadcast %cst_43 : f32 to vector<16x256xf32>
    %128 = arith.mulf %127, %126 : vector<16x256xf32>
    %cst_44 = arith.constant 2.000000e+00 : f32
    %129 = math.sqrt %cst_44 : f32
    %130 = vector.broadcast %129 : f32 to vector<16x256xf32>
    %131 = arith.divf %126, %130 : vector<16x256xf32>
    %132 = math.erf %131 : vector<16x256xf32>
    %cst_45 = arith.constant 1.000000e+00 : f32
    %133 = vector.broadcast %cst_45 : f32 to vector<16x256xf32>
    %134 = arith.addf %133, %132 : vector<16x256xf32>
    %135 = arith.mulf %128, %134 : vector<16x256xf32>
    %136 = arith.truncf %135 : vector<16x256xf32> to vector<16x256xbf16>
    %137 = arith.index_cast %123 : i32 to index
    %c0_46 = arith.constant 0 : index
    %138 = vector.load %arg8[%137, %c0_46] : memref<256x128xbf16, #tpu.memory_space<vmem>>, vector<256x128xbf16>
    %cst_47 = arith.constant dense<0.000000e+00> : vector<16x128xf32>
    %139 = tpu.matmul %136, %138, %cst_47 {dimension_numbers = #tpu.dot_dimension_numbers<[1], [0], [0], [1], [0, 0, 1, 1], [], []>} : vector<16x256xbf16>, vector<256x128xbf16>, vector<16x128xf32> -> vector<16x128xf32>
    %140 = arith.addf %121, %139 : vector<16x128xf32>
    %c1_i32 = arith.constant 1 : i32
    %141 = arith.addf %140, %119 : vector<16x128xf32>
    %c0_48 = arith.constant 0 : index
    %c0_49 = arith.constant 0 : index
    %c0_50 = arith.constant 0 : index
    %142 = vector.load %arg9[%c0_48, %c0_49, %c0_50] : memref<1x16x128xf32, #tpu.memory_space<vmem>>, vector<1x16x128xf32>
    %143 = vector.shape_cast %142 : vector<1x16x128xf32> to vector<16x128xf32>
    %144 = vector.shape_cast %141 : vector<16x128xf32> to vector<1x16x128xf32>
    tpu.vector_store %arg9[%c0_48, %c0_49, %c0_50], %144 {strides = array<i32>} : memref<1x16x128xf32, #tpu.memory_space<vmem>>, vector<1x16x128xf32>,
    return
  }
  func.func @transform_0(%arg0: i32) -> (i32, i32, i32) {
    %c0_i32 = arith.constant 0 : i32
    %c0_i32_0 = arith.constant 0 : i32
    %c0_i32_1 = arith.constant 0 : i32
    return %arg0, %c0_i32, %c0_i32_0 : i32, i32, i32
  }
  func.func @transform_1(%arg0: i32) -> (i32, i32) {
    %c0_i32 = arith.constant 0 : i32
    %c0_i32_0 = arith.constant 0 : i32
    %c0_i32_1 = arith.constant 0 : i32
    return %c0_i32, %c0_i32_0 : i32, i32
  }
  func.func @transform_2(%arg0: i32) -> (i32, i32) {
    %c0_i32 = arith.constant 0 : i32
    %c0_i32_0 = arith.constant 0 : i32
    %c0_i32_1 = arith.constant 0 : i32
    return %c0_i32, %c0_i32_0 : i32, i32
  }
  func.func @transform_3(%arg0: i32) -> (i32, i32) {
    %c0_i32 = arith.constant 0 : i32
    %c0_i32_0 = arith.constant 0 : i32
    %c0_i32_1 = arith.constant 0 : i32
    return %c0_i32, %c0_i32_0 : i32, i32
  }
  func.func @transform_4(%arg0: i32) -> (i32, i32, i32) {
    %c0_i32 = arith.constant 0 : i32
    %c0_i32_0 = arith.constant 0 : i32
    %c0_i32_1 = arith.constant 0 : i32
    %c0_i32_2 = arith.constant 0 : i32
    return %c0_i32, %c0_i32_0, %c0_i32_1 : i32, i32, i32
  }
  func.func @transform_5(%arg0: i32) -> (i32, i32) {
    %c0_i32 = arith.constant 0 : i32
    %c0_i32_0 = arith.constant 0 : i32
    %c0_i32_1 = arith.constant 0 : i32
    return %c0_i32, %c0_i32_0 : i32, i32
  }
  func.func @transform_6(%arg0: i32) -> (i32, i32) {
    %c0_i32 = arith.constant 0 : i32
    %c0_i32_0 = arith.constant 0 : i32
    %c0_i32_1 = arith.constant 0 : i32
    return %c0_i32, %c0_i32_0 : i32, i32
  }
  func.func @transform_7(%arg0: i32) -> (i32, i32) {
    %c0_i32 = arith.constant 0 : i32
    %c0_i32_0 = arith.constant 0 : i32
    %c0_i32_1 = arith.constant 0 : i32
    return %c0_i32, %c0_i32_0 : i32, i32
  }
  func.func @transform_8(%arg0: i32) -> (i32, i32, i32) {
    %c0_i32 = arith.constant 0 : i32
    %c0_i32_0 = arith.constant 0 : i32
    %c0_i32_1 = arith.constant 0 : i32
    return %arg0, %c0_i32, %c0_i32_0 : i32, i32, i32
  }
}

module attributes {stable_mosaic.version = 11 : i64} {
  func.func @encoder_layer_kernel(%arg0: i32, %arg1: memref<1x16x128xf32, #tpu.memory_space<vmem>>, %arg2: memref<128x128xbf16, #tpu.memory_space<vmem>>, %arg3: memref<128x128xbf16, #tpu.memory_space<vmem>>, %arg4: memref<128x128xbf16, #tpu.memory_space<vmem>>, %arg5: memref<4x32x128xbf16, #tpu.memory_space<vmem>>, %arg6: memref<1x128xf32, #tpu.memory_space<vmem>>, %arg7: memref<128x256xbf16, #tpu.memory_space<vmem>>, %arg8: memref<256x128xbf16, #tpu.memory_space<vmem>>, %arg9: memref<1x16x128xf32, #tpu.memory_space<vmem>>) attributes {dimension_semantics = [#tpu.dimension_semantics<parallel>], iteration_bounds = array<i64: 2>, scalar_prefetch = 0 : i64, scratch_operands = 0 : i64, tpu.core_type = #tpu.core_type<tc>, window_params = [{transform_indices = @transform_0, window_bounds = array<i64: 1, 16, 128>}, {pipeline_mode = #tpu.pipeline_mode<synchronous>, transform_indices = @transform_1, window_bounds = array<i64: 128, 128>}, {pipeline_mode = #tpu.pipeline_mode<synchronous>, transform_indices = @transform_2, window_bounds = array<i64: 128, 128>}, {pipeline_mode = #tpu.pipeline_mode<synchronous>, transform_indices = @transform_3, window_bounds = array<i64: 128, 128>}, {pipeline_mode = #tpu.pipeline_mode<synchronous>, transform_indices = @transform_4, window_bounds = array<i64: 4, 32, 128>}, {pipeline_mode = #tpu.pipeline_mode<synchronous>, transform_indices = @transform_5, window_bounds = array<i64: 1, 128>}, {pipeline_mode = #tpu.pipeline_mode<synchronous>, transform_indices = @transform_6, window_bounds = array<i64: 128, 256>}, {pipeline_mode = #tpu.pipeline_mode<synchronous>, transform_indices = @transform_7, window_bounds = array<i64: 256, 128>}, {transform_indices = @transform_8, window_bounds = array<i64: 1, 16, 128>}]} {
    %c0 = arith.constant 0 : index
    %c0_0 = arith.constant 0 : index
    %c0_1 = arith.constant 0 : index
    %0 = vector.load %arg1[%c0, %c0_0, %c0_1] : memref<1x16x128xf32, #tpu.memory_space<vmem>>, vector<1x16x128xf32>
    %1 = vector.shape_cast %0 : vector<1x16x128xf32> to vector<16x128xf32>
    %cst = arith.constant dense<0.000000e+00> : vector<16xf32>
    %2 = vector.multi_reduction <add>, %1, %cst [1] : vector<16x128xf32> to vector<16xf32>
    %3 = vector.shape_cast %2 : vector<16xf32> to vector<16x1xf32>
    %cst_2 = arith.constant 1.280000e+02 : f32
    %4 = vector.broadcast %cst_2 : f32 to vector<16x1xf32>
    %5 = arith.divf %3, %4 : vector<16x1xf32>
    %6 = vector.broadcast %5 : vector<16x1xf32> to vector<16x128xf32>
    %7 = arith.subf %1, %6 : vector<16x128xf32>
    %8 = arith.mulf %7, %7 : vector<16x128xf32>
    %cst_3 = arith.constant dense<0.000000e+00> : vector<16xf32>
    %9 = vector.multi_reduction <add>, %8, %cst_3 [1] : vector<16x128xf32> to vector<16xf32>
    %10 = vector.shape_cast %9 : vector<16xf32> to vector<16x1xf32>
    %cst_4 = arith.constant 1.280000e+02 : f32
    %11 = vector.broadcast %cst_4 : f32 to vector<16x1xf32>
    %12 = arith.divf %10, %11 : vector<16x1xf32>
    %13 = vector.broadcast %5 : vector<16x1xf32> to vector<16x128xf32>
    %14 = arith.subf %1, %13 : vector<16x128xf32>
    %15 = math.sqrt %12 : vector<16x1xf32>
    %cst_5 = arith.constant 1.000000e-03 : f32
    %16 = vector.broadcast %cst_5 : f32 to vector<16x1xf32>
    %17 = arith.addf %15, %16 : vector<16x1xf32>
    %18 = vector.broadcast %17 : vector<16x1xf32> to vector<16x128xf32>
    %19 = arith.divf %14, %18 : vector<16x128xf32>
    %20 = arith.truncf %19 : vector<16x128xf32> to vector<16x128xbf16>
    %c0_6 = arith.constant 0 : index
    %c0_7 = arith.constant 0 : index
    %21 = vector.load %arg2[%c0_6, %c0_7] : memref<128x128xbf16, #tpu.memory_space<vmem>>, vector<128x128xbf16>
    %cst_8 = arith.constant dense<0.000000e+00> : vector<16x128xf32>
    %22 = tpu.matmul %20, %21, %cst_8 {dimension_numbers = #tpu.dot_dimension_numbers<[1], [0], [0], [1], [0, 0, 1, 1], [], []>} : vector<16x128xbf16>, vector<128x128xbf16>, vector<16x128xf32> -> vector<16x128xf32>
    %23 = arith.truncf %22 : vector<16x128xf32> to vector<16x128xbf16>
    %c0_9 = arith.constant 0 : index
    %c0_10 = arith.constant 0 : index
    %24 = vector.load %arg3[%c0_9, %c0_10] : memref<128x128xbf16, #tpu.memory_space<vmem>>, vector<128x128xbf16>
    %cst_11 = arith.constant dense<0.000000e+00> : vector<16x128xf32>
    %25 = tpu.matmul %20, %24, %cst_11 {dimension_numbers = #tpu.dot_dimension_numbers<[1], [0], [0], [1], [0, 0, 1, 1], [], []>} : vector<16x128xbf16>, vector<128x128xbf16>, vector<16x128xf32> -> vector<16x128xf32>
    %26 = arith.truncf %25 : vector<16x128xf32> to vector<16x128xbf16>
    %c0_12 = arith.constant 0 : index
    %c0_13 = arith.constant 0 : index
    %27 = vector.load %arg4[%c0_12, %c0_13] : memref<128x128xbf16, #tpu.memory_space<vmem>>, vector<128x128xbf16>
    %cst_14 = arith.constant dense<0.000000e+00> : vector<16x128xf32>
    %28 = tpu.matmul %20, %27, %cst_14 {dimension_numbers = #tpu.dot_dimension_numbers<[1], [0], [0], [1], [0, 0, 1, 1], [], []>} : vector<16x128xbf16>, vector<128x128xbf16>, vector<16x128xf32> -> vector<16x128xf32>
    %29 = arith.truncf %28 : vector<16x128xf32> to vector<16x128xbf16>
    %30 = vector.extract_strided_slice %23 {offsets = [0, 0], sizes = [16, 32], strides = [1, 1]} : vector<16x128xbf16> to vector<16x32xbf16>
    %31 = vector.extract_strided_slice %23 {offsets = [0, 32], sizes = [16, 32], strides = [1, 1]} : vector<16x128xbf16> to vector<16x32xbf16>
    %32 = vector.extract_strided_slice %23 {offsets = [0, 64], sizes = [16, 32], strides = [1, 1]} : vector<16x128xbf16> to vector<16x32xbf16>
    %33 = vector.extract_strided_slice %23 {offsets = [0, 96], sizes = [16, 32], strides = [1, 1]} : vector<16x128xbf16> to vector<16x32xbf16>
    %34 = vector.shape_cast %30 : vector<16x32xbf16> to vector<1x16x32xbf16>
    %35 = vector.shape_cast %31 : vector<16x32xbf16> to vector<1x16x32xbf16>
    %36 = vector.shape_cast %32 : vector<16x32xbf16> to vector<1x16x32xbf16>
    %37 = vector.shape_cast %33 : vector<16x32xbf16> to vector<1x16x32xbf16>
    %38 = tpu.concatenate %34, %35, %36, %37 in 0 : vector<1x16x32xbf16>, vector<1x16x32xbf16>, vector<1x16x32xbf16>, vector<1x16x32xbf16> -> vector<4x16x32xbf16>
    %39 = vector.extract_strided_slice %26 {offsets = [0, 0], sizes = [16, 32], strides = [1, 1]} : vector<16x128xbf16> to vector<16x32xbf16>
    %40 = vector.extract_strided_slice %26 {offsets = [0, 32], sizes = [16, 32], strides = [1, 1]} : vector<16x128xbf16> to vector<16x32xbf16>
    %41 = vector.extract_strided_slice %26 {offsets = [0, 64], sizes = [16, 32], strides = [1, 1]} : vector<16x128xbf16> to vector<16x32xbf16>
    %42 = vector.extract_strided_slice %26 {offsets = [0, 96], sizes = [16, 32], strides = [1, 1]} : vector<16x128xbf16> to vector<16x32xbf16>
    %43 = vector.shape_cast %39 : vector<16x32xbf16> to vector<1x16x32xbf16>
    %44 = vector.shape_cast %40 : vector<16x32xbf16> to vector<1x16x32xbf16>
    %45 = vector.shape_cast %41 : vector<16x32xbf16> to vector<1x16x32xbf16>
    %46 = vector.shape_cast %42 : vector<16x32xbf16> to vector<1x16x32xbf16>
    %47 = tpu.concatenate %43, %44, %45, %46 in 0 : vector<1x16x32xbf16>, vector<1x16x32xbf16>, vector<1x16x32xbf16>, vector<1x16x32xbf16> -> vector<4x16x32xbf16>
    %48 = vector.extract_strided_slice %29 {offsets = [0, 0], sizes = [16, 32], strides = [1, 1]} : vector<16x128xbf16> to vector<16x32xbf16>
    %49 = vector.extract_strided_slice %29 {offsets = [0, 32], sizes = [16, 32], strides = [1, 1]} : vector<16x128xbf16> to vector<16x32xbf16>
    %50 = vector.extract_strided_slice %29 {offsets = [0, 64], sizes = [16, 32], strides = [1, 1]} : vector<16x128xbf16> to vector<16x32xbf16>
    %51 = vector.extract_strided_slice %29 {offsets = [0, 96], sizes = [16, 32], strides = [1, 1]} : vector<16x128xbf16> to vector<16x32xbf16>
    %52 = vector.shape_cast %48 : vector<16x32xbf16> to vector<1x16x32xbf16>
    %53 = vector.shape_cast %49 : vector<16x32xbf16> to vector<1x16x32xbf16>
    %54 = vector.shape_cast %50 : vector<16x32xbf16> to vector<1x16x32xbf16>
    %55 = vector.shape_cast %51 : vector<16x32xbf16> to vector<1x16x32xbf16>
    %56 = tpu.concatenate %52, %53, %54, %55 in 0 : vector<1x16x32xbf16>, vector<1x16x32xbf16>, vector<1x16x32xbf16>, vector<1x16x32xbf16> -> vector<4x16x32xbf16>
    "tpu.trace_start"() <{level = 10 : i32, message = "hqd,hkd->hqk"}> : () -> ()
    %cst_15 = arith.constant dense<0.000000e+00> : vector<4x16x16xf32>
    %57 = tpu.matmul %38, %47, %cst_15 {dimension_numbers = #tpu.dot_dimension_numbers<[2], [2], [1], [1], [0, 0, 0, 1, 1, 1], [0], [0]>} : vector<4x16x32xbf16>, vector<4x16x32xbf16>, vector<4x16x16xf32> -> vector<4x16x16xf32>
    "tpu.trace_stop"() : () -> ()
    %cst_16 = arith.constant 0.176776692 : f32
    %58 = vector.broadcast %cst_16 : f32 to vector<4x16x16xf32>
    %59 = arith.mulf %57, %58 : vector<4x16x16xf32>
    %cst_17 = arith.constant dense<0xFF800000> : vector<4x16xf32>
    %60 = vector.multi_reduction <maximumf>, %59, %cst_17 [1] : vector<4x16x16xf32> to vector<4x16xf32>
    %61 = vector.shape_cast %60 : vector<4x16xf32> to vector<4x1x16xf32>
    %62 = vector.broadcast %61 : vector<4x1x16xf32> to vector<4x16x16xf32>
    %63 = arith.subf %59, %62 : vector<4x16x16xf32>
    %64 = math.exp %63 : vector<4x16x16xf32>
    %cst_18 = arith.constant dense<0.000000e+00> : vector<4x16xf32>
    %65 = vector.multi_reduction <add>, %64, %cst_18 [1] : vector<4x16x16xf32> to vector<4x16xf32>
    %66 = vector.shape_cast %65 : vector<4x16xf32> to vector<4x1x16xf32>
    %67 = tpu.reciprocal %66 {approx = true} : vector<4x1x16xf32> -> vector<4x1x16xf32>
    %68 = vector.broadcast %67 : vector<4x1x16xf32> to vector<4x16x16xf32>
    %69 = arith.mulf %64, %68 : vector<4x16x16xf32>
    %70 = arith.truncf %69 : vector<4x16x16xf32> to vector<4x16x16xbf16>
    "tpu.trace_start"() <{level = 10 : i32, message = "hqk,hkd->hqd"}> : () -> ()
    %cst_19 = arith.constant dense<0.000000e+00> : vector<4x16x32xf32>
    %71 = tpu.matmul %70, %56, %cst_19 {dimension_numbers = #tpu.dot_dimension_numbers<[2], [1], [1], [2], [0, 0, 0, 1, 1, 2], [0], [0]>} : vector<4x16x16xbf16>, vector<4x16x32xbf16>, vector<4x16x32xf32> -> vector<4x16x32xf32>
    "tpu.trace_stop"() : () -> ()
    %72 = arith.truncf %71 : vector<4x16x32xf32> to vector<4x16x32xbf16>
    %c0_20 = arith.constant 0 : index
    %c0_21 = arith.constant 0 : index
    %c0_22 = arith.constant 0 : index
    %73 = vector.load %arg5[%c0_20, %c0_21, %c0_22] : memref<4x32x128xbf16, #tpu.memory_space<vmem>>, vector<4x32x128xbf16>
    "tpu.trace_start"() <{level = 10 : i32, message = "hqd,hde->hqe"}> : () -> ()
    %cst_23 = arith.constant dense<0.000000e+00> : vector<4x16x128xf32>
    %74 = tpu.matmul %72, %73, %cst_23 {dimension_numbers = #tpu.dot_dimension_numbers<[2], [1], [1], [2], [0, 0, 0, 1, 1, 2], [0], [0]>} : vector<4x16x32xbf16>, vector<4x32x128xbf16>, vector<4x16x128xf32> -> vector<4x16x128xf32>
    "tpu.trace_stop"() : () -> ()
    %cst_24 = arith.constant dense<0.000000e+00> : vector<16x128xf32>
    %75 = vector.multi_reduction <add>, %74, %cst_24 [0] : vector<4x16x128xf32> to vector<16x128xf32>
    %c0_25 = arith.constant 0 : index
    %c0_26 = arith.constant 0 : index
    %76 = vector.load %arg6[%c0_25, %c0_26] : memref<1x128xf32, #tpu.memory_space<vmem>>, vector<1x128xf32>
    %77 = vector.shape_cast %76 : vector<1x128xf32> to vector<128xf32>
    %78 = vector.shape_cast %77 : vector<128xf32> to vector<1x128xf32>
    %79 = vector.broadcast %78 : vector<1x128xf32> to vector<16x128xf32>
    %80 = arith.addf %75, %79 : vector<16x128xf32>
    %c0_27 = arith.constant 0 : index
    %c0_28 = arith.constant 0 : index
    %c0_29 = arith.constant 0 : index
    %81 = vector.load %arg1[%c0_27, %c0_28, %c0_29] : memref<1x16x128xf32, #tpu.memory_space<vmem>>, vector<1x16x128xf32>
    %82 = vector.shape_cast %81 : vector<1x16x128xf32> to vector<16x128xf32>
    %cst_30 = arith.constant dense<0.000000e+00> : vector<16xf32>
    %83 = vector.multi_reduction <add>, %82, %cst_30 [1] : vector<16x128xf32> to vector<16xf32>
    %84 = vector.shape_cast %83 : vector<16xf32> to vector<16x1xf32>
    %cst_31 = arith.constant 1.280000e+02 : f32
    %85 = vector.broadcast %cst_31 : f32 to vector<16x1xf32>
    %86 = arith.divf %84, %85 : vector<16x1xf32>
    %87 = vector.broadcast %86 : vector<16x1xf32> to vector<16x128xf32>
    %88 = arith.subf %82, %87 : vector<16x128xf32>
    %89 = arith.mulf %88, %88 : vector<16x128xf32>
    %cst_32 = arith.constant dense<0.000000e+00> : vector<16xf32>
    %90 = vector.multi_reduction <add>, %89, %cst_32 [1] : vector<16x128xf32> to vector<16xf32>
    %91 = vector.shape_cast %90 : vector<16xf32> to vector<16x1xf32>
    %cst_33 = arith.constant 1.280000e+02 : f32
    %92 = vector.broadcast %cst_33 : f32 to vector<16x1xf32>
    %93 = arith.divf %91, %92 : vector<16x1xf32>
    %94 = vector.broadcast %86 : vector<16x1xf32> to vector<16x128xf32>
    %95 = arith.subf %82, %94 : vector<16x128xf32>
    %96 = math.sqrt %93 : vector<16x1xf32>
    %cst_34 = arith.constant 1.000000e-03 : f32
    %97 = vector.broadcast %cst_34 : f32 to vector<16x1xf32>
    %98 = arith.addf %96, %97 : vector<16x1xf32>
    %99 = vector.broadcast %98 : vector<16x1xf32> to vector<16x128xf32>
    %100 = arith.divf %95, %99 : vector<16x128xf32>
    %101 = arith.addf %80, %100 : vector<16x128xf32>
    %cst_35 = arith.constant dense<0.000000e+00> : vector<16xf32>
    %102 = vector.multi_reduction <add>, %101, %cst_35 [1] : vector<16x128xf32> to vector<16xf32>
    %103 = vector.shape_cast %102 : vector<16xf32> to vector<16x1xf32>
    %cst_36 = arith.constant 1.280000e+02 : f32
    %104 = vector.broadcast %cst_36 : f32 to vector<16x1xf32>
    %105 = arith.divf %103, %104 : vector<16x1xf32>
    %106 = vector.broadcast %105 : vector<16x1xf32> to vector<16x128xf32>
    %107 = arith.subf %101, %106 : vector<16x128xf32>
    %108 = arith.mulf %107, %107 : vector<16x128xf32>
    %cst_37 = arith.constant dense<0.000000e+00> : vector<16xf32>
    %109 = vector.multi_reduction <add>, %108, %cst_37 [1] : vector<16x128xf32> to vector<16xf32>
    %110 = vector.shape_cast %109 : vector<16xf32> to vector<16x1xf32>
    %cst_38 = arith.constant 1.280000e+02 : f32
    %111 = vector.broadcast %cst_38 : f32 to vector<16x1xf32>
    %112 = arith.divf %110, %111 : vector<16x1xf32>
    %113 = vector.broadcast %105 : vector<16x1xf32> to vector<16x128xf32>
    %114 = arith.subf %101, %113 : vector<16x128xf32>
    %115 = math.sqrt %112 : vector<16x1xf32>
    %cst_39 = arith.constant 1.000000e-03 : f32
    %116 = vector.broadcast %cst_39 : f32 to vector<16x1xf32>
    %117 = arith.addf %115, %116 : vector<16x1xf32>
    %118 = vector.broadcast %117 : vector<16x1xf32> to vector<16x128xf32>
    %119 = arith.divf %114, %118 : vector<16x128xf32>
    %120 = arith.truncf %119 : vector<16x128xf32> to vector<16x128xbf16>
    %cst_40 = arith.constant 0.000000e+00 : f32
    %121 = vector.broadcast %cst_40 : f32 to vector<16x128xf32>
    %c0_i32 = arith.constant 0 : i32
    %c256_i32 = arith.constant 256 : i32
    %122 = arith.muli %c0_i32, %c256_i32 : i32
    %123 = tpu.assume_multiple %122, 256 : i32
    %c0_41 = arith.constant 0 : index
    %124 = arith.index_cast %123 : i32 to index
    %125 = vector.load %arg7[%c0_41, %124] : memref<128x256xbf16, #tpu.memory_space<vmem>>, vector<128x256xbf16>
    %cst_42 = arith.constant dense<0.000000e+00> : vector<16x256xf32>
    %126 = tpu.matmul %120, %125, %cst_42 {dimension_numbers = #tpu.dot_dimension_numbers<[1], [0], [0], [1], [0, 0, 1, 1], [], []>} : vector<16x128xbf16>, vector<128x256xbf16>, vector<16x256xf32> -> vector<16x256xf32>
    %cst_43 = arith.constant 5.000000e-01 : f32
    %127 = vector.broadcast %cst_43 : f32 to vector<16x256xf32>
    %128 = arith.mulf %127, %126 : vector<16x256xf32>
    %cst_44 = arith.constant 2.000000e+00 : f32
    %129 = math.sqrt %cst_44 : f32
    %130 = vector.broadcast %129 : f32 to vector<16x256xf32>
    %131 = arith.divf %126, %130 : vector<16x256xf32>
    %132 = math.erf %131 : vector<16x256xf32>
    %cst_45 = arith.constant 1.000000e+00 : f32
    %133 = vector.broadcast %cst_45 : f32 to vector<16x256xf32>
    %134 = arith.addf %133, %132 : vector<16x256xf32>
    %135 = arith.mulf %128, %134 : vector<16x256xf32>
    %136 = arith.truncf %135 : vector<16x256xf32> to vector<16x256xbf16>
    %137 = arith.index_cast %123 : i32 to index
    %c0_46 = arith.constant 0 : index
    %138 = vector.load %arg8[%137, %c0_46] : memref<256x128xbf16, #tpu.memory_space<vmem>>, vector<256x128xbf16>
    %cst_47 = arith.constant dense<0.000000e+00> : vector<16x128xf32>
    %139 = tpu.matmul %136, %138, %cst_47 {dimension_numbers = #tpu.dot_dimension_numbers<[1], [0], [0], [1], [0, 0, 1, 1], [], []>} : vector<16x256xbf16>, vector<256x128xbf16>, vector<16x128xf32> -> vector<16x128xf32>
    %140 = arith.addf %121, %139 : vector<16x128xf32>
    %c1_i32 = arith.constant 1 : i32
    %141 = arith.addf %140, %119 : vector<16x128xf32>
    %c0_48 = arith.constant 0 : index
    %c0_49 = arith.constant 0 : index
    %c0_50 = arith.constant 0 : index
    %142 = vector.load %arg9[%c0_48, %c0_49, %c0_50] : memref<1x16x128xf32, #tpu.memory_space<vmem>>, vector<1x16x128xf32>
    %143 = vector.shape_cast %142 : vector<1x16x128xf32> to vector<16x128xf32>
    %144 = vector.shape_cast %141 : vector<16x128xf32> to vector<1x16x128xf32>
    tpu.vector_store %arg9[%c0_48, %c0_49, %c0_50], %144 {strides = array<i32>} : memref<1x16x128xf32, #tpu.memory_space<vmem>>, vector<1x16x128xf32>,
    return
  }
  func.func @transform_0(%arg0: i32) -> (i32, i32, i32) {
    %c0_i32 = arith.constant 0 : i32
    %c0_i32_0 = arith.constant 0 : i32
    %c0_i32_1 = arith.constant 0 : i32
    return %arg0, %c0_i32, %c0_i32_0 : i32, i32, i32
  }
  func.func @transform_1(%arg0: i32) -> (i32, i32) {
    %c0_i32 = arith.constant 0 : i32
    %c0_i32_0 = arith.constant 0 : i32
    %c0_i32_1 = arith.constant 0 : i32
    return %c0_i32, %c0_i32_0 : i32, i32
  }
  func.func @transform_2(%arg0: i32) -> (i32, i32) {
    %c0_i32 = arith.constant 0 : i32
    %c0_i32_0 = arith.constant 0 : i32
    %c0_i32_1 = arith.constant 0 : i32
    return %c0_i32, %c0_i32_0 : i32, i32
  }
  func.func @transform_3(%arg0: i32) -> (i32, i32) {
    %c0_i32 = arith.constant 0 : i32
    %c0_i32_0 = arith.constant 0 : i32
    %c0_i32_1 = arith.constant 0 : i32
    return %c0_i32, %c0_i32_0 : i32, i32
  }
  func.func @transform_4(%arg0: i32) -> (i32, i32, i32) {
    %c0_i32 = arith.constant 0 : i32
    %c0_i32_0 = arith.constant 0 : i32
    %c0_i32_1 = arith.constant 0 : i32
    %c0_i32_2 = arith.constant 0 : i32
    return %c0_i32, %c0_i32_0, %c0_i32_1 : i32, i32, i32
  }
  func.func @transform_5(%arg0: i32) -> (i32, i32) {
    %c0_i32 = arith.constant 0 : i32
    %c0_i32_0 = arith.constant 0 : i32
    %c0_i32_1 = arith.constant 0 : i32
    return %c0_i32, %c0_i32_0 : i32, i32
  }
  func.func @transform_6(%arg0: i32) -> (i32, i32) {
    %c0_i32 = arith.constant 0 : i32
    %c0_i32_0 = arith.constant 0 : i32
    %c0_i32_1 = arith.constant 0 : i32
    return %c0_i32, %c0_i32_0 : i32, i32
  }
  func.func @transform_7(%arg0: i32) -> (i32, i32) {
    %c0_i32 = arith.constant 0 : i32
    %c0_i32_0 = arith.constant 0 : i32
    %c0_i32_1 = arith.constant 0 : i32
    return %c0_i32, %c0_i32_0 : i32, i32
  }
  func.func @transform_8(%arg0: i32) -> (i32, i32, i32) {
    %c0_i32 = arith.constant 0 : i32
    %c0_i32_0 = arith.constant 0 : i32
    %c0_i32_1 = arith.constant 0 : i32
    return %arg0, %c0_i32, %c0_i32_0 : i32, i32, i32
  }
}

</mosaic_0001>

<bundles_post_ra>
// kernel: tpu_custom_call.1
= control target key start
LH: loop header
LB: loop body
LE: loop exit
PB: predicated region body
PF: predicated region fallthrough
CT: control target
= control target key end

     0   :  { %s3381_s0 = inlined_call_operand.hbm [shape: f32[2,16,128], index: 0, kind: input, shape index: {}]   ;;  %s3382_s1 = inlined_call_operand.hbm [shape: bf16[128,128], index: 1, kind: input, shape index: {}]   ;;  %s3383_s2 = inlined_call_operand.hbm [shape: bf16[128,128], index: 2, kind: input, shape index: {}]   ;;  %s3384_s3 = inlined_call_operand.hbm [shape: bf16[128,128], index: 3, kind: input, shape index: {}]   ;;  %s3385_s4 = inlined_call_operand.hbm [shape: bf16[4,32,128], index: 4, kind: input, shape index: {}]   ;;  %s3386_s5 = inlined_call_operand.vmem [shape: f32[1,128], index: 5, kind: input, shape index: {}]   ;;  %s3387_s6 = inlined_call_operand.hbm [shape: bf16[128,256], index: 6, kind: input, shape index: {}]   ;;  %s3388_s7 = inlined_call_operand.hbm [shape: bf16[256,128], index: 7, kind: input, shape index: {}]   ;;  %s3389_s8 = inlined_call_operand.hbm [shape: f32[2,16,128], index: 8, kind: output, shape index: {}]  }
   0x1   :  { %3392 = sst [smem:[#allocation20_spill]] %s3382_s1 }
   0x2   :  { %3393 = sst [smem:[#allocation21_spill]] %s3383_s2 }
   0x3   :  { %3394 = sst [smem:[#allocation22_spill]] %s3384_s3 }
   0x4   :  { %13 = vsyncpa [#allocation3], 0 }
   0x5   :  { %15 = vsyncpa [#allocation3 + $0x1], 0 }
   0x6   :  { %16 = vsyncpa [#allocation6], 0 }
   0x7   :  { %17 = vsyncpa [#allocation9], 0 }
   0x8   :  { %18 = vsyncpa [#allocation12], 0 }
   0x9   :  { %19 = vsyncpa [#allocation4], 0 }
   0xa   :  { %21 = vsyncpa [#allocation4 + $0x1], 0  ;;  %s2953_s27 = smov 0   ;;  %s2955_s28 = smov 0  }
   0xb   :  { %s2957_s29 = smov 0   ;;  %s2959_s30 = smov 0  }
   0xc LB: > { %s3395_s1 = sld [smem:[#allocation20_spill]]  ;;  %s2977_s12 = sadd.s32 4294967295, %s2889_s30   ;;  %s2889_s30 = sphi %s2959_s30, %s3413_s30   ;;  %s2885_s29 = sphi %s2957_s29, %s3412_s29   ;;  %s2881_s28 = sphi %s2955_s28, %s3411_s28   ;;  %s2877_s27 = sphi %s2953_s27, %s3410_s27  }
   0xd   : > { %p2059_p0 = scmp.ge.s32.totalorder %s2889_s30, 1  ;;  %p48_p1 = scmp.eq.s32.totalorder %s2977_s12, 0 }
   0xe   : > { %p231_p2 = scmp.lt.s32.totalorder %s2889_s30, 3  ;;  %s2891_s14 = smov [#allocation5]  }
   0xf   : > { %s244_s15 = sshll.u32 %s2891_s14, 4  ;;  %s3397_s3 = sld [smem:[#allocation22_spill]]  ;;  %s245_s15 = int_to_ptr.vmem [resolvable:$true] %s244_s15 }
  0x10   : > { %p2982_p3 = pnand %p2059_p0, %p231_p2  ;;  %s301_s22 = sshll.u32 %s3387_s6, 4  ;;  %s302_s22 = int_to_ptr.hbm [resolvable:$true] %s301_s22 }
  0x11   : > { %s2892_s23 = smov [#allocation8]   ;;  %s2893_s25 = smov 64  }
  0x12   : > { %s242_s11 = sshll.u32 %s3395_s1, 4  ;;  %p2450_p4 = pneg %p2982_p3  ;;  %s243_s11 = int_to_ptr.hbm [resolvable:$true] %s242_s11 }
  0x13   : > { %s272_s24 = sshll.u32 %s2892_s23, 4  ;;  %s2894_s26 = smov 4   ;;  %s273_s24 = int_to_ptr.vmem [resolvable:$true] %s272_s24 }
  0x14   : > { %p2994_p6 = pnand %p2450_p4, %p48_p1  ;;  %s2895_s9 = smov [#allocation11]  }
  0x15   : > { %s270_s18 = sshll.u32 %s3397_s3, 4  ;;  %s303_s10 = sshll.u32 %s2895_s9, 4  ;;  %s271_s18 = int_to_ptr.hbm [resolvable:$true] %s270_s18  ;;  %s304_s10 = int_to_ptr.vmem [resolvable:$true] %s303_s10 }
  0x16   : > { %2453 = dma.hbm_to_vmem [thread:$0]  (!%p2994_p6), %s243_s11, 1024, %s245_s15, [#allocation6], %s2893_s25, %s2893_s25, %s2894_s26  }
  0x17   : > { %2459 = dma.hbm_to_vmem [thread:$0]  (!%p2994_p6), %s271_s18, 1024, %s273_s24, [#allocation9], %s2893_s25, %s2893_s25, %s2894_s26  }
  0x18   : > { %s3399_s2 = sld [smem:[#allocation21_spill]]  ;;  %s3390_s20 = smov 128  }
  0x19   : > { %s3391_s21 = smov 8   ;;  %s2898_s11 = smov [#allocation7]  }
  0x1a   : > { %2465 = dma.hbm_to_vmem [thread:$0]  (!%p2994_p6), %s302_s22, 2048, %s304_s10, [#allocation12], %s3390_s20, %s3390_s20, %s3391_s21  }
  0x1b   : > { %s258_s15 = sshll.u32 %s2898_s11, 4  ;;  %s284_s24 = sshll.u32 %s3385_s4, 4  ;;  %s259_s15 = int_to_ptr.vmem [resolvable:$true] %s258_s15  ;;  %s285_s24 = int_to_ptr.hbm [resolvable:$true] %s284_s24 }
  0x1c   : > { %s315_s10 = sshll.u32 %s3388_s7, 4  ;;  %s2899_s14 = smov [#allocation10]   ;;  %s316_s10 = int_to_ptr.hbm [resolvable:$true] %s315_s10 }
  0x1d   : > { %s286_s16 = sshll.u32 %s2899_s14, 4  ;;  %s3042_s18 = sadd.s32 1, %s2889_s30   ;;  %s287_s16 = int_to_ptr.vmem [resolvable:$true] %s286_s16 }
  0x1e   : > { %s256_s17 = sshll.u32 %s3399_s2, 4  ;;  %s31_s23 = ssub.s32 %s2889_s30, %s3042_s18  ;;  %s257_s17 = int_to_ptr.hbm [resolvable:$true] %s256_s17 }
  0x1f   : > { %2456 = dma.hbm_to_vmem [thread:$0]  (!%p2994_p6), %s257_s17, 1024, %s259_s15, [#allocation6], %s2893_s25, %s2893_s25, %s2894_s26  }
  0x20   : > { %2462 = dma.hbm_to_vmem [thread:$0]  (!%p2994_p6), %s285_s24, 1024, %s287_s16, [#allocation9], %s2893_s25, %s2893_s25, %s2894_s26  }
  0x21   : > { %s2900_s17 = smov [#allocation13]   ;;  %s2058_s15 = sadd.s32 4294967294, %s2889_s30  }
  0x22   : > { %s317_s11 = sshll.u32 %s2900_s17, 4  ;;  %s34_s22 = sadd.s32 1, %s2885_s29  ;;  %s318_s11 = int_to_ptr.vmem [resolvable:$true] %s317_s11 }
  0x23   : > { %2468 = dma.hbm_to_vmem [thread:$0]  (!%p2994_p6), %s316_s10, 2048, %s318_s11, [#allocation12], %s2893_s25, %s2893_s25, %s2894_s26  }
  0x24   : > { %p32_p7 = scmp.eq.s32.totalorder %s31_s23, 0  ;;  %p41_p8 = scmp.ne.s32.totalorder %s2885_s29, %s2881_s28 }
  0x25   : > { %p42_p9 = scmp.eq.s32.totalorder %s2889_s30, 0  ;;  %p47_p10 = scmp.ne.s32.totalorder %s2881_s28, %s2877_s27 }
  0x26   : > { %s3053_s24 = scalar_select %p32_p7, %s2885_s29, %s34_s22  }
  0x27   : > { %p3055_p11 = por %p42_p9, %p41_p8  ;;  %p3061_p12 = por %p48_p1, %p47_p10 }
  0x28   : > { %p218_p13 = scmp.eq.s32.totalorder %s2977_s12, 1  ;;  %p224_p0 = scmp.eq.s32.totalorder %s2058_s15, 1 }
  0x29   : > { %p2483_p2 = scmp.lt.s32.totalorder %s2889_s30, 2  ;;  %s331_s26 = sand.u32 1, %s2885_s29  }
  0x2a   : > { %p3068_p4 = por %p218_p13, %p41_p8  ;;  %p3072_p6 = por %p224_p0, %p47_p10 }
  0x2b   : > { %s2067_s14 = sshll.u32 %s331_s26, 4  ;;  %s2356_s16 = sshll.u32 %s2889_s30, 4 }
  0x2c   : > { %s340_s23 = scalar_lea.hbm %s3381_s0, %s2356_s16  ;;  %s335_s22 = scalar_lea.vmem [#allocation2], %s2067_s14 }
  0x2d   : > { %s343_s20 = sshll.u32 %s335_s22, 4  ;;  %s341_s21 = sshll.u32 %s340_s23, 4  ;;  %s344_s20 = int_to_ptr.vmem [resolvable:$true] %s343_s20  ;;  %s342_s21 = int_to_ptr.hbm [resolvable:$true] %s341_s21 }
  0x2e   : > { %p3082_p7 = pnand %p2483_p2, %p3055_p11  ;;  %s332_s1 = scalar_lea.sflag [#allocation3], %s331_s26 }
  0x2f   : > { %s2781_s2 = sshra.s32 %s342_s21, 4  ;;  %s2788_s17 = scalar_lea.hbm %s3381_s0, 32  ;;  %s2782_s2 = int_to_ptr.hbm [resolvable:$true] %s2781_s2 }
  0x30   : > { %s2783_s3 = scalar_lea.hbm %s2782_s2, 16  ;;  %p2785_p9 = pneg %p3082_p7 }
  0x31   : > { %p2784_p8 = scmp.ne.s32.totalorder %s2782_s2, %s2783_s3  ;;  %p2789_p11 = scmp.lt.s32.totalorder %s2782_s2, %s3381_s0 }
  0x32   : > { %p2790_p0 = scmp.lt.s32.totalorder %s2788_s17, %s2783_s3 }
  0x33   : > { %p2786_p10 = pnand %p2785_p9, %p2784_p8 }
  0x34   : > { %p2791_p2 = por %p2790_p0, %p2789_p11 }
  0x35   : > { %p2787_p13 = pneg %p2786_p10 }
  0x37   : > { %p2792_p5 = pnand %p2791_p2, %p2787_p13 }
  0x39   : > { %2795 = shalt.err (!%p2792_p5)
}
  0x3a   : > { %s3405_s26 = smov 8   ;;  %s3406_s23 = smov 128  }
  0x3b   : > { %2472 = dma.hbm_to_vmem [thread:$0]  (!%p3082_p7), %s342_s21, 256, %s344_s20, %s332_s1, %s3406_s23, %s3406_s23, %s3405_s26  }
  0x3c   : > { %355 = sbr.rel (%p2982_p3) target bundleno = 1749 (0x6d5), region = 52  ;;  %s3102_s22 = sand.u32 (!%p2982_p3), 1, %s2881_s28  }
  0x3d   : > { %s2071_s2 = sshll.u32 (!%p2982_p3), %s3102_s22, 4  ;;  %s358_s3 = scalar_lea.sflag (!%p2982_p3), [#allocation3], %s3102_s22 }
  0x3e   : > { %s361_s14 = scalar_lea.vmem (!%p2982_p3), [#allocation2], %s2071_s2 }
  0x41   : > { %2856 = dma.done.wait (%p3061_p12), %s358_s3, 256  }
  0x42   : > { %2858 = vsyncadd (%p3061_p12), %s358_s3, 4294967040 }
  0x43   : > { %2860 = dma.done.wait (%p48_p1), [#allocation6], 2048  }
  0x44   : > { %2862 = vsyncadd (%p48_p1), [#allocation6], 4294965248 }
  0x45   : > { %2864 = dma.done.wait (%p48_p1), [#allocation9], 2048  }
  0x46   : > { %2866 = vsyncadd (%p48_p1), [#allocation9], 4294965248 }
  0x47   : > { %2868 = dma.done.wait (%p48_p1), [#allocation12], 4096  }
  0x48   : > { %2870 = vsyncadd (%p48_p1), [#allocation12], 4294963200  ;;  %v3124_v0 = vld [vmem:[%s361_s14] sm:$0xff]  ;;  %v3127_v1 = vld [vmem:[%s361_s14 + $0x8] sm:$0xff]  ;;  %v2901_v2 = vmov 128.0   ;;  %s2902_s1 = smov 96  }
  0x49   : > { %428 = vadd.xlane.f32.xlu0 %v3124_v0  ;;  %2541 = vrcp.f32 %v2901_v2  ;;  %v2364_v17 = vld [vmem:[#allocation5 + $0x38] sm:$0xff]  ;;  %v2363_v20 = vld [vmem:[#allocation5 + $0x30] sm:$0xff]  ;;  %v2362_v23 = vld [vmem:[#allocation5 + $0x28] sm:$0xff]  ;;  %s2903_s13 = smov 64   ;;  %vm796_vm13 = vcmask 261120   ;;  %s2904_s20 = smov 32  }
  0x4a   : > { %v2372_v18 = vld [vmem:[#allocation7 + $0x38] sm:$0xff]  ;;  %572 = vmatpush.bf16.msra.mxu0 %v2364_v17  ;;  %v2371_v21 = vld [vmem:[#allocation7 + $0x30] sm:$0xff]  ;;  %v2370_v24 = vld [vmem:[#allocation7 + $0x28] sm:$0xff]  ;;  %vm903_vm14 = vcmask 130048   ;;  %s2421_s15 = sshll.u32 %s2977_s12, 4  ;;  %s424_s16 = scalar_lea.vmem [#allocation14], %s2071_s2 }
  0x4b   : > { %v2380_v19 = vld [vmem:[#allocation8 + $0x38] sm:$0xff]  ;;  %652 = vmatpush.bf16.msra.mxu1 %v2372_v18  ;;  %v2379_v22 = vld [vmem:[#allocation8 + $0x30] sm:$0xff]  ;;  %v2378_v25 = vld [vmem:[#allocation8 + $0x28] sm:$0xff]  ;;  %s1924_s19 = scalar_lea.hbm %s3389_s8, %s2421_s15  ;;  %s1925_s26 = sshll.u32 %s424_s16, 4  ;;  %s1926_s26 = int_to_ptr.vmem [resolvable:$true] %s1925_s26 }
  0x4c   : > { %732 = vmatpush.bf16.msra.mxu2 %v2380_v19  ;;  %v2361_v27 = vld [vmem:[#allocation5 + $0x20] sm:$0xff]  ;;  %v2360_v31 = vld [vmem:[#allocation5 + $0x18] sm:$0xff]  ;;  %v2359_v35 = vld [vmem:[#allocation5 + $0x10] sm:$0xff]  ;;  %s1927_s23 = sshll.u32 %s1924_s19, 4  ;;  %s1913_s12 = scalar_lea.sflag [#allocation4], %s3102_s22  ;;  %s1928_s23 = int_to_ptr.hbm [resolvable:$true] %s1927_s23 }
  0x4d   : > { %v2369_v28 = vld [vmem:[#allocation7 + $0x20] sm:$0xff]  ;;  %v2368_v32 = vld [vmem:[#allocation7 + $0x18] sm:$0xff]  ;;  %v2367_v36 = vld [vmem:[#allocation7 + $0x10] sm:$0xff]  ;;  %s2825_s3 = sshra.s32 %s1928_s23, 4  ;;  %s2826_s3 = int_to_ptr.hbm [resolvable:$true] %s2825_s3 }
  0x4e   : > { %573 = vmatpush.bf16.msra.mxu0 %v2363_v20  ;;  %v2377_v30 = vld [vmem:[#allocation8 + $0x20] sm:$0xff]  ;;  %v2376_v33 = vld [vmem:[#allocation8 + $0x18] sm:$0xff]  ;;  %v2375_v39 = vld [vmem:[#allocation8 + $0x10] sm:$0xff]  ;;  %s2827_s2 = scalar_lea.hbm %s2826_s3, 16  ;;  %p2832_p12 = scmp.lt.s32.totalorder %s2826_s3, %s3389_s8 }
  0x4f   : > { %v2542_v3 = vpop.eup %2541  ;;  %653 = vmatpush.bf16.msra.mxu1 %v2371_v21  ;;  %v2358_v42 = vld [vmem:[#allocation5 + $0x8] sm:$0xff]  ;;  %v2357_v47 = vld [vmem:[#allocation5] sm:$0xff]  ;;  %p2828_p1 = scmp.ne.s32.totalorder %s2826_s3, %s2827_s2 }
  0x50   : > { %v433_v4 = vmul.f32 128.0, %v2542_v3  ;;  %vm437_vm0 = vweird.f32 %v2542_v3  ;;  %733 = vmatpush.bf16.msra.mxu2 %v2379_v22  ;;  %v2366_v43 = vld [vmem:[#allocation7 + $0x8] sm:$0xff]  ;;  %v2365_v48 = vld [vmem:[#allocation7] sm:$0xff] }
  0x51   : > { %430 = vadd.xlane.f32.xlu0 %v3127_v1  ;;  %v2374_v44 = vld [vmem:[#allocation8 + $0x8] sm:$0xff]  ;;  %v2373_v50 = vld [vmem:[#allocation8] sm:$0xff]  ;;  %p2829_p3 = pnand %p2828_p1, %p3068_p4 }
  0x52   : > { %v434_v5 = vsub.f32 1.0, %v433_v4  ;;  %574 = vmatpush.bf16.msra.mxu0 %v2362_v23 }
  0x53   : > { %654 = vmatpush.bf16.msra.mxu1 %v2370_v24  ;;  %p2830_p5 = pneg %p2829_p3 }
  0x54   : > { %v435_v6 = vmul.f32 %v2542_v3, %v434_v5  ;;  %734 = vmatpush.bf16.msra.mxu2 %v2378_v25 }
  0x56   : > { %v436_v7 = vadd.f32 %v2542_v3, %v435_v6  ;;  %575 = vmatpush.bf16.msra.mxu0 %v2361_v27 }
  0x57   : > { %655 = vmatpush.bf16.msra.mxu1 %v2369_v28 }
  0x58   : > { %v3130_v8 = vsel %vm437_vm0, %v2542_v3, %v436_v7  ;;  %735 = vmatpush.bf16.msra.mxu2 %v2377_v30 }
  0x5a   : > { %576 = vmatpush.bf16.msra.mxu0 %v2360_v31 }
  0x5b   : > { %656 = vmatpush.bf16.msra.mxu1 %v2368_v32 }
  0x5c   : > { %736 = vmatpush.bf16.msra.mxu2 %v2376_v33 }
  0x5e   : > { %577 = vmatpush.bf16.msra.mxu0 %v2359_v35 }
  0x5f   : > { %657 = vmatpush.bf16.msra.mxu1 %v2367_v36 }
  0x60   : > { %737 = vmatpush.bf16.msra.mxu2 %v2375_v39 }
  0x62   : > { %578 = vmatpush.bf16.msra.mxu0 %v2358_v42 }
  0x63   : > { %658 = vmatpush.bf16.msra.mxu1 %v2366_v43 }
  0x64   : > { %738 = vmatpush.bf16.msra.mxu2 %v2374_v44 }
  0x66   : > { %579 = vmatpush.bf16.msra.mxu0 %v2357_v47 }
  0x67   : > { %659 = vmatpush.bf16.msra.mxu1 %v2365_v48 }
  0x68   : > { %739 = vmatpush.bf16.msra.mxu2 %v2373_v50 }
  0xbc   : > { %v429_v9 = vpop.xlane.xlu0 %428 }
  0xbd   : > { %v439_v10 = vmul.f32 %v3130_v8, %v429_v9 }
  0xbf   : > { %v3134_v11 = vsub.f32 %v3124_v0, %v439_v10 }
  0xc1   : > { %v443_v12 = vmul.f32 %v3134_v11, %v3134_v11 }
  0xc3   : > { %445 = vadd.xlane.f32.xlu1 %v443_v12 }
  0xc4   : > { %v431_v13 = vpop.xlane.xlu0 %430 }
  0xc5   : > { %v440_v14 = vmul.f32 %v3130_v8, %v431_v13 }
  0xc7   : > { %v3140_v15 = vsub.f32 %v3127_v1, %v440_v14 }
  0xc9   : > { %v444_v16 = vmul.f32 %v3140_v15, %v3140_v15 }
  0xcb   : > { %447 = vadd.xlane.f32.xlu1 %v444_v16 }
 0x136   : > { %v446_v26 = vpop.xlane.xlu1 %445 }
 0x137   : > { %v449_v29 = vmul.f32 %v446_v26, %v3130_v8 }
 0x139   : > { %2543 = vrsqrt.f32 %v449_v29  ;;  %vm458_vm1 = vcmp.eq.f32.partialorder %v449_v29, inf  ;;  %v461_v55 = vand.u32 2147483648, %v449_v29  ;;  %vm460_vm2 = vcmp.eq.f32.partialorder %v449_v29, 0.0 }
 0x13e   : > { %v448_v34 = vpop.xlane.xlu1 %447 }
 0x13f   : > { %v2544_v37 = vpop.eup %2543  ;;  %v450_v38 = vmul.f32 %v448_v34, %v3130_v8 }
 0x140   : > { %v452_v40 = vmul.f32 %v2544_v37, %v449_v29 }
 0x141   : > { %2545 = vrsqrt.f32 %v450_v38  ;;  %vm470_vm3 = vcmp.eq.f32.partialorder %v450_v38, inf  ;;  %v473_v63 = vand.u32 2147483648, %v450_v38  ;;  %vm472_vm4 = vcmp.eq.f32.partialorder %v450_v38, 0.0 }
 0x142   : > { %v453_v41 = vmul.f32 %v2544_v37, %v452_v40 }
 0x144   : > { %v454_v45 = vmul.f32 0.5, %v453_v41 }
 0x146   : > { %v455_v46 = vsub.f32 1.5, %v454_v45 }
 0x147   : > { %v2546_v49 = vpop.eup %2545 }
 0x148   : > { %v456_v51 = vmul.f32 %v2544_v37, %v455_v46  ;;  %v464_v52 = vmul.f32 %v2546_v49, %v450_v38 }
 0x14a   : > { %v457_v53 = vmul.f32 %v456_v51, %v449_v29  ;;  %v465_v54 = vmul.f32 %v2546_v49, %v464_v52 }
 0x14c   : > { %v466_v56 = vmul.f32 0.5, %v465_v54  ;;  %v459_v57 = vsel %vm458_vm1, %v449_v29, %v457_v53 }
 0x14d   : > { %v462_v58 = vsel %vm460_vm2, %v461_v55, %v459_v57 }
 0x14e   : > { %v467_v59 = vsub.f32 1.5, %v466_v56  ;;  %v475_v60 = vadd.f32 0.001, %v462_v58 }
 0x150   : > { %v468_v61 = vmul.f32 %v2546_v49, %v467_v59  ;;  %2547 = vrcp.f32 %v475_v60  ;;  %v488_v14 = vand.u32 2147483648, %v475_v60  ;;  %vm482_vm6 = vweird.f32 %v475_v60 }
 0x151   : > { %v486_v16 = vand.u32 2147483647, %v475_v60 }
 0x152   : > { %v469_v62 = vmul.f32 %v468_v61, %v450_v38  ;;  %v489_v22 = vor.u32 1.1754944e-38, %v488_v14 }
 0x153   : > { %vm487_vm9 = vcmp.eq.f32.partialorder %v486_v16, 8.507059e+37 }
 0x154   : > { %v471_v2 = vsel %vm470_vm3, %v450_v38, %v469_v62 }
 0x155   : > { %v474_v3 = vsel %vm472_vm4, %v473_v63, %v471_v2 }
 0x156   : > { %v2548_v4 = vpop.eup %2547  ;;  %v476_v5 = vadd.f32 0.001, %v474_v3 }
 0x157   : > { %v478_v6 = vmul.f32 %v2548_v4, %v475_v60  ;;  %vm483_vm5 = vweird.f32 %v2548_v4 }
 0x158   : > { %2549 = vrcp.f32 %v476_v5  ;;  %vm484_vm7 = vmor %vm482_vm6, %vm483_vm5  ;;  %v503_v18 = vand.u32 2147483648, %v476_v5  ;;  %v501_v21 = vand.u32 2147483647, %v476_v5  ;;  %vm497_vm10 = vweird.f32 %v476_v5 }
 0x159   : > { %v479_v7 = vsub.f32 1.0, %v478_v6 }
 0x15a   : > { %v504_v25 = vor.u32 1.1754944e-38, %v503_v18  ;;  %vm502_vm12 = vcmp.eq.f32.partialorder %v501_v21, 8.507059e+37 }
 0x15b   : > { %v480_v9 = vmul.f32 %v2548_v4, %v479_v7 }
 0x15d   : > { %v481_v12 = vadd.f32 %v2548_v4, %v480_v9 }
 0x15e   : > { %v2550_v10 = vpop.eup %2549 }
 0x15f   : > { %v493_v13 = vmul.f32 %v2550_v10, %v476_v5  ;;  %v485_v19 = vsel %vm484_vm7, %v2548_v4, %v481_v12  ;;  %vm498_vm8 = vweird.f32 %v2550_v10 }
 0x160   : > { %v490_v24 = vsel %vm487_vm9, %v489_v22, %v485_v19  ;;  %vm499_vm11 = vmor %vm497_vm10, %vm498_vm8 }
 0x161   : > { %v494_v17 = vsub.f32 1.0, %v493_v13  ;;  %v491_v28 = vmul.f32 %v490_v24, %v3134_v11 }
 0x163   : > { %v495_v20 = vmul.f32 %v2550_v10, %v494_v17 }
 0x165   : > { %v496_v23 = vadd.f32 %v2550_v10, %v495_v20 }
 0x167   : > { %v500_v26 = vsel %vm499_vm11, %v2550_v10, %v496_v23 }
 0x168   : > { %v505_v27 = vsel %vm502_vm12, %v504_v25, %v500_v26 }
 0x169   : > { %v506_v29 = vmul.f32 %v505_v27, %v3140_v15 }
 0x16b   : > { %v507_v30 = vpack.c.bf16 %v506_v29, %v491_v28 }
 0x16d   : > { %580 = vmatmul.bf16.vlgmr.msra.gmra.mxu0 %v507_v30  ;;  %660 = vmatmul.bf16.vlgmr.msra.gmra.mxu1 %v507_v30 }
 0x16e   : > { %740 = vmatmul.bf16.vlgmr.msra.gmra.mxu2 %v507_v30 }
 0x1ea   : > { %v581_v31 = vpop.f32.mrf.mxu0  ;;  %v661_v32 = vpop.f32.mrf.mxu1 }
 0x1eb   : > { %v586_v33 = vpack.c.bf16 %v581_v31, %v581_v31  ;;  %v666_v34 = vpack.c.bf16 %v661_v32, %v661_v32 }
 0x1ed   : > { %764 = vrot.lane.b32.xlu2 %v666_v34, %s2902_s1  ;;  %750 = vrot.lane.b32.xlu0 %v586_v33, %s2902_s1  ;;  %v793_v15 = vunpack.c.l.b16 %v666_v34  ;;  %v790_v48 = vunpack.c.l.b16 %v586_v33 }
 0x1f1   : > { %v741_v35 = vpop.f32.mrf.mxu2 }
 0x1f2   : > { %v583_v36 = vpop.f32.mrf.mxu0  ;;  %v663_v37 = vpop.f32.mrf.mxu1  ;;  %v746_v41 = vpack.c.bf16 %v741_v35, %v741_v35 }
 0x1f3   : > { %v587_v38 = vpack.c.bf16 %v583_v36, %v583_v36  ;;  %v667_v11 = vpack.c.bf16 %v663_v37, %v663_v37 }
 0x1f4   : > { %v1025_v46 = vunpack.c.l.b16 %v746_v41 }
 0x1f5   : > { %766 = vrot.lane.b32.xlu2 %v667_v11, %s2902_s1  ;;  %756 = vrot.lane.b32.xlu0 %v587_v38, %s2903_s13  ;;  %v794_v39 = vunpack.c.l.b16 %v667_v11  ;;  %v791_v45 = vunpack.c.l.b16 %v587_v38 }
 0x1f6   : > { %752 = vrot.lane.b32.xlu1 %v587_v38, %s2902_s1 }
 0x1f7   : > { %v795_v40 = vpack.c.b16 %v794_v39, %v793_v15  ;;  %v792_v50 = vpack.c.b16 %v791_v45, %v790_v48 }
 0x1f9   : > { %v743_v42 = vpop.f32.mrf.mxu2  ;;  %v801_v43 = vsel %vm796_vm13, %v795_v40, 0 }
 0x1fa   : > { %v747_v44 = vpack.c.bf16 %v743_v42, %v743_v42  ;;  %810 = vmatpush.bf16.xpose.msra.mxu3 %v801_v43 }
 0x1fc   : > { %v1026_v47 = vunpack.c.l.b16 %v747_v44 }
 0x1fd   : > { %768 = vrot.lane.b32.xlu2 %v666_v34, %s2903_s13  ;;  %758 = vrot.lane.b32.xlu0 %v586_v33, %s2904_s20 }
 0x1fe   : > { %774 = vrot.lane.b32.xlu1 %v667_v11, %s2904_s20  ;;  %v1027_v49 = vpack.c.b16 %v1026_v47, %v1025_v46 }
 0x200   : > { %1039 = vmatpush.bf16.msrb.mxu1 %v1027_v49 }
 0x201   : > { %2175 = vmatmul.msk.bf16.vlgmr.msra.gmra.mxu3 %vm796_vm13, %v792_v50 }
 0x205   : > { %770 = vrot.lane.b32.xlu2 %v667_v11, %s2903_s13  ;;  %780 = vrot.lane.b32.xlu0 %v747_v44, %s2902_s1 }
 0x206   : > { %778 = vrot.lane.b32.xlu1 %v746_v41, %s2902_s1 }
 0x20d   : > { %754 = vrot.lane.b32.xlu2 %v586_v33, %s2903_s13  ;;  %786 = vrot.lane.b32.xlu0 %v746_v41, %s2904_s20 }
 0x20e   : > { %784 = vrot.lane.b32.xlu1 %v747_v44, %s2903_s13 }
 0x215   : > { %772 = vrot.lane.b32.xlu2 %v666_v34, %s2904_s20 }
 0x21d   : > { %760 = vrot.lane.b32.xlu2 %v587_v38, %s2904_s20 }
 0x225   : > { %782 = vrot.lane.b32.xlu2 %v746_v41, %s2903_s13  ;;  %s2831_s13 = scalar_lea.hbm %s3389_s8, 32 }
 0x226   : > { %p2833_p7 = scmp.lt.s32.totalorder %s2831_s13, %s2827_s2 }
 0x228   : > { %p2834_p8 = por %p2833_p7, %p2832_p12 }
 0x22a   : > { %p2835_p9 = pnand %p2834_p8, %p2830_p5 }
 0x22d   : > { %788 = vrot.lane.b32.xlu2 %v747_v44, %s2904_s20 }
 0x237   : > { %1300 = vadd.xlane.f32.xlu0 %v3127_v1 }
 0x238   : > { %1298 = vadd.xlane.f32.xlu1 %v3124_v0 }
 0x247   : > { %v765_v51 = vpop.permute.xlu2 %764 }
 0x248   : > { %v820_v53 = vunpack.c.l.b16 %v765_v51 }
 0x24f   : > { %v767_v52 = vpop.permute.xlu2 %766 }
 0x250   : > { %v821_v54 = vunpack.c.l.b16 %v767_v52 }
 0x252   : > { %v822_v55 = vpack.c.b16 %v821_v54, %v820_v53 }
 0x254   : > { %v827_v56 = vsel %vm796_vm13, %v822_v55, 0 }
 0x255   : > { %836 = vmatpush.bf16.xpose.msrb.mxu3 %v827_v56 }
 0x257   : > { %v769_v57 = vpop.permute.xlu2 %768 }
 0x258   : > { %v846_v60 = vunpack.c.l.b16 %v769_v57 }
 0x25f   : > { %v771_v58 = vpop.permute.xlu2 %770  ;;  %v751_v59 = vpop.permute.xlu0 %750 }
 0x260   : > { %v847_v61 = vunpack.c.l.b16 %v771_v58  ;;  %v817_v5 = vunpack.c.l.b16 %v751_v59 }
 0x262   : > { %v848_v62 = vpack.c.b16 %v847_v61, %v846_v60 }
 0x264   : > { %v853_v63 = vsel %vm796_vm13, %v848_v62, 0 }
 0x265   : > { %862 = vmatpush.bf16.xpose.msra.mxu3 %v853_v63 }
 0x267   : > { %v755_v2 = vpop.permute.xlu2 %754  ;;  %v757_v3 = vpop.permute.xlu0 %756 }
 0x268   : > { %v753_v4 = vpop.permute.xlu1 %752  ;;  %v843_v18 = vunpack.c.l.b16 %v755_v2  ;;  %v844_v19 = vunpack.c.l.b16 %v757_v3 }
 0x269   : > { %v818_v6 = vunpack.c.l.b16 %v753_v4 }
 0x26a   : > { %v845_v28 = vpack.c.b16 %v844_v19, %v843_v18 }
 0x26b   : > { %v819_v7 = vpack.c.b16 %v818_v6, %v817_v5 }
 0x26d   : > { %2176 = vmatmul.msk.bf16.vlgmr.msrb.gmra.mxu3 %vm796_vm13, %v819_v7 }
 0x26f   : > { %v773_v9 = vpop.permute.xlu2 %772  ;;  %v759_v10 = vpop.permute.xlu0 %758 }
 0x270   : > { %v872_v12 = vunpack.c.l.b16 %v773_v9  ;;  %v775_v13 = vpop.permute.xlu1 %774  ;;  %v869_v22 = vunpack.c.l.b16 %v759_v10 }
 0x271   : > { %v873_v14 = vunpack.c.l.b16 %v775_v13 }
 0x273   : > { %v874_v16 = vpack.c.b16 %v873_v14, %v872_v12 }
 0x275   : > { %v879_v17 = vsel %vm796_vm13, %v874_v16, 0 }
 0x276   : > { %888 = vmatpush.bf16.xpose.msrb.mxu0 %v879_v17 }
 0x277   : > { %v761_v20 = vpop.permute.xlu2 %760  ;;  %v781_v21 = vpop.permute.xlu0 %780 }
 0x278   : > { %v870_v23 = vunpack.c.l.b16 %v761_v20  ;;  %v1052_v24 = vunpack.c.l.b16 %v781_v21  ;;  %v779_v25 = vpop.permute.xlu1 %778 }
 0x279   : > { %v1051_v26 = vunpack.c.l.b16 %v779_v25 }
 0x27a   : > { %v871_v27 = vpack.c.b16 %v870_v23, %v869_v22 }
 0x27b   : > { %v1053_v29 = vpack.c.b16 %v1052_v24, %v1051_v26 }
 0x27d   : > { %2177 = vmatmul.msk.bf16.vlgmr.msra.gmra.mxu3 %vm796_vm13, %v845_v28  ;;  %2178 = vmatmul.msk.bf16.vlgmr.msrb.gmra.mxu0 %vm796_vm13, %v871_v27 }
 0x27e   : > { %1065 = vmatpush.bf16.msrb.mxu2 %v1053_v29 }
 0x27f   : > { %v783_v30 = vpop.permute.xlu2 %782  ;;  %v787_v36 = vpop.permute.xlu0 %786 }
 0x280   : > { %v1077_v31 = vunpack.c.l.b16 %v783_v30  ;;  %v785_v32 = vpop.permute.xlu1 %784  ;;  %v1103_v38 = vunpack.c.l.b16 %v787_v36 }
 0x281   : > { %v1078_v33 = vunpack.c.l.b16 %v785_v32 }
 0x283   : > { %v1079_v34 = vpack.c.b16 %v1078_v33, %v1077_v31 }
 0x284   : > { %v812_v35 = vpop.f32.mrf.mxu3 }
 0x285   : > { %1091 = vmatpush.bf16.msrb.mxu3 %v1079_v34  ;;  %v895_v39 = vmul.f32 0.17677669, %v812_v35 }
 0x287   : > { %v789_v37 = vpop.permute.xlu2 %788  ;;  %v904_v42 = vsel %vm903_vm14, %v895_v39, -inf }
 0x288   : > { %v1104_v11 = vunpack.c.l.b16 %v789_v37 }
 0x28a   : > { %v1105_v15 = vpack.c.b16 %v1104_v11, %v1103_v38 }
 0x28c   : > { %v814_v40 = vpop.f32.mrf.mxu3  ;;  %1117 = vmatpush.bf16.msra.mxu0 %v1105_v15 }
 0x28d   : > { %v896_v41 = vmul.f32 0.17677669, %v814_v40 }
 0x28f   : > { %v905_v43 = vsel %vm903_vm14, %v896_v41, -inf }
 0x290   : > { %v906_v44 = vmax.f32 %v904_v42, %v905_v43 }
 0x292   : > { %v907_v45 = vrot.slane %v906_v44, 4 }
 0x294   : > { %v908_v46 = vmax.f32 %v906_v44, %v907_v45 }
 0x296   : > { %v909_v47 = vrot.slane %v908_v46, 2 }
 0x298   : > { %v910_v48 = vmax.f32 %v908_v46, %v909_v47 }
 0x29a   : > { %v911_v49 = vrot.slane %v910_v48, 1 }
 0x29c   : > { %v912_v50 = vmax.f32 %v910_v48, %v911_v49 }
 0x29e   : > { %v940_v51 = vsub.f32 %v895_v39, %v912_v50  ;;  %v941_v52 = vsub.f32 %v896_v41, %v912_v50 }
 0x2a0   : > { %v948_v53 = vmul.f32 1.442695, %v940_v51  ;;  %v950_v54 = vmul.f32 1.442695, %v941_v52 }
 0x2a2   : > { %2551 = vpow2.f32 %v948_v53 }
 0x2a3   : > { %2553 = vpow2.f32 %v950_v54 }
 0x2a8   : > { %v2552_v55 = vpop.eup %2551 }
 0x2a9   : > { %v2554_v56 = vpop.eup %2553  ;;  %v964_v57 = vsel %vm903_vm14, %v2552_v55, 0.0 }
 0x2aa   : > { %v965_v58 = vsel %vm903_vm14, %v2554_v56, 0.0  ;;  %v1301_v27 = vpop.xlane.xlu0 %1300 }
 0x2ab   : > { %v966_v59 = vadd.f32 %v965_v58, %v964_v57  ;;  %v1299_v28 = vpop.xlane.xlu1 %1298  ;;  %v1303_v31 = vmul.f32 %v1301_v27, %v3130_v8 }
 0x2ac   : > { %v1302_v32 = vmul.f32 %v1299_v28, %v3130_v8 }
 0x2ad   : > { %v967_v60 = vrot.slane %v966_v59, 4  ;;  %v3180_v35 = vsub.f32 %v3127_v1, %v1303_v31 }
 0x2ae   : > { %v3183_v36 = vsub.f32 %v3124_v0, %v1302_v32 }
 0x2af   : > { %v968_v61 = vadd.f32 %v967_v60, %v966_v59  ;;  %v1307_v39 = vmul.f32 %v3180_v35, %v3180_v35 }
 0x2b0   : > { %v1306_v40 = vmul.f32 %v3183_v36, %v3183_v36 }
 0x2b1   : > { %v969_v62 = vrot.slane %v968_v61, 2  ;;  %1310 = vadd.xlane.f32.xlu1 %v1307_v39 }
 0x2b2   : > { %1308 = vadd.xlane.f32.xlu2 %v1306_v40 }
 0x2b3   : > { %v970_v63 = vadd.f32 %v969_v62, %v968_v61 }
 0x2b5   : > { %v971_v2 = vrot.slane %v970_v63, 1 }
 0x2b7   : > { %v972_v3 = vadd.f32 %v971_v2, %v970_v63 }
 0x2b9   : > { %2555 = vrcp.f32 %v972_v3 }
 0x2bf   : > { %v2556_v4 = vpop.eup %2555 }
 0x2c0   : > { %v1004_v5 = vmul.f32 %v2556_v4, %v2552_v55  ;;  %v1005_v6 = vmul.f32 %v2556_v4, %v2554_v56 }
 0x2c2   : > { %v1012_v7 = vpack.c.bf16 %v1004_v5, %v1004_v5  ;;  %v1013_v9 = vpack.c.bf16 %v1005_v6, %v1005_v6 }
 0x2c4   : > { %v1022_v10 = vunpack.c.l.b16 %v1012_v7  ;;  %v1023_v12 = vunpack.c.l.b16 %v1013_v9 }
 0x2c6   : > { %v1024_v13 = vpack.c.b16 %v1023_v12, %v1022_v10 }
 0x2c8   : > { %2179 = vmatmul.msk.bf16.vlgmr.msrb.gmra.mxu1 %vm903_vm14, %v1024_v13 }
 0x2f0   : > { %v838_v14 = vpop.f32.mrf.mxu3 }
 0x2f1   : > { %v897_v16 = vmul.f32 0.17677669, %v838_v14 }
 0x2f3   : > { %v913_v20 = vsel %vm903_vm14, %v897_v16, -inf }
 0x2f8   : > { %v840_v17 = vpop.f32.mrf.mxu3 }
 0x2f9   : > { %v898_v18 = vmul.f32 0.17677669, %v840_v17 }
 0x2fa   : > { %v890_v19 = vpop.f32.mrf.mxu0 }
 0x2fb   : > { %v914_v21 = vsel %vm903_vm14, %v898_v18, -inf  ;;  %v901_v26 = vmul.f32 0.17677669, %v890_v19 }
 0x2fc   : > { %v915_v22 = vmax.f32 %v913_v20, %v914_v21 }
 0x2fd   : > { %v931_v37 = vsel %vm903_vm14, %v901_v26, -inf }
 0x2fe   : > { %v916_v23 = vrot.slane %v915_v22, 4 }
 0x300   : > { %v917_v24 = vmax.f32 %v915_v22, %v916_v23  ;;  %v864_v25 = vpop.f32.mrf.mxu3 }
 0x301   : > { %v899_v41 = vmul.f32 0.17677669, %v864_v25 }
 0x302   : > { %v918_v29 = vrot.slane %v917_v24, 2  ;;  %v892_v30 = vpop.f32.mrf.mxu0 }
 0x303   : > { %v902_v33 = vmul.f32 0.17677669, %v892_v30  ;;  %v922_v47 = vsel %vm903_vm14, %v899_v41, -inf }
 0x304   : > { %v919_v34 = vmax.f32 %v917_v24, %v918_v29 }
 0x305   : > { %v932_v38 = vsel %vm903_vm14, %v902_v33, -inf }
 0x306   : > { %v920_v11 = vrot.slane %v919_v34, 1  ;;  %v933_v15 = vmax.f32 %v931_v37, %v932_v38 }
 0x308   : > { %v921_v42 = vmax.f32 %v919_v34, %v920_v11  ;;  %v934_v43 = vrot.slane %v933_v15, 4  ;;  %v866_v1 = vpop.f32.mrf.mxu3 }
 0x309   : > { %v900_v0 = vmul.f32 0.17677669, %v866_v1 }
 0x30a   : > { %v942_v44 = vsub.f32 %v897_v16, %v921_v42  ;;  %v943_v45 = vsub.f32 %v898_v18, %v921_v42  ;;  %v935_v46 = vmax.f32 %v933_v15, %v934_v43  ;;  %v2382_v42 = vld [vmem:[#allocation10 + $0x8] sm:$0xff] }
 0x30b   : > { %v923_v48 = vsel %vm903_vm14, %v900_v0, -inf  ;;  %1174 = vmatpush.bf16.msra.mxu1 %v2382_v42 }
 0x30c   : > { %v952_v49 = vmul.f32 1.442695, %v942_v44  ;;  %v954_v50 = vmul.f32 1.442695, %v943_v45  ;;  %v936_v51 = vrot.slane %v935_v46, 2  ;;  %v924_v52 = vmax.f32 %v922_v47, %v923_v48  ;;  %v2381_v48 = vld [vmem:[#allocation10] sm:$0xff] }
 0x30e   : > { %2557 = vpow2.f32 %v952_v49  ;;  %v937_v53 = vmax.f32 %v935_v46, %v936_v51  ;;  %v925_v54 = vrot.slane %v924_v52, 4 }
 0x30f   : > { %2559 = vpow2.f32 %v954_v50  ;;  %1175 = vmatpush.bf16.msra.mxu1 %v2381_v48 }
 0x310   : > { %v938_v55 = vrot.slane %v937_v53, 1  ;;  %v926_v56 = vmax.f32 %v924_v52, %v925_v54 }
 0x312   : > { %v939_v57 = vmax.f32 %v937_v53, %v938_v55  ;;  %v927_v58 = vrot.slane %v926_v56, 2 }
 0x314   : > { %v2558_v59 = vpop.eup %2557  ;;  %v946_v60 = vsub.f32 %v901_v26, %v939_v57  ;;  %v947_v61 = vsub.f32 %v902_v33, %v939_v57  ;;  %v928_v62 = vmax.f32 %v926_v56, %v927_v58 }
 0x315   : > { %v2560_v63 = vpop.eup %2559  ;;  %v973_v2 = vsel %vm903_vm14, %v2558_v59, 0.0 }
 0x316   : > { %v974_v3 = vsel %vm903_vm14, %v2560_v63, 0.0  ;;  %v960_v4 = vmul.f32 1.442695, %v946_v60  ;;  %v962_v5 = vmul.f32 1.442695, %v947_v61  ;;  %v929_v6 = vrot.slane %v928_v62, 1 }
 0x317   : > { %v975_v7 = vadd.f32 %v974_v3, %v973_v2 }
 0x318   : > { %2561 = vpow2.f32 %v960_v4  ;;  %v930_v9 = vmax.f32 %v928_v62, %v929_v6 }
 0x319   : > { %v976_v10 = vrot.slane %v975_v7, 4  ;;  %2563 = vpow2.f32 %v962_v5 }
 0x31a   : > { %v944_v12 = vsub.f32 %v899_v41, %v930_v9  ;;  %v945_v13 = vsub.f32 %v900_v0, %v930_v9 }
 0x31b   : > { %v977_v14 = vadd.f32 %v976_v10, %v975_v7 }
 0x31c   : > { %v956_v16 = vmul.f32 1.442695, %v944_v12  ;;  %v958_v17 = vmul.f32 1.442695, %v945_v13 }
 0x31d   : > { %v978_v18 = vrot.slane %v977_v14, 2 }
 0x31e   : > { %v2562_v19 = vpop.eup %2561  ;;  %2565 = vpow2.f32 %v956_v16  ;;  %v2384_v16 = vld [vmem:[#allocation10 + $0x18] sm:$0xff] }
 0x31f   : > { %v2564_v20 = vpop.eup %2563  ;;  %v979_v21 = vadd.f32 %v978_v18, %v977_v14  ;;  %v991_v22 = vsel %vm903_vm14, %v2562_v19, 0.0  ;;  %2567 = vpow2.f32 %v958_v17  ;;  %1208 = vmatpush.bf16.msra.mxu2 %v2384_v16  ;;  %v2383_v17 = vld [vmem:[#allocation10 + $0x10] sm:$0xff]  ;;  %v2388_v18 = vld [vmem:[#allocation10 + $0x38] sm:$0xff] }
 0x320   : > { %v992_v23 = vsel %vm903_vm14, %v2564_v20, 0.0  ;;  %1276 = vmatpush.bf16.msrb.mxu0 %v2388_v18 }
 0x321   : > { %v980_v24 = vrot.slane %v979_v21, 1  ;;  %v993_v25 = vadd.f32 %v992_v23, %v991_v22 }
 0x323   : > { %v981_v26 = vadd.f32 %v980_v24, %v979_v21  ;;  %v994_v27 = vrot.slane %v993_v25, 4  ;;  %1209 = vmatpush.bf16.msra.mxu2 %v2383_v17  ;;  %v2385_v21 = vld [vmem:[#allocation10 + $0x20] sm:$0xff] }
 0x324   : > { %v2566_v28 = vpop.eup %2565 }
 0x325   : > { %v2568_v29 = vpop.eup %2567  ;;  %v995_v30 = vadd.f32 %v994_v27, %v993_v25  ;;  %v982_v31 = vsel %vm903_vm14, %v2566_v28, 0.0  ;;  %2569 = vrcp.f32 %v981_v26 }
 0x326   : > { %v983_v32 = vsel %vm903_vm14, %v2568_v29, 0.0 }
 0x327   : > { %v996_v33 = vrot.slane %v995_v30, 2  ;;  %v984_v34 = vadd.f32 %v983_v32, %v982_v31 }
 0x329   : > { %v997_v37 = vadd.f32 %v996_v33, %v995_v30  ;;  %v985_v38 = vrot.slane %v984_v34, 4 }
 0x32b   : > { %v2570_v11 = vpop.eup %2569  ;;  %v998_v15 = vrot.slane %v997_v37, 1  ;;  %v986_v39 = vadd.f32 %v985_v38, %v984_v34 }
 0x32c   : > { %v1006_v40 = vmul.f32 %v2570_v11, %v2558_v59  ;;  %v1007_v41 = vmul.f32 %v2570_v11, %v2560_v63 }
 0x32d   : > { %v999_v43 = vadd.f32 %v998_v15, %v997_v37  ;;  %v987_v1 = vrot.slane %v986_v39, 2 }
 0x32e   : > { %v1014_v0 = vpack.c.bf16 %v1006_v40, %v1006_v40  ;;  %v1015_v44 = vpack.c.bf16 %v1007_v41, %v1007_v41 }
 0x32f   : > { %2571 = vrcp.f32 %v999_v43  ;;  %v988_v45 = vadd.f32 %v987_v1, %v986_v39  ;;  %v1309_v43 = vpop.xlane.xlu2 %1308 }
 0x330   : > { %v1048_v46 = vunpack.c.l.b16 %v1014_v0  ;;  %v1049_v47 = vunpack.c.l.b16 %v1015_v44  ;;  %v1312_v1 = vmul.f32 %v1309_v43, %v3130_v8  ;;  %v1311_v0 = vpop.xlane.xlu1 %1310 }
 0x331   : > { %v989_v49 = vrot.slane %v988_v45, 1  ;;  %v1313_v44 = vmul.f32 %v1311_v0, %v3130_v8 }
 0x332   : > { %v1050_v50 = vpack.c.b16 %v1049_v47, %v1048_v46  ;;  %vm1321_vm15 = vcmp.eq.f32.partialorder %v1312_v1, inf  ;;  %vm1323_vm0 = vcmp.eq.f32.partialorder %v1312_v1, 0.0 }
 0x333   : > { %v990_v51 = vadd.f32 %v989_v49, %v988_v45  ;;  %vm1333_vm1 = vcmp.eq.f32.partialorder %v1313_v44, inf  ;;  %vm1335_vm2 = vcmp.eq.f32.partialorder %v1313_v44, 0.0 }
 0x334   : > { %2180 = vmatmul.msk.bf16.vlgmr.msrb.gmra.mxu2 %vm903_vm14, %v1050_v50 }
 0x335   : > { %v2572_v52 = vpop.eup %2571  ;;  %2573 = vrcp.f32 %v990_v51 }
 0x336   : > { %v1010_v53 = vmul.f32 %v2572_v52, %v2562_v19  ;;  %v1011_v54 = vmul.f32 %v2572_v52, %v2564_v20  ;;  %v2387_v19 = vld [vmem:[#allocation10 + $0x30] sm:$0xff]  ;;  %v2386_v20 = vld [vmem:[#allocation10 + $0x28] sm:$0xff]  ;;  %2575 = vrsqrt.f32 %v1312_v1 }
 0x337   : > { %1277 = vmatpush.bf16.msrb.mxu0 %v2387_v19  ;;  %1242 = vmatpush.bf16.msra.mxu3 %v2386_v20  ;;  %2577 = vrsqrt.f32 %v1313_v44 }
 0x338   : > { %v1019_v55 = vpack.c.bf16 %v1011_v54, %v1011_v54  ;;  %v1018_v56 = vpack.c.bf16 %v1010_v53, %v1010_v53 }
 0x33a   : > { %v1101_v57 = vunpack.c.l.b16 %v1019_v55  ;;  %v1100_v58 = vunpack.c.l.b16 %v1018_v56 }
 0x33b   : > { %v2574_v59 = vpop.eup %2573  ;;  %1243 = vmatpush.bf16.msra.mxu3 %v2385_v21 }
 0x33c   : > { %v1008_v60 = vmul.f32 %v2574_v59, %v2566_v28  ;;  %v1009_v61 = vmul.f32 %v2574_v59, %v2568_v29  ;;  %v1102_v62 = vpack.c.b16 %v1101_v57, %v1100_v58  ;;  %v2576_v45 = vpop.eup %2575  ;;  %v1324_v57 = vand.u32 2147483648, %v1312_v1 }
 0x33d   : > { %v1315_v46 = vmul.f32 %v2576_v45, %v1312_v1  ;;  %v2578_v48 = vpop.eup %2577 }
 0x33e   : > { %v1017_v63 = vpack.c.bf16 %v1009_v61, %v1009_v61  ;;  %2182 = vmatmul.msk.bf16.vlgmr.msra.gmra.mxu0 %vm903_vm14, %v1102_v62  ;;  %v1016_v2 = vpack.c.bf16 %v1008_v60, %v1008_v60  ;;  %v1327_v50 = vmul.f32 %v2578_v48, %v1313_v44 }
 0x33f   : > { %v1316_v47 = vmul.f32 %v2576_v45, %v1315_v46 }
 0x340   : > { %v1075_v3 = vunpack.c.l.b16 %v1017_v63  ;;  %v1074_v4 = vunpack.c.l.b16 %v1016_v2  ;;  %v1328_v52 = vmul.f32 %v2578_v48, %v1327_v50  ;;  %v1336_v63 = vand.u32 2147483648, %v1313_v44 }
 0x341   : > { %v1317_v49 = vmul.f32 0.5, %v1316_v47 }
 0x342   : > { %v1076_v5 = vpack.c.b16 %v1075_v3, %v1074_v4  ;;  %v1329_v54 = vmul.f32 0.5, %v1328_v52 }
 0x343   : > { %v1318_v51 = vsub.f32 1.5, %v1317_v49 }
 0x344   : > { %2181 = vmatmul.msk.bf16.vlgmr.msrb.gmra.mxu3 %vm903_vm14, %v1076_v5  ;;  %v1330_v56 = vsub.f32 1.5, %v1329_v54  ;;  %v2404_v54 = vld [vmem:[#allocation11 + $0x74] sm:$0xf0] }
 0x345   : > { %v1041_v6 = vpop.f32.mrf.mxu1  ;;  %v1319_v53 = vmul.f32 %v2576_v45, %v1318_v51 }
 0x346   : > { %v1124_v7 = vpack.c.bf16 %v1041_v6, %v1041_v6  ;;  %v1331_v58 = vmul.f32 %v2578_v48, %v1330_v56 }
 0x347   : > { %v1320_v55 = vmul.f32 %v1319_v53, %v1312_v1 }
 0x348   : > { %v1150_v12 = vunpack.c.l.b16 %v1124_v7  ;;  %v1332_v61 = vmul.f32 %v1331_v58, %v1313_v44 }
 0x349   : > { %v1322_v59 = vsel %vm1321_vm15, %v1312_v1, %v1320_v55  ;;  %v2403_v55 = vld [vmem:[#allocation11 + $0x74] sm:$0xf] }
 0x34a   : > { %v1325_v60 = vsel %vm1323_vm0, %v1324_v57, %v1322_v59  ;;  %v1334_v2 = vsel %vm1333_vm1, %v1313_v44, %v1332_v61  ;;  %v2279_v57 = vld [vmem:[#allocation11 + $0x78] sm:$0xf0]  ;;  %v2269_v59 = vld [vmem:[#allocation11 + $0x60] sm:$0xf]  ;;  %v2401_v61 = vld [vmem:[#allocation11 + $0x64] sm:$0xf] }
 0x34b   : > { %v1338_v62 = vadd.f32 0.001, %v1325_v60  ;;  %v1337_v3 = vsel %vm1335_vm2, %v1336_v63, %v1334_v2  ;;  %v2282_v58 = vor.u32 %v2403_v55, %v2279_v57  ;;  %v2402_v60 = vld [vmem:[#allocation11 + $0x64] sm:$0xf0]  ;;  %v2271_v63 = vld [vmem:[#allocation11 + $0x68] sm:$0xf0] }
 0x34c   : > { %v1339_v4 = vadd.f32 0.001, %v1337_v3  ;;  %v2274_v2 = vor.u32 %v2401_v61, %v2271_v63  ;;  %v2261_v3 = vld [vmem:[#allocation11 + $0x50] sm:$0xf] }
 0x34d   : > { %v1043_v9 = vpop.f32.mrf.mxu1  ;;  %2579 = vrcp.f32 %v1338_v62  ;;  %vm1345_vm3 = vweird.f32 %v1338_v62  ;;  %v1349_v17 = vand.u32 2147483647, %v1338_v62  ;;  %1555 = vmatpush.bf16.msrb.mxu2 %v2282_v58 }
 0x34e   : > { %v1125_v10 = vpack.c.bf16 %v1043_v9, %v1043_v9  ;;  %2581 = vrcp.f32 %v1339_v4  ;;  %vm1360_vm7 = vweird.f32 %v1339_v4 }
 0x34f   : > { %vm1350_vm6 = vcmp.eq.f32.partialorder %v1349_v17, 8.507059e+37 }
 0x350   : > { %v1151_v13 = vunpack.c.l.b16 %v1125_v10 }
 0x351   : > { %1556 = vmatpush.bf16.msrb.mxu2 %v2274_v2 }
 0x352   : > { %v1152_v14 = vpack.c.b16 %v1151_v13, %v1150_v12 }
 0x353   : > { %v2580_v5 = vpop.eup %2579 }
 0x354   : > { %2191 = vmatmul.msk.bf16.vlgmr.msra.gmra.mxu1 %vm796_vm13, %v1152_v14  ;;  %v1341_v6 = vmul.f32 %v2580_v5, %v1338_v62  ;;  %v2582_v9 = vpop.eup %2581  ;;  %vm1346_vm4 = vweird.f32 %v2580_v5  ;;  %v1351_v14 = vand.u32 2147483648, %v1338_v62  ;;  %v2270_v62 = vor.u32 %v2402_v60, %v2269_v59 }
 0x355   : > { %v1356_v12 = vmul.f32 %v2582_v9, %v1339_v4  ;;  %vm1347_vm5 = vmor %vm1345_vm3, %vm1346_vm4  ;;  %vm1361_vm8 = vweird.f32 %v2582_v9 }
 0x356   : > { %v1342_v7 = vsub.f32 1.0, %v1341_v6  ;;  %v1352_v20 = vor.u32 1.1754944e-38, %v1351_v14  ;;  %vm1362_vm9 = vmor %vm1360_vm7, %vm1361_vm8  ;;  %v2255_v14 = vld [vmem:[#allocation11 + $0x48] sm:$0xf0] }
 0x357   : > { %v1357_v18 = vsub.f32 1.0, %v1356_v12 }
 0x358   : > { %v1343_v10 = vmul.f32 %v2580_v5, %v1342_v7  ;;  %v2263_v7 = vld [vmem:[#allocation11 + $0x58] sm:$0xf0] }
 0x35a   : > { %v1344_v16 = vadd.f32 %v2580_v5, %v1343_v10  ;;  %v2398_v10 = vld [vmem:[#allocation11 + $0x44] sm:$0xf0] }
 0x3b7   : > { %v1067_v22 = vpop.f32.mrf.mxu2 }
 0x3b8   : > { %v1126_v24 = vpack.c.bf16 %v1067_v22, %v1067_v22  ;;  %v1348_v22 = vsel %vm1347_vm5, %v2580_v5, %v1344_v16  ;;  %v2399_v5 = vld [vmem:[#allocation11 + $0x54] sm:$0xf] }
 0x3b9   : > { %v2266_v12 = vor.u32 %v2399_v5, %v2263_v7 }
 0x3ba   : > { %v1184_v27 = vunpack.c.l.b16 %v1126_v24 }
 0x3bb   : > { %v1119_v23 = vpop.f32.mrf.mxu0  ;;  %1557 = vmatpush.bf16.msrb.mxu2 %v2266_v12 }
 0x3bc   : > { %v1130_v28 = vpack.c.bf16 %v1119_v23, %v1119_v23  ;;  %v1358_v23 = vmul.f32 %v2582_v9, %v1357_v18 }
 0x3be   : > { %v1252_v33 = vunpack.c.l.b16 %v1130_v28  ;;  %v1353_v28 = vsel %vm1350_vm6, %v1352_v20, %v1348_v22  ;;  %v2245_v20 = vld [vmem:[#allocation11 + $0x30] sm:$0xf]  ;;  %v2395_v22 = vld [vmem:[#allocation11 + $0x34] sm:$0xf] }
 0x3bf   : > { %v1069_v25 = vpop.f32.mrf.mxu2 }
 0x3c0   : > { %v1127_v26 = vpack.c.bf16 %v1069_v25, %v1069_v25 }
 0x3c2   : > { %v1185_v29 = vunpack.c.l.b16 %v1127_v26 }
 0x3c3   : > { %v1121_v30 = vpop.f32.mrf.mxu0 }
 0x3c4   : > { %v1186_v31 = vpack.c.b16 %v1185_v29, %v1184_v27  ;;  %v1131_v32 = vpack.c.bf16 %v1121_v30, %v1121_v30  ;;  %v2540_v27 = vld [vmem:[%s3386_s5] ss:$0 sm:$0xff]  ;;  %v1366_v29 = vand.u32 2147483648, %v1339_v4 }
 0x3c6   : > { %v1253_v34 = vunpack.c.l.b16 %v1131_v32  ;;  %2200 = vmatmul.msk.bf16.vlgmr.msra.gmra.mxu2 %vm796_vm13, %v1186_v31  ;;  %v1359_v31 = vadd.f32 %v2582_v9, %v1358_v23  ;;  %v1364_v32 = vand.u32 2147483647, %v1339_v4  ;;  %v2400_v4 = vld [vmem:[#allocation11 + $0x54] sm:$0xf0]  ;;  %v2247_v23 = vld [vmem:[#allocation11 + $0x38] sm:$0xf0] }
 0x3c7   : > { %v1093_v37 = vpop.f32.mrf.mxu3  ;;  %v2262_v6 = vor.u32 %v2400_v4, %v2261_v3 }
 0x3c8   : > { %v1254_v38 = vpack.c.b16 %v1253_v34, %v1252_v33  ;;  %v1128_v11 = vpack.c.bf16 %v1093_v37, %v1093_v37  ;;  %v1354_v37 = vmul.f32 %v1353_v28, %v3183_v36  ;;  %vm1365_vm10 = vcmp.eq.f32.partialorder %v1364_v32, 8.507059e+37  ;;  %v2393_v28 = vld [vmem:[#allocation11 + $0x24] sm:$0xf] }
 0x3ca   : > { %2218 = vmatmul.msk.bf16.vlgmr.msrb.gmra.mxu0 %vm796_vm13, %v1254_v38  ;;  %v1218_v40 = vunpack.c.l.b16 %v1128_v11  ;;  %v1367_v11 = vor.u32 1.1754944e-38, %v1366_v29  ;;  %v2239_v29 = vld [vmem:[#allocation11 + $0x28] sm:$0xf0] }
 0x3cf   : > { %v1095_v15 = vpop.f32.mrf.mxu3 }
 0x3d0   : > { %v1129_v39 = vpack.c.bf16 %v1095_v15, %v1095_v15 }
 0x3d1   : > { %v1177_v19 = vpop.f32.mrf.mxu1 }
 0x3d2   : > { %v1219_v41 = vunpack.c.l.b16 %v1129_v39 }
 0x3d4   : > { %v1220_v42 = vpack.c.b16 %v1219_v41, %v1218_v40  ;;  %v1363_v40 = vsel %vm1362_vm9, %v2582_v9, %v1359_v31  ;;  %v2253_v9 = vld [vmem:[#allocation11 + $0x40] sm:$0xf] }
 0x3d5   : > { %v1368_v1 = vsel %vm1365_vm10, %v1367_v11, %v1363_v40  ;;  %v2254_v17 = vor.u32 %v2398_v10, %v2253_v9 }
 0x3d6   : > { %2209 = vmatmul.msk.bf16.vlgmr.msra.gmra.mxu3 %vm796_vm13, %v1220_v42  ;;  %v1369_v45 = vmul.f32 %v1368_v1, %v3180_v35  ;;  %v2277_v35 = vld [vmem:[#allocation11 + $0x70] sm:$0xf]  ;;  %v2390_v1 = vld [vmem:[#allocation11 + $0x4] sm:$0xf0] }
 0x3d7   : > { %v2278_v56 = vor.u32 %v2404_v54, %v2277_v35 }
 0x3d9   : > { %v1179_v38 = vpop.f32.mrf.mxu1  ;;  %1541 = vmatpush.bf16.msrb.mxu1 %v2278_v56 }
 0x3dd   : > { %1542 = vmatpush.bf16.msrb.mxu1 %v2270_v62 }
 0x3e1   : > { %1543 = vmatpush.bf16.msrb.mxu1 %v2262_v6 }
 0x3e5   : > { %1544 = vmatpush.bf16.msrb.mxu1 %v2254_v17 }
 0x447   : > { %v1279_v24 = vpop.f32.mrf.mxu0 }
 0x449   : > { %v1211_v13 = vpop.f32.mrf.mxu2 }
 0x44a   : > { %v1284_v21 = vadd.f32 %v1211_v13, %v1177_v19  ;;  %v2397_v13 = vld [vmem:[#allocation11 + $0x44] sm:$0xf] }
 0x44b   : > { %v2258_v19 = vor.u32 %v2397_v13, %v2255_v14 }
 0x44d   : > { %1558 = vmatpush.bf16.msrb.mxu2 %v2258_v19 }
 0x44f   : > { %v1281_v43 = vpop.f32.mrf.mxu0 }
 0x451   : > { %v1213_v33 = vpop.f32.mrf.mxu2 }
 0x452   : > { %v1287_v15 = vadd.f32 %v1213_v33, %v1179_v38  ;;  %v2392_v38 = vld [vmem:[#allocation11 + $0x14] sm:$0xf0] }
 0x459   : > { %v1245_v25 = vpop.f32.mrf.mxu3 }
 0x45a   : > { %v1285_v26 = vadd.f32 %v1284_v21, %v1245_v25  ;;  %v2396_v21 = vld [vmem:[#allocation11 + $0x34] sm:$0xf0]  ;;  %v2250_v25 = vor.u32 %v2395_v22, %v2247_v23 }
 0x45c   : > { %v1286_v30 = vadd.f32 %v1285_v26, %v1279_v24  ;;  %v2246_v24 = vor.u32 %v2396_v21, %v2245_v20  ;;  %v2237_v26 = vld [vmem:[#allocation11 + $0x20] sm:$0xf]  ;;  %1559 = vmatpush.bf16.msrb.mxu2 %v2250_v25 }
 0x45e   : > { %v1294_v34 = vadd.f32 %v2540_v27, %v1286_v30  ;;  %1545 = vmatpush.bf16.msrb.mxu1 %v2246_v24 }
 0x460   : > { %v1370_v39 = vadd.f32 %v1354_v37, %v1294_v34  ;;  %v2242_v34 = vor.u32 %v2393_v28, %v2239_v29  ;;  %v2229_v37 = vld [vmem:[#allocation11 + $0x10] sm:$0xf]  ;;  %v2905_v29 = vmov 1.4142135  }
 0x461   : > { %v1247_v41 = vpop.f32.mrf.mxu3 }
 0x462   : > { %v1288_v42 = vadd.f32 %v1287_v15, %v1247_v41  ;;  %1372 = vadd.xlane.f32.xlu0 %v1370_v39  ;;  %v2391_v15 = vld [vmem:[#allocation11 + $0x14] sm:$0xf]  ;;  %v2230_v41 = vor.u32 %v2392_v38, %v2229_v37  ;;  %1560 = vmatpush.bf16.msrb.mxu2 %v2242_v34 }
 0x464   : > { %v1289_v0 = vadd.f32 %v1288_v42, %v1281_v43  ;;  %v2221_v43 = vld [vmem:[#allocation11] sm:$0xf] }
 0x466   : > { %v1295_v44 = vadd.f32 %v2540_v27, %v1289_v0  ;;  %v2394_v27 = vld [vmem:[#allocation11 + $0x24] sm:$0xf0] }
 0x467   : > { %v2238_v31 = vor.u32 %v2394_v27, %v2237_v26 }
 0x468   : > { %v1371_v46 = vadd.f32 %v1369_v45, %v1295_v44  ;;  %v2389_v44 = vld [vmem:[#allocation11 + $0x4] sm:$0xf]  ;;  %v2223_v45 = vld [vmem:[#allocation11 + $0x8] sm:$0xf0] }
 0x469   : > { %1546 = vmatpush.bf16.msrb.mxu1 %v2238_v31 }
 0x46a   : > { %1374 = vadd.xlane.f32.xlu2 %v1371_v46 }
 0x46d   : > { %1547 = vmatpush.bf16.msrb.mxu1 %v2230_v41 }
 0x4d5   : > { %v1373_v47 = vpop.xlane.xlu0 %1372 }
 0x4d6   : > { %v1376_v36 = vmul.f32 %v1373_v47, %v3130_v8 }
 0x4d8   : > { %v3214_v48 = vsub.f32 %v1370_v39, %v1376_v36  ;;  %v2231_v39 = vld [vmem:[#allocation11 + $0x18] sm:$0xf0]  ;;  %v2226_v36 = vor.u32 %v2389_v44, %v2223_v45  ;;  %v2411_v45 = vld [vmem:[#allocation13 + $0x30] sm:$0xff] }
 0x4d9   : > { %v2234_v42 = vor.u32 %v2391_v15, %v2231_v39  ;;  %v2412_v15 = vld [vmem:[#allocation13 + $0x38] sm:$0xff] }
 0x4da   : > { %v1380_v49 = vmul.f32 %v3214_v48, %v3214_v48  ;;  %1882 = vmatpush.bf16.msrb.mxu3 %v2412_v15 }
 0x4db   : > { %1561 = vmatpush.bf16.msrb.mxu2 %v2234_v42 }
 0x4dc   : > { %1382 = vadd.xlane.f32.xlu1 %v1380_v49 }
 0x4dd   : > { %v1375_v50 = vpop.xlane.xlu2 %1374 }
 0x4de   : > { %v1377_v51 = vmul.f32 %v1375_v50, %v3130_v8  ;;  %1883 = vmatpush.bf16.msrb.mxu3 %v2411_v45 }
 0x4df   : > { %1562 = vmatpush.bf16.msrb.mxu2 %v2226_v36  ;;  %v2420_v36 = vld [vmem:[#allocation13 + $0x78] sm:$0xff] }
 0x4e0   : > { %v3219_v52 = vsub.f32 %v1371_v46, %v1377_v51  ;;  %1896 = vmatpush.bf16.msra.mxu0 %v2420_v36 }
 0x4e2   : > { %v1381_v53 = vmul.f32 %v3219_v52, %v3219_v52 }
 0x4e4   : > { %1384 = vadd.xlane.f32.xlu0 %v1381_v53 }
 0x54f   : > { %v1383_v16 = vpop.xlane.xlu1 %1382 }
 0x550   : > { %v1386_v18 = vmul.f32 %v1383_v16, %v3130_v8 }
 0x552   : > { %2583 = vrsqrt.f32 %v1386_v18  ;;  %vm1395_vm11 = vcmp.eq.f32.partialorder %v1386_v18, inf  ;;  %v1398_v35 = vand.u32 2147483648, %v1386_v18  ;;  %vm1397_vm12 = vcmp.eq.f32.partialorder %v1386_v18, 0.0 }
 0x557   : > { %v1385_v30 = vpop.xlane.xlu0 %1384 }
 0x558   : > { %v2584_v32 = vpop.eup %2583  ;;  %v1387_v33 = vmul.f32 %v1385_v30, %v3130_v8  ;;  %v2222_v8 = vor.u32 %v2390_v1, %v2221_v43 }
 0x559   : > { %v1389_v11 = vmul.f32 %v2584_v32, %v1386_v18 }
 0x55a   : > { %2585 = vrsqrt.f32 %v1387_v33  ;;  %1548 = vmatpush.bf16.msrb.mxu1 %v2222_v8  ;;  %vm1407_vm13 = vcmp.eq.f32.partialorder %v1387_v33, inf  ;;  %v1410_v61 = vand.u32 2147483648, %v1387_v33  ;;  %vm1409_vm14 = vcmp.eq.f32.partialorder %v1387_v33, 0.0 }
 0x55b   : > { %v1390_v40 = vmul.f32 %v2584_v32, %v1389_v11 }
 0x55d   : > { %v1391_v0 = vmul.f32 0.5, %v1390_v40 }
 0x55f   : > { %v1392_v46 = vsub.f32 1.5, %v1391_v0 }
 0x560   : > { %v2586_v47 = vpop.eup %2585 }
 0x561   : > { %v1393_v49 = vmul.f32 %v2584_v32, %v1392_v46  ;;  %v1401_v50 = vmul.f32 %v2586_v47, %v1387_v33 }
 0x563   : > { %v1394_v51 = vmul.f32 %v1393_v49, %v1386_v18  ;;  %v1402_v53 = vmul.f32 %v2586_v47, %v1401_v50 }
 0x565   : > { %v1396_v54 = vsel %vm1395_vm11, %v1386_v18, %v1394_v51  ;;  %v1403_v55 = vmul.f32 0.5, %v1402_v53 }
 0x566   : > { %v1399_v56 = vsel %vm1397_vm12, %v1398_v35, %v1396_v54 }
 0x567   : > { %v1404_v57 = vsub.f32 1.5, %v1403_v55  ;;  %v1412_v58 = vadd.f32 0.001, %v1399_v56  ;;  %v2410_v55 = vld [vmem:[#allocation13 + $0x28] sm:$0xff] }
 0x568   : > { %1884 = vmatpush.bf16.msrb.mxu3 %v2410_v55 }
 0x569   : > { %v1405_v59 = vmul.f32 %v2586_v47, %v1404_v57  ;;  %2587 = vrcp.f32 %v1412_v58  ;;  %v1425_v12 = vand.u32 2147483648, %v1412_v58  ;;  %vm1419_vm0 = vweird.f32 %v1412_v58 }
 0x56a   : > { %v1423_v13 = vand.u32 2147483647, %v1412_v58 }
 0x56b   : > { %v1406_v60 = vmul.f32 %v1405_v59, %v1387_v33  ;;  %v1426_v20 = vor.u32 1.1754944e-38, %v1425_v12  ;;  %v2418_v12 = vld [vmem:[#allocation13 + $0x68] sm:$0xff] }
 0x56c   : > { %vm1424_vm3 = vcmp.eq.f32.partialorder %v1423_v13, 8.507059e+37 }
 0x56d   : > { %v1408_v62 = vsel %vm1407_vm13, %v1387_v33, %v1406_v60 }
 0x56e   : > { %v1411_v63 = vsel %vm1409_vm14, %v1410_v61, %v1408_v62 }
 0x56f   : > { %v2588_v2 = vpop.eup %2587  ;;  %v1413_v3 = vadd.f32 0.001, %v1411_v63 }
 0x570   : > { %v1415_v4 = vmul.f32 %v2588_v2, %v1412_v58  ;;  %vm1420_vm15 = vweird.f32 %v2588_v2  ;;  %v2419_v58 = vld [vmem:[#allocation13 + $0x70] sm:$0xff] }
 0x571   : > { %2589 = vrcp.f32 %v1413_v3  ;;  %vm1421_vm1 = vmor %vm1419_vm0, %vm1420_vm15  ;;  %v1440_v16 = vand.u32 2147483648, %v1413_v3  ;;  %v1438_v19 = vand.u32 2147483647, %v1413_v3  ;;  %vm1434_vm4 = vweird.f32 %v1413_v3  ;;  %1897 = vmatpush.bf16.msra.mxu0 %v2419_v58 }
 0x572   : > { %v1416_v5 = vsub.f32 1.0, %v1415_v4  ;;  %2591 = vrcp.f32 %v2905_v29 }
 0x573   : > { %v1441_v23 = vor.u32 1.1754944e-38, %v1440_v16  ;;  %vm1439_vm6 = vcmp.eq.f32.partialorder %v1438_v19, 8.507059e+37 }
 0x574   : > { %v1417_v6 = vmul.f32 %v2588_v2, %v1416_v5 }
 0x575   : > { %1898 = vmatpush.bf16.msra.mxu0 %v2418_v12 }
 0x576   : > { %v1418_v9 = vadd.f32 %v2588_v2, %v1417_v6 }
 0x577   : > { %v2590_v7 = vpop.eup %2589 }
 0x578   : > { %v1430_v10 = vmul.f32 %v2590_v7, %v1413_v3  ;;  %v1422_v17 = vsel %vm1421_vm1, %v2588_v2, %v1418_v9  ;;  %vm1435_vm2 = vweird.f32 %v2590_v7  ;;  %v2592_v30 = vpop.eup %2591  ;;  %v2409_v3 = vld [vmem:[#allocation13 + $0x20] sm:$0xff] }
 0x579   : > { %v1427_v22 = vsel %vm1424_vm3, %v1426_v20, %v1422_v17  ;;  %vm1436_vm5 = vmor %vm1434_vm4, %vm1435_vm2  ;;  %v1574_v31 = vmul.f32 1.4142135, %v2592_v30  ;;  %vm1578_vm7 = vweird.f32 %v2592_v30  ;;  %1885 = vmatpush.bf16.msrb.mxu3 %v2409_v3  ;;  %v2408_v20 = vld [vmem:[#allocation13 + $0x18] sm:$0xff]  ;;  %v2405_v3 = vld [vmem:[#allocation13] sm:$0xff] }
 0x57a   : > { %v1431_v14 = vsub.f32 1.0, %v1430_v10  ;;  %v3226_v26 = vmul.f32 %v1427_v22, %v3214_v48 }
 0x57b   : > { %v1575_v32 = vsub.f32 1.0, %v1574_v31 }
 0x57c   : > { %v1432_v18 = vmul.f32 %v2590_v7, %v1431_v14 }
 0x57d   : > { %v1576_v33 = vmul.f32 %v2592_v30, %v1575_v32  ;;  %1886 = vmatpush.bf16.msrb.mxu3 %v2408_v20 }
 0x57e   : > { %v1433_v21 = vadd.f32 %v2590_v7, %v1432_v18 }
 0x57f   : > { %v1577_v34 = vadd.f32 %v2592_v30, %v1576_v33 }
 0x580   : > { %v1437_v24 = vsel %vm1436_vm5, %v2590_v7, %v1433_v21 }
 0x581   : > { %v1442_v25 = vsel %vm1439_vm6, %v1441_v23, %v1437_v24  ;;  %v1579_v37 = vsel %vm1578_vm7, %v2592_v30, %v1577_v34  ;;  %v2417_v30 = vld [vmem:[#allocation13 + $0x60] sm:$0xff] }
 0x582   : > { %v3229_v27 = vmul.f32 %v1442_v25, %v3219_v52  ;;  %1899 = vmatpush.bf16.msra.mxu0 %v2417_v30 }
 0x584   : > { %v1444_v28 = vpack.c.bf16 %v3229_v27, %v3226_v26 }
 0x586   : > { %1549 = vmatmul.bf16.vlgmr.msrb.gmra.mxu1 %v1444_v28  ;;  %1563 = vmatmul.bf16.vlgmr.msrb.gmra.mxu2 %v1444_v28 }
 0x603   : > { %v3233_v38 = vpop.f32.mrf.mxu1 }
 0x604   : > { %v3236_v48 = vmul.f32 %v1579_v37, %v3233_v38 }
 0x606   : > { %v1584_v52 = vmul.f32 %v3236_v48, %v3236_v48 }
 0x608   : > { %v3240_v11 = vmin.f32 %v1584_v52, 16.0  ;;  %v2407_v52 = vld [vmem:[#allocation13 + $0x10] sm:$0xff] }
 0x609   : > { %v3242_v39 = vpop.f32.mrf.mxu2  ;;  %1887 = vmatpush.bf16.msrb.mxu3 %v2407_v52 }
 0x60a   : > { %v1586_v40 = vmul.f32 2.1237322e-06, %v3240_v11  ;;  %v1597_v41 = vmul.f32 3.8918573e-05, %v3240_v11  ;;  %v3247_v42 = vmul.f32 %v1579_v37, %v3242_v39 }
 0x60b   : > { %v3249_v43 = vpop.f32.mrf.mxu1 }
 0x60c   : > { %v1587_v1 = vadd.f32 0.00028619796, %v1586_v40  ;;  %v1598_v0 = vadd.f32 0.001143296, %v1597_v41  ;;  %v1624_v44 = vmul.f32 %v3247_v42, %v3247_v42  ;;  %v3254_v46 = vmul.f32 %v1579_v37, %v3249_v43 }
 0x60e   : > { %v1599_v8 = vmul.f32 %v1598_v0, %v3240_v11  ;;  %v3257_v47 = vmin.f32 %v1624_v44, 16.0  ;;  %v1664_v49 = vmul.f32 %v3254_v46, %v3254_v46  ;;  %v1588_v50 = vmul.f32 %v1587_v1, %v3240_v11  ;;  %v2416_v44 = vld [vmem:[#allocation13 + $0x58] sm:$0xff] }
 0x60f   : > { %1900 = vmatpush.bf16.msra.mxu0 %v2416_v44 }
 0x610   : > { %v1600_v51 = vadd.f32 0.014752088, %v1599_v8  ;;  %v1637_v53 = vmul.f32 3.8918573e-05, %v3257_v47  ;;  %v3263_v35 = vmin.f32 %v1664_v49, 16.0  ;;  %v2406_v49 = vld [vmem:[#allocation13 + $0x8] sm:$0xff] }
 0x611   : > { %v3265_v54 = vpop.f32.mrf.mxu2  ;;  %v1626_v57 = vmul.f32 2.1237322e-06, %v3257_v47  ;;  %v1589_v63 = vadd.f32 0.0036580483, %v1588_v50  ;;  %1888 = vmatpush.bf16.msrb.mxu3 %v2406_v49 }
 0x612   : > { %v1601_v56 = vmul.f32 %v1600_v51, %v3240_v11  ;;  %v1638_v59 = vadd.f32 0.001143296, %v1637_v53  ;;  %v1666_v60 = vmul.f32 2.1237322e-06, %v3263_v35  ;;  %v1677_v61 = vmul.f32 3.8918573e-05, %v3263_v35 }
 0x613   : > { %v3272_v62 = vmul.f32 %v1579_v37, %v3265_v54  ;;  %v1627_v10 = vadd.f32 0.00028619796, %v1626_v57  ;;  %v1590_v18 = vmul.f32 %v1589_v63, %v3240_v11 }
 0x614   : > { %v1602_v2 = vadd.f32 0.112945676, %v1601_v56  ;;  %v1639_v4 = vmul.f32 %v1638_v59, %v3257_v47  ;;  %v1667_v5 = vadd.f32 0.00028619796, %v1666_v60  ;;  %v1678_v6 = vadd.f32 0.001143296, %v1677_v61 }
 0x615   : > { %v1704_v7 = vmul.f32 %v3272_v62, %v3272_v62  ;;  %v1628_v28 = vmul.f32 %v1627_v10, %v3257_v47  ;;  %v1591_v33 = vadd.f32 0.05243302, %v1590_v18  ;;  %v2415_v59 = vld [vmem:[#allocation13 + $0x50] sm:$0xff]  ;;  %v2414_v10 = vld [vmem:[#allocation13 + $0x48] sm:$0xff]  ;;  %1889 = vmatpush.bf16.msrb.mxu3 %v2405_v3 }
 0x616   : > { %v1603_v9 = vmul.f32 %v1602_v2, %v3240_v11  ;;  %v1640_v13 = vadd.f32 0.014752088, %v1639_v4  ;;  %v1668_v14 = vmul.f32 %v1667_v5, %v3263_v35  ;;  %v1679_v16 = vmul.f32 %v1678_v6, %v3263_v35  ;;  %1901 = vmatpush.bf16.msra.mxu0 %v2415_v59 }
 0x617   : > { %v3280_v17 = vmin.f32 %v1704_v7, 16.0  ;;  %v1629_v0 = vadd.f32 0.0036580483, %v1628_v28  ;;  %v1592_v50 = vmul.f32 %v1591_v33, %v3240_v11 }
 0x618   : > { %v1604_v19 = vadd.f32 0.4994258, %v1603_v9  ;;  %v1641_v21 = vmul.f32 %v1640_v13, %v3257_v47  ;;  %v1669_v22 = vadd.f32 0.0036580483, %v1668_v14  ;;  %v1680_v23 = vadd.f32 0.014752088, %v1679_v16 }
 0x619   : > { %v1706_v24 = vmul.f32 2.1237322e-06, %v3280_v17  ;;  %v1717_v29 = vmul.f32 3.8918573e-05, %v3280_v17  ;;  %v1630_v56 = vmul.f32 %v1629_v0, %v3257_v47  ;;  %v1593_v4 = vadd.f32 0.18741608, %v1592_v50 }
 0x61a   : > { %v1605_v25 = vmul.f32 %v1604_v19, %v3240_v11  ;;  %v1642_v31 = vadd.f32 0.112945676, %v1641_v21  ;;  %v1681_v32 = vmul.f32 %v1680_v23, %v3263_v35  ;;  %v1670_v40 = vmul.f32 %v1669_v22, %v3263_v35  ;;  %1902 = vmatpush.bf16.msra.mxu0 %v2414_v10  ;;  %v2413_v23 = vld [vmem:[#allocation13 + $0x40] sm:$0xff] }
 0x61b   : > { %v1718_v37 = vadd.f32 0.001143296, %v1717_v29  ;;  %v1707_v1 = vadd.f32 0.00028619796, %v1706_v24  ;;  %v1631_v7 = vadd.f32 0.05243302, %v1630_v56  ;;  %v1594_v16 = vmul.f32 %v1593_v4, %v3240_v11 }
 0x61c   : > { %v3289_v34 = vadd.f32 1.0, %v1605_v25  ;;  %v1643_v15 = vmul.f32 %v1642_v31, %v3257_v47  ;;  %v1682_v41 = vadd.f32 0.112945676, %v1681_v32  ;;  %v1671_v53 = vadd.f32 0.05243302, %v1670_v40 }
 0x61d   : > { %v1719_v36 = vmul.f32 %v1718_v37, %v3280_v17  ;;  %v1708_v55 = vmul.f32 %v1707_v1, %v3280_v17  ;;  %v1632_v20 = vmul.f32 %v1631_v7, %v3257_v47  ;;  %v1595_v30 = vadd.f32 1.1283791, %v1594_v16 }
 0x61e   : > { %2593 = vrcp.f32 %v3289_v34  ;;  %v1644_v45 = vadd.f32 0.4994258, %v1643_v15  ;;  %v1683_v8 = vmul.f32 %v1682_v41, %v3263_v35  ;;  %v1672_v9 = vmul.f32 %v1671_v53, %v3263_v35  ;;  %1903 = vmatpush.bf16.msra.mxu0 %v2413_v23 }
 0x61f   : > { %v1720_v58 = vadd.f32 0.014752088, %v1719_v36  ;;  %v1709_v6 = vadd.f32 0.0036580483, %v1708_v55  ;;  %v1618_v28 = vand.u32 2147483648, %v3289_v34  ;;  %vm1612_vm9 = vweird.f32 %v3289_v34 }
 0x620   : > { %v1645_v51 = vmul.f32 %v1644_v45, %v3257_v47  ;;  %v1684_v57 = vadd.f32 0.4994258, %v1683_v8  ;;  %v1673_v21 = vadd.f32 0.18741608, %v1672_v9  ;;  %v1616_v11 = vand.u32 2147483647, %v3289_v34 }
 0x621   : > { %v1721_v2 = vmul.f32 %v1720_v58, %v3280_v17  ;;  %v1710_v19 = vmul.f32 %v1709_v6, %v3280_v17  ;;  %v1633_v37 = vadd.f32 0.18741608, %v1632_v20  ;;  %v1619_v41 = vor.u32 1.1754944e-38, %v1618_v28 }
 0x622   : > { %v3300_v60 = vadd.f32 1.0, %v1645_v51  ;;  %v1685_v63 = vmul.f32 %v1684_v57, %v3263_v35  ;;  %v1674_v15 = vmul.f32 %v1673_v21, %v3263_v35  ;;  %vm1617_vm11 = vcmp.eq.f32.partialorder %v1616_v11, 8.507059e+37 }
 0x623   : > { %v1722_v14 = vadd.f32 0.112945676, %v1721_v2  ;;  %v1711_v31 = vadd.f32 0.05243302, %v1710_v19  ;;  %v1596_v36 = vmul.f32 %v1595_v30, %v3236_v48  ;;  %v1634_v49 = vmul.f32 %v1633_v37, %v3257_v47 }
 0x624   : > { %v2594_v61 = vpop.eup %2593  ;;  %2595 = vrcp.f32 %v3300_v60  ;;  %v3307_v13 = vadd.f32 1.0, %v1685_v63  ;;  %v1675_v50 = vadd.f32 1.1283791, %v1674_v15  ;;  %vm1652_vm14 = vweird.f32 %v3300_v60 }
 0x625   : > { %v1608_v5 = vmul.f32 %v2594_v61, %v3289_v34  ;;  %vm1613_vm8 = vweird.f32 %v2594_v61  ;;  %v1723_v22 = vmul.f32 %v1722_v14, %v3280_v17  ;;  %v1712_v45 = vmul.f32 %v1711_v31, %v3280_v17 }
 0x626   : > { %2597 = vrcp.f32 %v3307_v13  ;;  %vm1614_vm10 = vmor %vm1612_vm9, %vm1613_vm8  ;;  %v1696_v35 = vand.u32 2147483647, %v3307_v13  ;;  %v1698_v53 = vand.u32 2147483648, %v3307_v13  ;;  %v1658_v58 = vand.u32 2147483648, %v3300_v60 }
 0x627   : > { %v1609_v12 = vsub.f32 1.0, %v1608_v5  ;;  %v1724_v32 = vadd.f32 0.4994258, %v1723_v22  ;;  %v1713_v59 = vadd.f32 0.18741608, %v1712_v45  ;;  %vm1692_vm0 = vweird.f32 %v3307_v13 }
 0x628   : > { %v1656_v47 = vand.u32 2147483647, %v3300_v60  ;;  %v1635_v63 = vadd.f32 1.1283791, %v1634_v49  ;;  %v1676_v2 = vmul.f32 %v1675_v50, %v3254_v46  ;;  %v1699_v3 = vor.u32 1.1754944e-38, %v1698_v53 }
 0x629   : > { %v1610_v18 = vmul.f32 %v2594_v61, %v1609_v12  ;;  %v1725_v1 = vmul.f32 %v1724_v32, %v3280_v17  ;;  %vm1697_vm2 = vcmp.eq.f32.partialorder %v1696_v35, 8.507059e+37  ;;  %v1659_v9 = vor.u32 1.1754944e-38, %v1658_v58 }
 0x62a   : > { %v2596_v24 = vpop.eup %2595  ;;  %v1714_v12 = vmul.f32 %v1713_v59, %v3280_v17  ;;  %vm1657_vm3 = vcmp.eq.f32.partialorder %v1656_v47, 8.507059e+37  ;;  %v1571_v21 = vmul.f32 0.5, %v3249_v43 }
 0x62b   : > { %v1611_v25 = vadd.f32 %v2594_v61, %v1610_v18  ;;  %v1648_v29 = vmul.f32 %v2596_v24, %v3300_v60  ;;  %v1726_v8 = vadd.f32 1.0, %v1725_v1  ;;  %vm1653_vm12 = vweird.f32 %v2596_v24 }
 0x62c   : > { %v2598_v40 = vpop.eup %2597  ;;  %vm3328_vm15 = vmor %vm1652_vm14, %vm1653_vm12  ;;  %v1636_v18 = vmul.f32 %v1635_v63, %v3247_v42  ;;  %v1715_v22 = vadd.f32 1.1283791, %v1714_v12 }
 0x62d   : > { %v1615_v33 = vsel %vm1614_vm10, %v2594_v61, %v1611_v25  ;;  %v1649_v52 = vsub.f32 1.0, %v1648_v29  ;;  %v1688_v34 = vmul.f32 %v2598_v40, %v3307_v13  ;;  %2599 = vrcp.f32 %v1726_v8 }
 0x62e   : > { %v1620_v44 = vsel %vm1617_vm11, %v1619_v41, %v1615_v33  ;;  %vm1693_vm13 = vweird.f32 %v2598_v40  ;;  %v1569_v13 = vmul.f32 0.5, %v3233_v38  ;;  %v1736_v23 = vand.u32 2147483647, %v1726_v8 }
 0x62f   : > { %v1650_v0 = vmul.f32 %v2596_v24, %v1649_v52  ;;  %v1689_v51 = vsub.f32 1.0, %v1688_v34  ;;  %v1621_v55 = vmul.f32 %v1620_v44, %v1596_v36  ;;  %vm1694_vm1 = vmor %vm1692_vm0, %vm1693_vm13  ;;  %vm1732_vm5 = vweird.f32 %v1726_v8 }
 0x630   : > { %v1716_v38 = vmul.f32 %v1715_v22, %v3272_v62  ;;  %vm1737_vm7 = vcmp.eq.f32.partialorder %v1736_v23, 8.507059e+37  ;;  %v1572_v41 = vmul.f32 0.5, %v3265_v54 }
 0x631   : > { %v1651_v56 = vadd.f32 %v2596_v24, %v1650_v0  ;;  %v1690_v57 = vmul.f32 %v2598_v40, %v1689_v51  ;;  %v2283_v4 = vclamps-f32 %v1621_v55, 1.0 }
 0x633   : > { %v1691_v61 = vadd.f32 %v2598_v40, %v1690_v57  ;;  %v1655_v5 = vsel %vm3328_vm15, %v2596_v24, %v1651_v56  ;;  %v2600_v7 = vpop.eup %2599  ;;  %v1744_v46 = vadd.f32 1.0, %v2283_v4  ;;  %v1738_v24 = vand.u32 2147483648, %v1726_v8 }
 0x634   : > { %v1728_v14 = vmul.f32 %v2600_v7, %v1726_v8  ;;  %v1660_v16 = vsel %vm1657_vm3, %v1659_v9, %v1655_v5  ;;  %vm1733_vm4 = vweird.f32 %v2600_v7 }
 0x635   : > { %v1695_v6 = vsel %vm1694_vm1, %v2598_v40, %v1691_v61  ;;  %v1661_v25 = vmul.f32 %v1660_v16, %v1636_v18  ;;  %v1748_v17 = vmul.f32 %v1744_v46, %v1569_v13  ;;  %vm1734_vm6 = vmor %vm1732_vm5, %vm1733_vm4  ;;  %v1739_v31 = vor.u32 1.1754944e-38, %v1738_v24 }
 0x636   : > { %v1700_v10 = vsel %vm1697_vm2, %v1699_v3, %v1695_v6  ;;  %v1729_v20 = vsub.f32 1.0, %v1728_v14  ;;  %v1570_v40 = vmul.f32 0.5, %v3242_v39 }
 0x637   : > { %v1701_v60 = vmul.f32 %v1700_v10, %v1676_v2  ;;  %v2284_v42 = vclamps-f32 %v1661_v25, 1.0 }
 0x638   : > { %v1730_v11 = vmul.f32 %v2600_v7, %v1729_v20 }
 0x639   : > { %v2285_v19 = vclamps-f32 %v1701_v60, 1.0  ;;  %v1745_v52 = vadd.f32 1.0, %v2284_v42 }
 0x63a   : > { %v1731_v30 = vadd.f32 %v2600_v7, %v1730_v11 }
 0x63b   : > { %v1746_v28 = vadd.f32 1.0, %v2285_v19  ;;  %v1749_v0 = vmul.f32 %v1745_v52, %v1570_v40 }
 0x63c   : > { %v1735_v33 = vsel %vm1734_vm6, %v2600_v7, %v1731_v30 }
 0x63d   : > { %v1750_v29 = vmul.f32 %v1746_v28, %v1571_v21  ;;  %v1740_v43 = vsel %vm1737_vm7, %v1739_v31, %v1735_v33 }
 0x63e   : > { %v1741_v37 = vmul.f32 %v1740_v43, %v1716_v38 }
 0x63f   : > { %v1752_v32 = vpack.c.bf16 %v1750_v29, %v1748_v17 }
 0x640   : > { %v2286_v15 = vclamps-f32 %v1741_v37, 1.0 }
 0x641   : > { %1890 = vmatmul.bf16.vlgmr.msrb.gmra.mxu3 %v1752_v32 }
 0x642   : > { %v1747_v1 = vadd.f32 1.0, %v2286_v15 }
 0x644   : > { %v1751_v62 = vmul.f32 %v1747_v1, %v1572_v41 }
 0x646   : > { %v1753_v34 = vpack.c.bf16 %v1751_v62, %v1749_v0 }
 0x648   : > { %1904 = vmatmul.bf16.vlgmr.msra.gmra.mxu0 %v1753_v34 }
 0x6c4   : > { %v1891_v44 = vpop.f32.mrf.mxu3 }
 0x6c5   : > { %v1892_v45 = vadd.f32 %v1891_v44, %v3226_v26  ;;  %v1905_v8 = vpop.f32.mrf.mxu0 }
 0x6c7   : > { %v1906_v36 = vadd.f32 %v1905_v8, %v1892_v45 }
 0x6c9   : > { %1910 = vst [vmem:[%s424_s16] sm:$0xff] %v1906_v36 }
 0x6cc   : > { %v1893_v39 = vpop.f32.mrf.mxu3 }
 0x6cd   : > { %v1894_v54 = vadd.f32 %v1893_v39, %v3229_v27  ;;  %v1907_v49 = vpop.f32.mrf.mxu0 }
 0x6cf   : > { %v1908_v26 = vadd.f32 %v1907_v49, %v1894_v54 }
 0x6d1   : > { %1911 = vst [vmem:[%s424_s16 + $0x8] sm:$0xff] %v1908_v26 }
 0x6d2   : > { %2838 = shalt.err (!%p2835_p9)
}
 0x6d3   : > { %s2906_s22 = smov 128   ;;  %s2907_s25 = smov 8  }
 0x6d4   : > { %2448 = dma.vmem_to_hbm [thread:$0]  (%p3068_p4), %s1926_s26, 256, %s1928_s23, %s1913_s12, %s2906_s22, %s2906_s22, %s2907_s25  }
 0x6d5 PF: > { %s1942_s15 = sand.u32 1, %s2877_s27   ;;  %p3409_p10 = scmp.ge.s32.totalorder %s2889_s30, 2 }
 0x6d6   : > { %s1943_s16 = scalar_lea.sflag [#allocation4], %s1942_s15 }
 0x6d7   : > { %p2474_p13 = pnand %p3409_p10, %p3072_p6 }
 0x6d9   : > { %p2475_p11 = pneg %p2474_p13 }
 0x6db   : > { %2872 = dma.done.wait (%p2475_p11), %s1943_s16, 256  }
 0x6dc   : > { %2874 = vsyncadd (%p2475_p11), %s1943_s16, 4294967040  ;;  %p24_p0 = scmp.ge.s32.totalorder %s3042_s18, 4   ;;  %s3410_s27 = smov %s2881_s28 }
 0x6dd   : > { %s3411_s28 = smov %s2885_s29  ;;  %s3412_s29 = smov %s3053_s24 }
 0x6de   : > { %s3413_s30 = smov %s3042_s18  ;;  %26 = sbr.rel (!%p24_p0) target bundleno = 12 (0xc), region = 121 }
 0x6e3   :  { %1949 = vsyncpa [#allocation3], 1 }
 0x6e4   :  { %1951 = vsyncpa [#allocation3 + $0x1], 1 }
 0x6e5   :  { %1952 = vsyncpa [#allocation6], 1 }
 0x6e6   :  { %1953 = vsyncpa [#allocation9], 1 }
 0x6e7   :  { %1954 = vsyncpa [#allocation12], 1 }
 0x6e8   :  { %1955 = vsyncpa [#allocation4], 1 }
 0x6e9   :  { %1957 = vsyncpa [#allocation4 + $0x1], 1 }

// kernel: tpu_custom_call.1
= control target key start
LH: loop header
LB: loop body
LE: loop exit
PB: predicated region body
PF: predicated region fallthrough
CT: control target
= control target key end

     0   :  { %s3381_s0 = inlined_call_operand.hbm [shape: f32[2,16,128], index: 0, kind: input, shape index: {}]   ;;  %s3382_s1 = inlined_call_operand.hbm [shape: bf16[128,128], index: 1, kind: input, shape index: {}]   ;;  %s3383_s2 = inlined_call_operand.hbm [shape: bf16[128,128], index: 2, kind: input, shape index: {}]   ;;  %s3384_s3 = inlined_call_operand.hbm [shape: bf16[128,128], index: 3, kind: input, shape index: {}]   ;;  %s3385_s4 = inlined_call_operand.hbm [shape: bf16[4,32,128], index: 4, kind: input, shape index: {}]   ;;  %s3386_s5 = inlined_call_operand.vmem [shape: f32[1,128], index: 5, kind: input, shape index: {}]   ;;  %s3387_s6 = inlined_call_operand.hbm [shape: bf16[128,256], index: 6, kind: input, shape index: {}]   ;;  %s3388_s7 = inlined_call_operand.hbm [shape: bf16[256,128], index: 7, kind: input, shape index: {}]   ;;  %s3389_s8 = inlined_call_operand.hbm [shape: f32[2,16,128], index: 8, kind: output, shape index: {}]  }
   0x1   :  { %3392 = sst [smem:[#allocation20_spill]] %s3382_s1 }
   0x2   :  { %3393 = sst [smem:[#allocation21_spill]] %s3383_s2 }
   0x3   :  { %3394 = sst [smem:[#allocation22_spill]] %s3384_s3 }
   0x4   :  { %13 = vsyncpa [#allocation3], 0 }
   0x5   :  { %15 = vsyncpa [#allocation3 + $0x1], 0 }
   0x6   :  { %16 = vsyncpa [#allocation6], 0 }
   0x7   :  { %17 = vsyncpa [#allocation9], 0 }
   0x8   :  { %18 = vsyncpa [#allocation12], 0 }
   0x9   :  { %19 = vsyncpa [#allocation4], 0 }
   0xa   :  { %21 = vsyncpa [#allocation4 + $0x1], 0  ;;  %s2953_s27 = smov 0   ;;  %s2955_s28 = smov 0  }
   0xb   :  { %s2957_s29 = smov 0   ;;  %s2959_s30 = smov 0  }
   0xc LB: > { %s3395_s1 = sld [smem:[#allocation20_spill]]  ;;  %s2977_s12 = sadd.s32 4294967295, %s2889_s30   ;;  %s2889_s30 = sphi %s2959_s30, %s3413_s30   ;;  %s2885_s29 = sphi %s2957_s29, %s3412_s29   ;;  %s2881_s28 = sphi %s2955_s28, %s3411_s28   ;;  %s2877_s27 = sphi %s2953_s27, %s3410_s27  }
   0xd   : > { %p2059_p0 = scmp.ge.s32.totalorder %s2889_s30, 1  ;;  %p48_p1 = scmp.eq.s32.totalorder %s2977_s12, 0 }
   0xe   : > { %p231_p2 = scmp.lt.s32.totalorder %s2889_s30, 3  ;;  %s2891_s14 = smov [#allocation5]  }
   0xf   : > { %s244_s15 = sshll.u32 %s2891_s14, 4  ;;  %s3397_s3 = sld [smem:[#allocation22_spill]]  ;;  %s245_s15 = int_to_ptr.vmem [resolvable:$true] %s244_s15 }
  0x10   : > { %p2982_p3 = pnand %p2059_p0, %p231_p2  ;;  %s301_s22 = sshll.u32 %s3387_s6, 4  ;;  %s302_s22 = int_to_ptr.hbm [resolvable:$true] %s301_s22 }
  0x11   : > { %s2892_s23 = smov [#allocation8]   ;;  %s2893_s25 = smov 64  }
  0x12   : > { %s242_s11 = sshll.u32 %s3395_s1, 4  ;;  %p2450_p4 = pneg %p2982_p3  ;;  %s243_s11 = int_to_ptr.hbm [resolvable:$true] %s242_s11 }
  0x13   : > { %s272_s24 = sshll.u32 %s2892_s23, 4  ;;  %s2894_s26 = smov 4   ;;  %s273_s24 = int_to_ptr.vmem [resolvable:$true] %s272_s24 }
  0x14   : > { %p2994_p6 = pnand %p2450_p4, %p48_p1  ;;  %s2895_s9 = smov [#allocation11]  }
  0x15   : > { %s270_s18 = sshll.u32 %s3397_s3, 4  ;;  %s303_s10 = sshll.u32 %s2895_s9, 4  ;;  %s271_s18 = int_to_ptr.hbm [resolvable:$true] %s270_s18  ;;  %s304_s10 = int_to_ptr.vmem [resolvable:$true] %s303_s10 }
  0x16   : > { %2453 = dma.hbm_to_vmem [thread:$0]  (!%p2994_p6), %s243_s11, 1024, %s245_s15, [#allocation6], %s2893_s25, %s2893_s25, %s2894_s26  }
  0x17   : > { %2459 = dma.hbm_to_vmem [thread:$0]  (!%p2994_p6), %s271_s18, 1024, %s273_s24, [#allocation9], %s2893_s25, %s2893_s25, %s2894_s26  }
  0x18   : > { %s3399_s2 = sld [smem:[#allocation21_spill]]  ;;  %s3390_s20 = smov 128  }
  0x19   : > { %s3391_s21 = smov 8   ;;  %s2898_s11 = smov [#allocation7]  }
  0x1a   : > { %2465 = dma.hbm_to_vmem [thread:$0]  (!%p2994_p6), %s302_s22, 2048, %s304_s10, [#allocation12], %s3390_s20, %s3390_s20, %s3391_s21  }
  0x1b   : > { %s258_s15 = sshll.u32 %s2898_s11, 4  ;;  %s284_s24 = sshll.u32 %s3385_s4, 4  ;;  %s259_s15 = int_to_ptr.vmem [resolvable:$true] %s258_s15  ;;  %s285_s24 = int_to_ptr.hbm [resolvable:$true] %s284_s24 }
  0x1c   : > { %s315_s10 = sshll.u32 %s3388_s7, 4  ;;  %s2899_s14 = smov [#allocation10]   ;;  %s316_s10 = int_to_ptr.hbm [resolvable:$true] %s315_s10 }
  0x1d   : > { %s286_s16 = sshll.u32 %s2899_s14, 4  ;;  %s3042_s18 = sadd.s32 1, %s2889_s30   ;;  %s287_s16 = int_to_ptr.vmem [resolvable:$true] %s286_s16 }
  0x1e   : > { %s256_s17 = sshll.u32 %s3399_s2, 4  ;;  %s31_s23 = ssub.s32 %s2889_s30, %s3042_s18  ;;  %s257_s17 = int_to_ptr.hbm [resolvable:$true] %s256_s17 }
  0x1f   : > { %2456 = dma.hbm_to_vmem [thread:$0]  (!%p2994_p6), %s257_s17, 1024, %s259_s15, [#allocation6], %s2893_s25, %s2893_s25, %s2894_s26  }
  0x20   : > { %2462 = dma.hbm_to_vmem [thread:$0]  (!%p2994_p6), %s285_s24, 1024, %s287_s16, [#allocation9], %s2893_s25, %s2893_s25, %s2894_s26  }
  0x21   : > { %s2900_s17 = smov [#allocation13]   ;;  %s2058_s15 = sadd.s32 4294967294, %s2889_s30  }
  0x22   : > { %s317_s11 = sshll.u32 %s2900_s17, 4  ;;  %s34_s22 = sadd.s32 1, %s2885_s29  ;;  %s318_s11 = int_to_ptr.vmem [resolvable:$true] %s317_s11 }
  0x23   : > { %2468 = dma.hbm_to_vmem [thread:$0]  (!%p2994_p6), %s316_s10, 2048, %s318_s11, [#allocation12], %s2893_s25, %s2893_s25, %s2894_s26  }
  0x24   : > { %p32_p7 = scmp.eq.s32.totalorder %s31_s23, 0  ;;  %p41_p8 = scmp.ne.s32.totalorder %s2885_s29, %s2881_s28 }
  0x25   : > { %p42_p9 = scmp.eq.s32.totalorder %s2889_s30, 0  ;;  %p47_p10 = scmp.ne.s32.totalorder %s2881_s28, %s2877_s27 }
  0x26   : > { %s3053_s24 = scalar_select %p32_p7, %s2885_s29, %s34_s22  }
  0x27   : > { %p3055_p11 = por %p42_p9, %p41_p8  ;;  %p3061_p12 = por %p48_p1, %p47_p10 }
  0x28   : > { %p218_p13 = scmp.eq.s32.totalorder %s2977_s12, 1  ;;  %p224_p0 = scmp.eq.s32.totalorder %s2058_s15, 1 }
  0x29   : > { %p2483_p2 = scmp.lt.s32.totalorder %s2889_s30, 2  ;;  %s331_s26 = sand.u32 1, %s2885_s29  }
  0x2a   : > { %p3068_p4 = por %p218_p13, %p41_p8  ;;  %p3072_p6 = por %p224_p0, %p47_p10 }
  0x2b   : > { %s2067_s14 = sshll.u32 %s331_s26, 4  ;;  %s2356_s16 = sshll.u32 %s2889_s30, 4 }
  0x2c   : > { %s340_s23 = scalar_lea.hbm %s3381_s0, %s2356_s16  ;;  %s335_s22 = scalar_lea.vmem [#allocation2], %s2067_s14 }
  0x2d   : > { %s343_s20 = sshll.u32 %s335_s22, 4  ;;  %s341_s21 = sshll.u32 %s340_s23, 4  ;;  %s344_s20 = int_to_ptr.vmem [resolvable:$true] %s343_s20  ;;  %s342_s21 = int_to_ptr.hbm [resolvable:$true] %s341_s21 }
  0x2e   : > { %p3082_p7 = pnand %p2483_p2, %p3055_p11  ;;  %s332_s1 = scalar_lea.sflag [#allocation3], %s331_s26 }
  0x2f   : > { %s2781_s2 = sshra.s32 %s342_s21, 4  ;;  %s2788_s17 = scalar_lea.hbm %s3381_s0, 32  ;;  %s2782_s2 = int_to_ptr.hbm [resolvable:$true] %s2781_s2 }
  0x30   : > { %s2783_s3 = scalar_lea.hbm %s2782_s2, 16  ;;  %p2785_p9 = pneg %p3082_p7 }
  0x31   : > { %p2784_p8 = scmp.ne.s32.totalorder %s2782_s2, %s2783_s3  ;;  %p2789_p11 = scmp.lt.s32.totalorder %s2782_s2, %s3381_s0 }
  0x32   : > { %p2790_p0 = scmp.lt.s32.totalorder %s2788_s17, %s2783_s3 }
  0x33   : > { %p2786_p10 = pnand %p2785_p9, %p2784_p8 }
  0x34   : > { %p2791_p2 = por %p2790_p0, %p2789_p11 }
  0x35   : > { %p2787_p13 = pneg %p2786_p10 }
  0x37   : > { %p2792_p5 = pnand %p2791_p2, %p2787_p13 }
  0x39   : > { %2795 = shalt.err (!%p2792_p5)
}
  0x3a   : > { %s3405_s26 = smov 8   ;;  %s3406_s23 = smov 128  }
  0x3b   : > { %2472 = dma.hbm_to_vmem [thread:$0]  (!%p3082_p7), %s342_s21, 256, %s344_s20, %s332_s1, %s3406_s23, %s3406_s23, %s3405_s26  }
  0x3c   : > { %355 = sbr.rel (%p2982_p3) target bundleno = 1749 (0x6d5), region = 52  ;;  %s3102_s22 = sand.u32 (!%p2982_p3), 1, %s2881_s28  }
  0x3d   : > { %s2071_s2 = sshll.u32 (!%p2982_p3), %s3102_s22, 4  ;;  %s358_s3 = scalar_lea.sflag (!%p2982_p3), [#allocation3], %s3102_s22 }
  0x3e   : > { %s361_s14 = scalar_lea.vmem (!%p2982_p3), [#allocation2], %s2071_s2 }
  0x41   : > { %2856 = dma.done.wait (%p3061_p12), %s358_s3, 256  }
  0x42   : > { %2858 = vsyncadd (%p3061_p12), %s358_s3, 4294967040 }
  0x43   : > { %2860 = dma.done.wait (%p48_p1), [#allocation6], 2048  }
  0x44   : > { %2862 = vsyncadd (%p48_p1), [#allocation6], 4294965248 }
  0x45   : > { %2864 = dma.done.wait (%p48_p1), [#allocation9], 2048  }
  0x46   : > { %2866 = vsyncadd (%p48_p1), [#allocation9], 4294965248 }
  0x47   : > { %2868 = dma.done.wait (%p48_p1), [#allocation12], 4096  }
  0x48   : > { %2870 = vsyncadd (%p48_p1), [#allocation12], 4294963200  ;;  %v3124_v0 = vld [vmem:[%s361_s14] sm:$0xff]  ;;  %v3127_v1 = vld [vmem:[%s361_s14 + $0x8] sm:$0xff]  ;;  %v2901_v2 = vmov 128.0   ;;  %s2902_s1 = smov 96  }
  0x49   : > { %428 = vadd.xlane.f32.xlu0 %v3124_v0  ;;  %2541 = vrcp.f32 %v2901_v2  ;;  %v2364_v17 = vld [vmem:[#allocation5 + $0x38] sm:$0xff]  ;;  %v2363_v20 = vld [vmem:[#allocation5 + $0x30] sm:$0xff]  ;;  %v2362_v23 = vld [vmem:[#allocation5 + $0x28] sm:$0xff]  ;;  %s2903_s13 = smov 64   ;;  %vm796_vm13 = vcmask 261120   ;;  %s2904_s20 = smov 32  }
  0x4a   : > { %v2372_v18 = vld [vmem:[#allocation7 + $0x38] sm:$0xff]  ;;  %572 = vmatpush.bf16.msra.mxu0 %v2364_v17  ;;  %v2371_v21 = vld [vmem:[#allocation7 + $0x30] sm:$0xff]  ;;  %v2370_v24 = vld [vmem:[#allocation7 + $0x28] sm:$0xff]  ;;  %vm903_vm14 = vcmask 130048   ;;  %s2421_s15 = sshll.u32 %s2977_s12, 4  ;;  %s424_s16 = scalar_lea.vmem [#allocation14], %s2071_s2 }
  0x4b   : > { %v2380_v19 = vld [vmem:[#allocation8 + $0x38] sm:$0xff]  ;;  %652 = vmatpush.bf16.msra.mxu1 %v2372_v18  ;;  %v2379_v22 = vld [vmem:[#allocation8 + $0x30] sm:$0xff]  ;;  %v2378_v25 = vld [vmem:[#allocation8 + $0x28] sm:$0xff]  ;;  %s1924_s19 = scalar_lea.hbm %s3389_s8, %s2421_s15  ;;  %s1925_s26 = sshll.u32 %s424_s16, 4  ;;  %s1926_s26 = int_to_ptr.vmem [resolvable:$true] %s1925_s26 }
  0x4c   : > { %732 = vmatpush.bf16.msra.mxu2 %v2380_v19  ;;  %v2361_v27 = vld [vmem:[#allocation5 + $0x20] sm:$0xff]  ;;  %v2360_v31 = vld [vmem:[#allocation5 + $0x18] sm:$0xff]  ;;  %v2359_v35 = vld [vmem:[#allocation5 + $0x10] sm:$0xff]  ;;  %s1927_s23 = sshll.u32 %s1924_s19, 4  ;;  %s1913_s12 = scalar_lea.sflag [#allocation4], %s3102_s22  ;;  %s1928_s23 = int_to_ptr.hbm [resolvable:$true] %s1927_s23 }
  0x4d   : > { %v2369_v28 = vld [vmem:[#allocation7 + $0x20] sm:$0xff]  ;;  %v2368_v32 = vld [vmem:[#allocation7 + $0x18] sm:$0xff]  ;;  %v2367_v36 = vld [vmem:[#allocation7 + $0x10] sm:$0xff]  ;;  %s2825_s3 = sshra.s32 %s1928_s23, 4  ;;  %s2826_s3 = int_to_ptr.hbm [resolvable:$true] %s2825_s3 }
  0x4e   : > { %573 = vmatpush.bf16.msra.mxu0 %v2363_v20  ;;  %v2377_v30 = vld [vmem:[#allocation8 + $0x20] sm:$0xff]  ;;  %v2376_v33 = vld [vmem:[#allocation8 + $0x18] sm:$0xff]  ;;  %v2375_v39 = vld [vmem:[#allocation8 + $0x10] sm:$0xff]  ;;  %s2827_s2 = scalar_lea.hbm %s2826_s3, 16  ;;  %p2832_p12 = scmp.lt.s32.totalorder %s2826_s3, %s3389_s8 }
  0x4f   : > { %v2542_v3 = vpop.eup %2541  ;;  %653 = vmatpush.bf16.msra.mxu1 %v2371_v21  ;;  %v2358_v42 = vld [vmem:[#allocation5 + $0x8] sm:$0xff]  ;;  %v2357_v47 = vld [vmem:[#allocation5] sm:$0xff]  ;;  %p2828_p1 = scmp.ne.s32.totalorder %s2826_s3, %s2827_s2 }
  0x50   : > { %v433_v4 = vmul.f32 128.0, %v2542_v3  ;;  %vm437_vm0 = vweird.f32 %v2542_v3  ;;  %733 = vmatpush.bf16.msra.mxu2 %v2379_v22  ;;  %v2366_v43 = vld [vmem:[#allocation7 + $0x8] sm:$0xff]  ;;  %v2365_v48 = vld [vmem:[#allocation7] sm:$0xff] }
  0x51   : > { %430 = vadd.xlane.f32.xlu0 %v3127_v1  ;;  %v2374_v44 = vld [vmem:[#allocation8 + $0x8] sm:$0xff]  ;;  %v2373_v50 = vld [vmem:[#allocation8] sm:$0xff]  ;;  %p2829_p3 = pnand %p2828_p1, %p3068_p4 }
  0x52   : > { %v434_v5 = vsub.f32 1.0, %v433_v4  ;;  %574 = vmatpush.bf16.msra.mxu0 %v2362_v23 }
  0x53   : > { %654 = vmatpush.bf16.msra.mxu1 %v2370_v24  ;;  %p2830_p5 = pneg %p2829_p3 }
  0x54   : > { %v435_v6 = vmul.f32 %v2542_v3, %v434_v5  ;;  %734 = vmatpush.bf16.msra.mxu2 %v2378_v25 }
  0x56   : > { %v436_v7 = vadd.f32 %v2542_v3, %v435_v6  ;;  %575 = vmatpush.bf16.msra.mxu0 %v2361_v27 }
  0x57   : > { %655 = vmatpush.bf16.msra.mxu1 %v2369_v28 }
  0x58   : > { %v3130_v8 = vsel %vm437_vm0, %v2542_v3, %v436_v7  ;;  %735 = vmatpush.bf16.msra.mxu2 %v2377_v30 }
  0x5a   : > { %576 = vmatpush.bf16.msra.mxu0 %v2360_v31 }
  0x5b   : > { %656 = vmatpush.bf16.msra.mxu1 %v2368_v32 }
  0x5c   : > { %736 = vmatpush.bf16.msra.mxu2 %v2376_v33 }
  0x5e   : > { %577 = vmatpush.bf16.msra.mxu0 %v2359_v35 }
  0x5f   : > { %657 = vmatpush.bf16.msra.mxu1 %v2367_v36 }
  0x60   : > { %737 = vmatpush.bf16.msra.mxu2 %v2375_v39 }
  0x62   : > { %578 = vmatpush.bf16.msra.mxu0 %v2358_v42 }
  0x63   : > { %658 = vmatpush.bf16.msra.mxu1 %v2366_v43 }
  0x64   : > { %738 = vmatpush.bf16.msra.mxu2 %v2374_v44 }
  0x66   : > { %579 = vmatpush.bf16.msra.mxu0 %v2357_v47 }
  0x67   : > { %659 = vmatpush.bf16.msra.mxu1 %v2365_v48 }
  0x68   : > { %739 = vmatpush.bf16.msra.mxu2 %v2373_v50 }
  0xbc   : > { %v429_v9 = vpop.xlane.xlu0 %428 }
  0xbd   : > { %v439_v10 = vmul.f32 %v3130_v8, %v429_v9 }
  0xbf   : > { %v3134_v11 = vsub.f32 %v3124_v0, %v439_v10 }
  0xc1   : > { %v443_v12 = vmul.f32 %v3134_v11, %v3134_v11 }
  0xc3   : > { %445 = vadd.xlane.f32.xlu1 %v443_v12 }
  0xc4   : > { %v431_v13 = vpop.xlane.xlu0 %430 }
  0xc5   : > { %v440_v14 = vmul.f32 %v3130_v8, %v431_v13 }
  0xc7   : > { %v3140_v15 = vsub.f32 %v3127_v1, %v440_v14 }
  0xc9   : > { %v444_v16 = vmul.f32 %v3140_v15, %v3140_v15 }
  0xcb   : > { %447 = vadd.xlane.f32.xlu1 %v444_v16 }
 0x136   : > { %v446_v26 = vpop.xlane.xlu1 %445 }
 0x137   : > { %v449_v29 = vmul.f32 %v446_v26, %v3130_v8 }
 0x139   : > { %2543 = vrsqrt.f32 %v449_v29  ;;  %vm458_vm1 = vcmp.eq.f32.partialorder %v449_v29, inf  ;;  %v461_v55 = vand.u32 2147483648, %v449_v29  ;;  %vm460_vm2 = vcmp.eq.f32.partialorder %v449_v29, 0.0 }
 0x13e   : > { %v448_v34 = vpop.xlane.xlu1 %447 }
 0x13f   : > { %v2544_v37 = vpop.eup %2543  ;;  %v450_v38 = vmul.f32 %v448_v34, %v3130_v8 }
 0x140   : > { %v452_v40 = vmul.f32 %v2544_v37, %v449_v29 }
 0x141   : > { %2545 = vrsqrt.f32 %v450_v38  ;;  %vm470_vm3 = vcmp.eq.f32.partialorder %v450_v38, inf  ;;  %v473_v63 = vand.u32 2147483648, %v450_v38  ;;  %vm472_vm4 = vcmp.eq.f32.partialorder %v450_v38, 0.0 }
 0x142   : > { %v453_v41 = vmul.f32 %v2544_v37, %v452_v40 }
 0x144   : > { %v454_v45 = vmul.f32 0.5, %v453_v41 }
 0x146   : > { %v455_v46 = vsub.f32 1.5, %v454_v45 }
 0x147   : > { %v2546_v49 = vpop.eup %2545 }
 0x148   : > { %v456_v51 = vmul.f32 %v2544_v37, %v455_v46  ;;  %v464_v52 = vmul.f32 %v2546_v49, %v450_v38 }
 0x14a   : > { %v457_v53 = vmul.f32 %v456_v51, %v449_v29  ;;  %v465_v54 = vmul.f32 %v2546_v49, %v464_v52 }
 0x14c   : > { %v466_v56 = vmul.f32 0.5, %v465_v54  ;;  %v459_v57 = vsel %vm458_vm1, %v449_v29, %v457_v53 }
 0x14d   : > { %v462_v58 = vsel %vm460_vm2, %v461_v55, %v459_v57 }
 0x14e   : > { %v467_v59 = vsub.f32 1.5, %v466_v56  ;;  %v475_v60 = vadd.f32 0.001, %v462_v58 }
 0x150   : > { %v468_v61 = vmul.f32 %v2546_v49, %v467_v59  ;;  %2547 = vrcp.f32 %v475_v60  ;;  %v488_v14 = vand.u32 2147483648, %v475_v60  ;;  %vm482_vm6 = vweird.f32 %v475_v60 }
 0x151   : > { %v486_v16 = vand.u32 2147483647, %v475_v60 }
 0x152   : > { %v469_v62 = vmul.f32 %v468_v61, %v450_v38  ;;  %v489_v22 = vor.u32 1.1754944e-38, %v488_v14 }
 0x153   : > { %vm487_vm9 = vcmp.eq.f32.partialorder %v486_v16, 8.507059e+37 }
 0x154   : > { %v471_v2 = vsel %vm470_vm3, %v450_v38, %v469_v62 }
 0x155   : > { %v474_v3 = vsel %vm472_vm4, %v473_v63, %v471_v2 }
 0x156   : > { %v2548_v4 = vpop.eup %2547  ;;  %v476_v5 = vadd.f32 0.001, %v474_v3 }
 0x157   : > { %v478_v6 = vmul.f32 %v2548_v4, %v475_v60  ;;  %vm483_vm5 = vweird.f32 %v2548_v4 }
 0x158   : > { %2549 = vrcp.f32 %v476_v5  ;;  %vm484_vm7 = vmor %vm482_vm6, %vm483_vm5  ;;  %v503_v18 = vand.u32 2147483648, %v476_v5  ;;  %v501_v21 = vand.u32 2147483647, %v476_v5  ;;  %vm497_vm10 = vweird.f32 %v476_v5 }
 0x159   : > { %v479_v7 = vsub.f32 1.0, %v478_v6 }
 0x15a   : > { %v504_v25 = vor.u32 1.1754944e-38, %v503_v18  ;;  %vm502_vm12 = vcmp.eq.f32.partialorder %v501_v21, 8.507059e+37 }
 0x15b   : > { %v480_v9 = vmul.f32 %v2548_v4, %v479_v7 }
 0x15d   : > { %v481_v12 = vadd.f32 %v2548_v4, %v480_v9 }
 0x15e   : > { %v2550_v10 = vpop.eup %2549 }
 0x15f   : > { %v493_v13 = vmul.f32 %v2550_v10, %v476_v5  ;;  %v485_v19 = vsel %vm484_vm7, %v2548_v4, %v481_v12  ;;  %vm498_vm8 = vweird.f32 %v2550_v10 }
 0x160   : > { %v490_v24 = vsel %vm487_vm9, %v489_v22, %v485_v19  ;;  %vm499_vm11 = vmor %vm497_vm10, %vm498_vm8 }
 0x161   : > { %v494_v17 = vsub.f32 1.0, %v493_v13  ;;  %v491_v28 = vmul.f32 %v490_v24, %v3134_v11 }
 0x163   : > { %v495_v20 = vmul.f32 %v2550_v10, %v494_v17 }
 0x165   : > { %v496_v23 = vadd.f32 %v2550_v10, %v495_v20 }
 0x167   : > { %v500_v26 = vsel %vm499_vm11, %v2550_v10, %v496_v23 }
 0x168   : > { %v505_v27 = vsel %vm502_vm12, %v504_v25, %v500_v26 }
 0x169   : > { %v506_v29 = vmul.f32 %v505_v27, %v3140_v15 }
 0x16b   : > { %v507_v30 = vpack.c.bf16 %v506_v29, %v491_v28 }
 0x16d   : > { %580 = vmatmul.bf16.vlgmr.msra.gmra.mxu0 %v507_v30  ;;  %660 = vmatmul.bf16.vlgmr.msra.gmra.mxu1 %v507_v30 }
 0x16e   : > { %740 = vmatmul.bf16.vlgmr.msra.gmra.mxu2 %v507_v30 }
 0x1ea   : > { %v581_v31 = vpop.f32.mrf.mxu0  ;;  %v661_v32 = vpop.f32.mrf.mxu1 }
 0x1eb   : > { %v586_v33 = vpack.c.bf16 %v581_v31, %v581_v31  ;;  %v666_v34 = vpack.c.bf16 %v661_v32, %v661_v32 }
 0x1ed   : > { %764 = vrot.lane.b32.xlu2 %v666_v34, %s2902_s1  ;;  %750 = vrot.lane.b32.xlu0 %v586_v33, %s2902_s1  ;;  %v793_v15 = vunpack.c.l.b16 %v666_v34  ;;  %v790_v48 = vunpack.c.l.b16 %v586_v33 }
 0x1f1   : > { %v741_v35 = vpop.f32.mrf.mxu2 }
 0x1f2   : > { %v583_v36 = vpop.f32.mrf.mxu0  ;;  %v663_v37 = vpop.f32.mrf.mxu1  ;;  %v746_v41 = vpack.c.bf16 %v741_v35, %v741_v35 }
 0x1f3   : > { %v587_v38 = vpack.c.bf16 %v583_v36, %v583_v36  ;;  %v667_v11 = vpack.c.bf16 %v663_v37, %v663_v37 }
 0x1f4   : > { %v1025_v46 = vunpack.c.l.b16 %v746_v41 }
 0x1f5   : > { %766 = vrot.lane.b32.xlu2 %v667_v11, %s2902_s1  ;;  %756 = vrot.lane.b32.xlu0 %v587_v38, %s2903_s13  ;;  %v794_v39 = vunpack.c.l.b16 %v667_v11  ;;  %v791_v45 = vunpack.c.l.b16 %v587_v38 }
 0x1f6   : > { %752 = vrot.lane.b32.xlu1 %v587_v38, %s2902_s1 }
 0x1f7   : > { %v795_v40 = vpack.c.b16 %v794_v39, %v793_v15  ;;  %v792_v50 = vpack.c.b16 %v791_v45, %v790_v48 }
 0x1f9   : > { %v743_v42 = vpop.f32.mrf.mxu2  ;;  %v801_v43 = vsel %vm796_vm13, %v795_v40, 0 }
 0x1fa   : > { %v747_v44 = vpack.c.bf16 %v743_v42, %v743_v42  ;;  %810 = vmatpush.bf16.xpose.msra.mxu3 %v801_v43 }
 0x1fc   : > { %v1026_v47 = vunpack.c.l.b16 %v747_v44 }
 0x1fd   : > { %768 = vrot.lane.b32.xlu2 %v666_v34, %s2903_s13  ;;  %758 = vrot.lane.b32.xlu0 %v586_v33, %s2904_s20 }
 0x1fe   : > { %774 = vrot.lane.b32.xlu1 %v667_v11, %s2904_s20  ;;  %v1027_v49 = vpack.c.b16 %v1026_v47, %v1025_v46 }
 0x200   : > { %1039 = vmatpush.bf16.msrb.mxu1 %v1027_v49 }
 0x201   : > { %2175 = vmatmul.msk.bf16.vlgmr.msra.gmra.mxu3 %vm796_vm13, %v792_v50 }
 0x205   : > { %770 = vrot.lane.b32.xlu2 %v667_v11, %s2903_s13  ;;  %780 = vrot.lane.b32.xlu0 %v747_v44, %s2902_s1 }
 0x206   : > { %778 = vrot.lane.b32.xlu1 %v746_v41, %s2902_s1 }
 0x20d   : > { %754 = vrot.lane.b32.xlu2 %v586_v33, %s2903_s13  ;;  %786 = vrot.lane.b32.xlu0 %v746_v41, %s2904_s20 }
 0x20e   : > { %784 = vrot.lane.b32.xlu1 %v747_v44, %s2903_s13 }
 0x215   : > { %772 = vrot.lane.b32.xlu2 %v666_v34, %s2904_s20 }
 0x21d   : > { %760 = vrot.lane.b32.xlu2 %v587_v38, %s2904_s20 }
 0x225   : > { %782 = vrot.lane.b32.xlu2 %v746_v41, %s2903_s13  ;;  %s2831_s13 = scalar_lea.hbm %s3389_s8, 32 }
 0x226   : > { %p2833_p7 = scmp.lt.s32.totalorder %s2831_s13, %s2827_s2 }
 0x228   : > { %p2834_p8 = por %p2833_p7, %p2832_p12 }
 0x22a   : > { %p2835_p9 = pnand %p2834_p8, %p2830_p5 }
 0x22d   : > { %788 = vrot.lane.b32.xlu2 %v747_v44, %s2904_s20 }
 0x237   : > { %1300 = vadd.xlane.f32.xlu0 %v3127_v1 }
 0x238   : > { %1298 = vadd.xlane.f32.xlu1 %v3124_v0 }
 0x247   : > { %v765_v51 = vpop.permute.xlu2 %764 }
 0x248   : > { %v820_v53 = vunpack.c.l.b16 %v765_v51 }
 0x24f   : > { %v767_v52 = vpop.permute.xlu2 %766 }
 0x250   : > { %v821_v54 = vunpack.c.l.b16 %v767_v52 }
 0x252   : > { %v822_v55 = vpack.c.b16 %v821_v54, %v820_v53 }
 0x254   : > { %v827_v56 = vsel %vm796_vm13, %v822_v55, 0 }
 0x255   : > { %836 = vmatpush.bf16.xpose.msrb.mxu3 %v827_v56 }
 0x257   : > { %v769_v57 = vpop.permute.xlu2 %768 }
 0x258   : > { %v846_v60 = vunpack.c.l.b16 %v769_v57 }
 0x25f   : > { %v771_v58 = vpop.permute.xlu2 %770  ;;  %v751_v59 = vpop.permute.xlu0 %750 }
 0x260   : > { %v847_v61 = vunpack.c.l.b16 %v771_v58  ;;  %v817_v5 = vunpack.c.l.b16 %v751_v59 }
 0x262   : > { %v848_v62 = vpack.c.b16 %v847_v61, %v846_v60 }
 0x264   : > { %v853_v63 = vsel %vm796_vm13, %v848_v62, 0 }
 0x265   : > { %862 = vmatpush.bf16.xpose.msra.mxu3 %v853_v63 }
 0x267   : > { %v755_v2 = vpop.permute.xlu2 %754  ;;  %v757_v3 = vpop.permute.xlu0 %756 }
 0x268   : > { %v753_v4 = vpop.permute.xlu1 %752  ;;  %v843_v18 = vunpack.c.l.b16 %v755_v2  ;;  %v844_v19 = vunpack.c.l.b16 %v757_v3 }
 0x269   : > { %v818_v6 = vunpack.c.l.b16 %v753_v4 }
 0x26a   : > { %v845_v28 = vpack.c.b16 %v844_v19, %v843_v18 }
 0x26b   : > { %v819_v7 = vpack.c.b16 %v818_v6, %v817_v5 }
 0x26d   : > { %2176 = vmatmul.msk.bf16.vlgmr.msrb.gmra.mxu3 %vm796_vm13, %v819_v7 }
 0x26f   : > { %v773_v9 = vpop.permute.xlu2 %772  ;;  %v759_v10 = vpop.permute.xlu0 %758 }
 0x270   : > { %v872_v12 = vunpack.c.l.b16 %v773_v9  ;;  %v775_v13 = vpop.permute.xlu1 %774  ;;  %v869_v22 = vunpack.c.l.b16 %v759_v10 }
 0x271   : > { %v873_v14 = vunpack.c.l.b16 %v775_v13 }
 0x273   : > { %v874_v16 = vpack.c.b16 %v873_v14, %v872_v12 }
 0x275   : > { %v879_v17 = vsel %vm796_vm13, %v874_v16, 0 }
 0x276   : > { %888 = vmatpush.bf16.xpose.msrb.mxu0 %v879_v17 }
 0x277   : > { %v761_v20 = vpop.permute.xlu2 %760  ;;  %v781_v21 = vpop.permute.xlu0 %780 }
 0x278   : > { %v870_v23 = vunpack.c.l.b16 %v761_v20  ;;  %v1052_v24 = vunpack.c.l.b16 %v781_v21  ;;  %v779_v25 = vpop.permute.xlu1 %778 }
 0x279   : > { %v1051_v26 = vunpack.c.l.b16 %v779_v25 }
 0x27a   : > { %v871_v27 = vpack.c.b16 %v870_v23, %v869_v22 }
 0x27b   : > { %v1053_v29 = vpack.c.b16 %v1052_v24, %v1051_v26 }
 0x27d   : > { %2177 = vmatmul.msk.bf16.vlgmr.msra.gmra.mxu3 %vm796_vm13, %v845_v28  ;;  %2178 = vmatmul.msk.bf16.vlgmr.msrb.gmra.mxu0 %vm796_vm13, %v871_v27 }
 0x27e   : > { %1065 = vmatpush.bf16.msrb.mxu2 %v1053_v29 }
 0x27f   : > { %v783_v30 = vpop.permute.xlu2 %782  ;;  %v787_v36 = vpop.permute.xlu0 %786 }
 0x280   : > { %v1077_v31 = vunpack.c.l.b16 %v783_v30  ;;  %v785_v32 = vpop.permute.xlu1 %784  ;;  %v1103_v38 = vunpack.c.l.b16 %v787_v36 }
 0x281   : > { %v1078_v33 = vunpack.c.l.b16 %v785_v32 }
 0x283   : > { %v1079_v34 = vpack.c.b16 %v1078_v33, %v1077_v31 }
 0x284   : > { %v812_v35 = vpop.f32.mrf.mxu3 }
 0x285   : > { %1091 = vmatpush.bf16.msrb.mxu3 %v1079_v34  ;;  %v895_v39 = vmul.f32 0.17677669, %v812_v35 }
 0x287   : > { %v789_v37 = vpop.permute.xlu2 %788  ;;  %v904_v42 = vsel %vm903_vm14, %v895_v39, -inf }
 0x288   : > { %v1104_v11 = vunpack.c.l.b16 %v789_v37 }
 0x28a   : > { %v1105_v15 = vpack.c.b16 %v1104_v11, %v1103_v38 }
 0x28c   : > { %v814_v40 = vpop.f32.mrf.mxu3  ;;  %1117 = vmatpush.bf16.msra.mxu0 %v1105_v15 }
 0x28d   : > { %v896_v41 = vmul.f32 0.17677669, %v814_v40 }
 0x28f   : > { %v905_v43 = vsel %vm903_vm14, %v896_v41, -inf }
 0x290   : > { %v906_v44 = vmax.f32 %v904_v42, %v905_v43 }
 0x292   : > { %v907_v45 = vrot.slane %v906_v44, 4 }
 0x294   : > { %v908_v46 = vmax.f32 %v906_v44, %v907_v45 }
 0x296   : > { %v909_v47 = vrot.slane %v908_v46, 2 }
 0x298   : > { %v910_v48 = vmax.f32 %v908_v46, %v909_v47 }
 0x29a   : > { %v911_v49 = vrot.slane %v910_v48, 1 }
 0x29c   : > { %v912_v50 = vmax.f32 %v910_v48, %v911_v49 }
 0x29e   : > { %v940_v51 = vsub.f32 %v895_v39, %v912_v50  ;;  %v941_v52 = vsub.f32 %v896_v41, %v912_v50 }
 0x2a0   : > { %v948_v53 = vmul.f32 1.442695, %v940_v51  ;;  %v950_v54 = vmul.f32 1.442695, %v941_v52 }
 0x2a2   : > { %2551 = vpow2.f32 %v948_v53 }
 0x2a3   : > { %2553 = vpow2.f32 %v950_v54 }
 0x2a8   : > { %v2552_v55 = vpop.eup %2551 }
 0x2a9   : > { %v2554_v56 = vpop.eup %2553  ;;  %v964_v57 = vsel %vm903_vm14, %v2552_v55, 0.0 }
 0x2aa   : > { %v965_v58 = vsel %vm903_vm14, %v2554_v56, 0.0  ;;  %v1301_v27 = vpop.xlane.xlu0 %1300 }
 0x2ab   : > { %v966_v59 = vadd.f32 %v965_v58, %v964_v57  ;;  %v1299_v28 = vpop.xlane.xlu1 %1298  ;;  %v1303_v31 = vmul.f32 %v1301_v27, %v3130_v8 }
 0x2ac   : > { %v1302_v32 = vmul.f32 %v1299_v28, %v3130_v8 }
 0x2ad   : > { %v967_v60 = vrot.slane %v966_v59, 4  ;;  %v3180_v35 = vsub.f32 %v3127_v1, %v1303_v31 }
 0x2ae   : > { %v3183_v36 = vsub.f32 %v3124_v0, %v1302_v32 }
 0x2af   : > { %v968_v61 = vadd.f32 %v967_v60, %v966_v59  ;;  %v1307_v39 = vmul.f32 %v3180_v35, %v3180_v35 }
 0x2b0   : > { %v1306_v40 = vmul.f32 %v3183_v36, %v3183_v36 }
 0x2b1   : > { %v969_v62 = vrot.slane %v968_v61, 2  ;;  %1310 = vadd.xlane.f32.xlu1 %v1307_v39 }
 0x2b2   : > { %1308 = vadd.xlane.f32.xlu2 %v1306_v40 }
 0x2b3   : > { %v970_v63 = vadd.f32 %v969_v62, %v968_v61 }
 0x2b5   : > { %v971_v2 = vrot.slane %v970_v63, 1 }
 0x2b7   : > { %v972_v3 = vadd.f32 %v971_v2, %v970_v63 }
 0x2b9   : > { %2555 = vrcp.f32 %v972_v3 }
 0x2bf   : > { %v2556_v4 = vpop.eup %2555 }
 0x2c0   : > { %v1004_v5 = vmul.f32 %v2556_v4, %v2552_v55  ;;  %v1005_v6 = vmul.f32 %v2556_v4, %v2554_v56 }
 0x2c2   : > { %v1012_v7 = vpack.c.bf16 %v1004_v5, %v1004_v5  ;;  %v1013_v9 = vpack.c.bf16 %v1005_v6, %v1005_v6 }
 0x2c4   : > { %v1022_v10 = vunpack.c.l.b16 %v1012_v7  ;;  %v1023_v12 = vunpack.c.l.b16 %v1013_v9 }
 0x2c6   : > { %v1024_v13 = vpack.c.b16 %v1023_v12, %v1022_v10 }
 0x2c8   : > { %2179 = vmatmul.msk.bf16.vlgmr.msrb.gmra.mxu1 %vm903_vm14, %v1024_v13 }
 0x2f0   : > { %v838_v14 = vpop.f32.mrf.mxu3 }
 0x2f1   : > { %v897_v16 = vmul.f32 0.17677669, %v838_v14 }
 0x2f3   : > { %v913_v20 = vsel %vm903_vm14, %v897_v16, -inf }
 0x2f8   : > { %v840_v17 = vpop.f32.mrf.mxu3 }
 0x2f9   : > { %v898_v18 = vmul.f32 0.17677669, %v840_v17 }
 0x2fa   : > { %v890_v19 = vpop.f32.mrf.mxu0 }
 0x2fb   : > { %v914_v21 = vsel %vm903_vm14, %v898_v18, -inf  ;;  %v901_v26 = vmul.f32 0.17677669, %v890_v19 }
 0x2fc   : > { %v915_v22 = vmax.f32 %v913_v20, %v914_v21 }
 0x2fd   : > { %v931_v37 = vsel %vm903_vm14, %v901_v26, -inf }
 0x2fe   : > { %v916_v23 = vrot.slane %v915_v22, 4 }
 0x300   : > { %v917_v24 = vmax.f32 %v915_v22, %v916_v23  ;;  %v864_v25 = vpop.f32.mrf.mxu3 }
 0x301   : > { %v899_v41 = vmul.f32 0.17677669, %v864_v25 }
 0x302   : > { %v918_v29 = vrot.slane %v917_v24, 2  ;;  %v892_v30 = vpop.f32.mrf.mxu0 }
 0x303   : > { %v902_v33 = vmul.f32 0.17677669, %v892_v30  ;;  %v922_v47 = vsel %vm903_vm14, %v899_v41, -inf }
 0x304   : > { %v919_v34 = vmax.f32 %v917_v24, %v918_v29 }
 0x305   : > { %v932_v38 = vsel %vm903_vm14, %v902_v33, -inf }
 0x306   : > { %v920_v11 = vrot.slane %v919_v34, 1  ;;  %v933_v15 = vmax.f32 %v931_v37, %v932_v38 }
 0x308   : > { %v921_v42 = vmax.f32 %v919_v34, %v920_v11  ;;  %v934_v43 = vrot.slane %v933_v15, 4  ;;  %v866_v1 = vpop.f32.mrf.mxu3 }
 0x309   : > { %v900_v0 = vmul.f32 0.17677669, %v866_v1 }
 0x30a   : > { %v942_v44 = vsub.f32 %v897_v16, %v921_v42  ;;  %v943_v45 = vsub.f32 %v898_v18, %v921_v42  ;;  %v935_v46 = vmax.f32 %v933_v15, %v934_v43  ;;  %v2382_v42 = vld [vmem:[#allocation10 + $0x8] sm:$0xff] }
 0x30b   : > { %v923_v48 = vsel %vm903_vm14, %v900_v0, -inf  ;;  %1174 = vmatpush.bf16.msra.mxu1 %v2382_v42 }
 0x30c   : > { %v952_v49 = vmul.f32 1.442695, %v942_v44  ;;  %v954_v50 = vmul.f32 1.442695, %v943_v45  ;;  %v936_v51 = vrot.slane %v935_v46, 2  ;;  %v924_v52 = vmax.f32 %v922_v47, %v923_v48  ;;  %v2381_v48 = vld [vmem:[#allocation10] sm:$0xff] }
 0x30e   : > { %2557 = vpow2.f32 %v952_v49  ;;  %v937_v53 = vmax.f32 %v935_v46, %v936_v51  ;;  %v925_v54 = vrot.slane %v924_v52, 4 }
 0x30f   : > { %2559 = vpow2.f32 %v954_v50  ;;  %1175 = vmatpush.bf16.msra.mxu1 %v2381_v48 }
 0x310   : > { %v938_v55 = vrot.slane %v937_v53, 1  ;;  %v926_v56 = vmax.f32 %v924_v52, %v925_v54 }
 0x312   : > { %v939_v57 = vmax.f32 %v937_v53, %v938_v55  ;;  %v927_v58 = vrot.slane %v926_v56, 2 }
 0x314   : > { %v2558_v59 = vpop.eup %2557  ;;  %v946_v60 = vsub.f32 %v901_v26, %v939_v57  ;;  %v947_v61 = vsub.f32 %v902_v33, %v939_v57  ;;  %v928_v62 = vmax.f32 %v926_v56, %v927_v58 }
 0x315   : > { %v2560_v63 = vpop.eup %2559  ;;  %v973_v2 = vsel %vm903_vm14, %v2558_v59, 0.0 }
 0x316   : > { %v974_v3 = vsel %vm903_vm14, %v2560_v63, 0.0  ;;  %v960_v4 = vmul.f32 1.442695, %v946_v60  ;;  %v962_v5 = vmul.f32 1.442695, %v947_v61  ;;  %v929_v6 = vrot.slane %v928_v62, 1 }
 0x317   : > { %v975_v7 = vadd.f32 %v974_v3, %v973_v2 }
 0x318   : > { %2561 = vpow2.f32 %v960_v4  ;;  %v930_v9 = vmax.f32 %v928_v62, %v929_v6 }
 0x319   : > { %v976_v10 = vrot.slane %v975_v7, 4  ;;  %2563 = vpow2.f32 %v962_v5 }
 0x31a   : > { %v944_v12 = vsub.f32 %v899_v41, %v930_v9  ;;  %v945_v13 = vsub.f32 %v900_v0, %v930_v9 }
 0x31b   : > { %v977_v14 = vadd.f32 %v976_v10, %v975_v7 }
 0x31c   : > { %v956_v16 = vmul.f32 1.442695, %v944_v12  ;;  %v958_v17 = vmul.f32 1.442695, %v945_v13 }
 0x31d   : > { %v978_v18 = vrot.slane %v977_v14, 2 }
 0x31e   : > { %v2562_v19 = vpop.eup %2561  ;;  %2565 = vpow2.f32 %v956_v16  ;;  %v2384_v16 = vld [vmem:[#allocation10 + $0x18] sm:$0xff] }
 0x31f   : > { %v2564_v20 = vpop.eup %2563  ;;  %v979_v21 = vadd.f32 %v978_v18, %v977_v14  ;;  %v991_v22 = vsel %vm903_vm14, %v2562_v19, 0.0  ;;  %2567 = vpow2.f32 %v958_v17  ;;  %1208 = vmatpush.bf16.msra.mxu2 %v2384_v16  ;;  %v2383_v17 = vld [vmem:[#allocation10 + $0x10] sm:$0xff]  ;;  %v2388_v18 = vld [vmem:[#allocation10 + $0x38] sm:$0xff] }
 0x320   : > { %v992_v23 = vsel %vm903_vm14, %v2564_v20, 0.0  ;;  %1276 = vmatpush.bf16.msrb.mxu0 %v2388_v18 }
 0x321   : > { %v980_v24 = vrot.slane %v979_v21, 1  ;;  %v993_v25 = vadd.f32 %v992_v23, %v991_v22 }
 0x323   : > { %v981_v26 = vadd.f32 %v980_v24, %v979_v21  ;;  %v994_v27 = vrot.slane %v993_v25, 4  ;;  %1209 = vmatpush.bf16.msra.mxu2 %v2383_v17  ;;  %v2385_v21 = vld [vmem:[#allocation10 + $0x20] sm:$0xff] }
 0x324   : > { %v2566_v28 = vpop.eup %2565 }
 0x325   : > { %v2568_v29 = vpop.eup %2567  ;;  %v995_v30 = vadd.f32 %v994_v27, %v993_v25  ;;  %v982_v31 = vsel %vm903_vm14, %v2566_v28, 0.0  ;;  %2569 = vrcp.f32 %v981_v26 }
 0x326   : > { %v983_v32 = vsel %vm903_vm14, %v2568_v29, 0.0 }
 0x327   : > { %v996_v33 = vrot.slane %v995_v30, 2  ;;  %v984_v34 = vadd.f32 %v983_v32, %v982_v31 }
 0x329   : > { %v997_v37 = vadd.f32 %v996_v33, %v995_v30  ;;  %v985_v38 = vrot.slane %v984_v34, 4 }
 0x32b   : > { %v2570_v11 = vpop.eup %2569  ;;  %v998_v15 = vrot.slane %v997_v37, 1  ;;  %v986_v39 = vadd.f32 %v985_v38, %v984_v34 }
 0x32c   : > { %v1006_v40 = vmul.f32 %v2570_v11, %v2558_v59  ;;  %v1007_v41 = vmul.f32 %v2570_v11, %v2560_v63 }
 0x32d   : > { %v999_v43 = vadd.f32 %v998_v15, %v997_v37  ;;  %v987_v1 = vrot.slane %v986_v39, 2 }
 0x32e   : > { %v1014_v0 = vpack.c.bf16 %v1006_v40, %v1006_v40  ;;  %v1015_v44 = vpack.c.bf16 %v1007_v41, %v1007_v41 }
 0x32f   : > { %2571 = vrcp.f32 %v999_v43  ;;  %v988_v45 = vadd.f32 %v987_v1, %v986_v39  ;;  %v1309_v43 = vpop.xlane.xlu2 %1308 }
 0x330   : > { %v1048_v46 = vunpack.c.l.b16 %v1014_v0  ;;  %v1049_v47 = vunpack.c.l.b16 %v1015_v44  ;;  %v1312_v1 = vmul.f32 %v1309_v43, %v3130_v8  ;;  %v1311_v0 = vpop.xlane.xlu1 %1310 }
 0x331   : > { %v989_v49 = vrot.slane %v988_v45, 1  ;;  %v1313_v44 = vmul.f32 %v1311_v0, %v3130_v8 }
 0x332   : > { %v1050_v50 = vpack.c.b16 %v1049_v47, %v1048_v46  ;;  %vm1321_vm15 = vcmp.eq.f32.partialorder %v1312_v1, inf  ;;  %vm1323_vm0 = vcmp.eq.f32.partialorder %v1312_v1, 0.0 }
 0x333   : > { %v990_v51 = vadd.f32 %v989_v49, %v988_v45  ;;  %vm1333_vm1 = vcmp.eq.f32.partialorder %v1313_v44, inf  ;;  %vm1335_vm2 = vcmp.eq.f32.partialorder %v1313_v44, 0.0 }
 0x334   : > { %2180 = vmatmul.msk.bf16.vlgmr.msrb.gmra.mxu2 %vm903_vm14, %v1050_v50 }
 0x335   : > { %v2572_v52 = vpop.eup %2571  ;;  %2573 = vrcp.f32 %v990_v51 }
 0x336   : > { %v1010_v53 = vmul.f32 %v2572_v52, %v2562_v19  ;;  %v1011_v54 = vmul.f32 %v2572_v52, %v2564_v20  ;;  %v2387_v19 = vld [vmem:[#allocation10 + $0x30] sm:$0xff]  ;;  %v2386_v20 = vld [vmem:[#allocation10 + $0x28] sm:$0xff]  ;;  %2575 = vrsqrt.f32 %v1312_v1 }
 0x337   : > { %1277 = vmatpush.bf16.msrb.mxu0 %v2387_v19  ;;  %1242 = vmatpush.bf16.msra.mxu3 %v2386_v20  ;;  %2577 = vrsqrt.f32 %v1313_v44 }
 0x338   : > { %v1019_v55 = vpack.c.bf16 %v1011_v54, %v1011_v54  ;;  %v1018_v56 = vpack.c.bf16 %v1010_v53, %v1010_v53 }
 0x33a   : > { %v1101_v57 = vunpack.c.l.b16 %v1019_v55  ;;  %v1100_v58 = vunpack.c.l.b16 %v1018_v56 }
 0x33b   : > { %v2574_v59 = vpop.eup %2573  ;;  %1243 = vmatpush.bf16.msra.mxu3 %v2385_v21 }
 0x33c   : > { %v1008_v60 = vmul.f32 %v2574_v59, %v2566_v28  ;;  %v1009_v61 = vmul.f32 %v2574_v59, %v2568_v29  ;;  %v1102_v62 = vpack.c.b16 %v1101_v57, %v1100_v58  ;;  %v2576_v45 = vpop.eup %2575  ;;  %v1324_v57 = vand.u32 2147483648, %v1312_v1 }
 0x33d   : > { %v1315_v46 = vmul.f32 %v2576_v45, %v1312_v1  ;;  %v2578_v48 = vpop.eup %2577 }
 0x33e   : > { %v1017_v63 = vpack.c.bf16 %v1009_v61, %v1009_v61  ;;  %2182 = vmatmul.msk.bf16.vlgmr.msra.gmra.mxu0 %vm903_vm14, %v1102_v62  ;;  %v1016_v2 = vpack.c.bf16 %v1008_v60, %v1008_v60  ;;  %v1327_v50 = vmul.f32 %v2578_v48, %v1313_v44 }
 0x33f   : > { %v1316_v47 = vmul.f32 %v2576_v45, %v1315_v46 }
 0x340   : > { %v1075_v3 = vunpack.c.l.b16 %v1017_v63  ;;  %v1074_v4 = vunpack.c.l.b16 %v1016_v2  ;;  %v1328_v52 = vmul.f32 %v2578_v48, %v1327_v50  ;;  %v1336_v63 = vand.u32 2147483648, %v1313_v44 }
 0x341   : > { %v1317_v49 = vmul.f32 0.5, %v1316_v47 }
 0x342   : > { %v1076_v5 = vpack.c.b16 %v1075_v3, %v1074_v4  ;;  %v1329_v54 = vmul.f32 0.5, %v1328_v52 }
 0x343   : > { %v1318_v51 = vsub.f32 1.5, %v1317_v49 }
 0x344   : > { %2181 = vmatmul.msk.bf16.vlgmr.msrb.gmra.mxu3 %vm903_vm14, %v1076_v5  ;;  %v1330_v56 = vsub.f32 1.5, %v1329_v54  ;;  %v2404_v54 = vld [vmem:[#allocation11 + $0x74] sm:$0xf0] }
 0x345   : > { %v1041_v6 = vpop.f32.mrf.mxu1  ;;  %v1319_v53 = vmul.f32 %v2576_v45, %v1318_v51 }
 0x346   : > { %v1124_v7 = vpack.c.bf16 %v1041_v6, %v1041_v6  ;;  %v1331_v58 = vmul.f32 %v2578_v48, %v1330_v56 }
 0x347   : > { %v1320_v55 = vmul.f32 %v1319_v53, %v1312_v1 }
 0x348   : > { %v1150_v12 = vunpack.c.l.b16 %v1124_v7  ;;  %v1332_v61 = vmul.f32 %v1331_v58, %v1313_v44 }
 0x349   : > { %v1322_v59 = vsel %vm1321_vm15, %v1312_v1, %v1320_v55  ;;  %v2403_v55 = vld [vmem:[#allocation11 + $0x74] sm:$0xf] }
 0x34a   : > { %v1325_v60 = vsel %vm1323_vm0, %v1324_v57, %v1322_v59  ;;  %v1334_v2 = vsel %vm1333_vm1, %v1313_v44, %v1332_v61  ;;  %v2279_v57 = vld [vmem:[#allocation11 + $0x78] sm:$0xf0]  ;;  %v2269_v59 = vld [vmem:[#allocation11 + $0x60] sm:$0xf]  ;;  %v2401_v61 = vld [vmem:[#allocation11 + $0x64] sm:$0xf] }
 0x34b   : > { %v1338_v62 = vadd.f32 0.001, %v1325_v60  ;;  %v1337_v3 = vsel %vm1335_vm2, %v1336_v63, %v1334_v2  ;;  %v2282_v58 = vor.u32 %v2403_v55, %v2279_v57  ;;  %v2402_v60 = vld [vmem:[#allocation11 + $0x64] sm:$0xf0]  ;;  %v2271_v63 = vld [vmem:[#allocation11 + $0x68] sm:$0xf0] }
 0x34c   : > { %v1339_v4 = vadd.f32 0.001, %v1337_v3  ;;  %v2274_v2 = vor.u32 %v2401_v61, %v2271_v63  ;;  %v2261_v3 = vld [vmem:[#allocation11 + $0x50] sm:$0xf] }
 0x34d   : > { %v1043_v9 = vpop.f32.mrf.mxu1  ;;  %2579 = vrcp.f32 %v1338_v62  ;;  %vm1345_vm3 = vweird.f32 %v1338_v62  ;;  %v1349_v17 = vand.u32 2147483647, %v1338_v62  ;;  %1555 = vmatpush.bf16.msrb.mxu2 %v2282_v58 }
 0x34e   : > { %v1125_v10 = vpack.c.bf16 %v1043_v9, %v1043_v9  ;;  %2581 = vrcp.f32 %v1339_v4  ;;  %vm1360_vm7 = vweird.f32 %v1339_v4 }
 0x34f   : > { %vm1350_vm6 = vcmp.eq.f32.partialorder %v1349_v17, 8.507059e+37 }
 0x350   : > { %v1151_v13 = vunpack.c.l.b16 %v1125_v10 }
 0x351   : > { %1556 = vmatpush.bf16.msrb.mxu2 %v2274_v2 }
 0x352   : > { %v1152_v14 = vpack.c.b16 %v1151_v13, %v1150_v12 }
 0x353   : > { %v2580_v5 = vpop.eup %2579 }
 0x354   : > { %2191 = vmatmul.msk.bf16.vlgmr.msra.gmra.mxu1 %vm796_vm13, %v1152_v14  ;;  %v1341_v6 = vmul.f32 %v2580_v5, %v1338_v62  ;;  %v2582_v9 = vpop.eup %2581  ;;  %vm1346_vm4 = vweird.f32 %v2580_v5  ;;  %v1351_v14 = vand.u32 2147483648, %v1338_v62  ;;  %v2270_v62 = vor.u32 %v2402_v60, %v2269_v59 }
 0x355   : > { %v1356_v12 = vmul.f32 %v2582_v9, %v1339_v4  ;;  %vm1347_vm5 = vmor %vm1345_vm3, %vm1346_vm4  ;;  %vm1361_vm8 = vweird.f32 %v2582_v9 }
 0x356   : > { %v1342_v7 = vsub.f32 1.0, %v1341_v6  ;;  %v1352_v20 = vor.u32 1.1754944e-38, %v1351_v14  ;;  %vm1362_vm9 = vmor %vm1360_vm7, %vm1361_vm8  ;;  %v2255_v14 = vld [vmem:[#allocation11 + $0x48] sm:$0xf0] }
 0x357   : > { %v1357_v18 = vsub.f32 1.0, %v1356_v12 }
 0x358   : > { %v1343_v10 = vmul.f32 %v2580_v5, %v1342_v7  ;;  %v2263_v7 = vld [vmem:[#allocation11 + $0x58] sm:$0xf0] }
 0x35a   : > { %v1344_v16 = vadd.f32 %v2580_v5, %v1343_v10  ;;  %v2398_v10 = vld [vmem:[#allocation11 + $0x44] sm:$0xf0] }
 0x3b7   : > { %v1067_v22 = vpop.f32.mrf.mxu2 }
 0x3b8   : > { %v1126_v24 = vpack.c.bf16 %v1067_v22, %v1067_v22  ;;  %v1348_v22 = vsel %vm1347_vm5, %v2580_v5, %v1344_v16  ;;  %v2399_v5 = vld [vmem:[#allocation11 + $0x54] sm:$0xf] }
 0x3b9   : > { %v2266_v12 = vor.u32 %v2399_v5, %v2263_v7 }
 0x3ba   : > { %v1184_v27 = vunpack.c.l.b16 %v1126_v24 }
 0x3bb   : > { %v1119_v23 = vpop.f32.mrf.mxu0  ;;  %1557 = vmatpush.bf16.msrb.mxu2 %v2266_v12 }
 0x3bc   : > { %v1130_v28 = vpack.c.bf16 %v1119_v23, %v1119_v23  ;;  %v1358_v23 = vmul.f32 %v2582_v9, %v1357_v18 }
 0x3be   : > { %v1252_v33 = vunpack.c.l.b16 %v1130_v28  ;;  %v1353_v28 = vsel %vm1350_vm6, %v1352_v20, %v1348_v22  ;;  %v2245_v20 = vld [vmem:[#allocation11 + $0x30] sm:$0xf]  ;;  %v2395_v22 = vld [vmem:[#allocation11 + $0x34] sm:$0xf] }
 0x3bf   : > { %v1069_v25 = vpop.f32.mrf.mxu2 }
 0x3c0   : > { %v1127_v26 = vpack.c.bf16 %v1069_v25, %v1069_v25 }
 0x3c2   : > { %v1185_v29 = vunpack.c.l.b16 %v1127_v26 }
 0x3c3   : > { %v1121_v30 = vpop.f32.mrf.mxu0 }
 0x3c4   : > { %v1186_v31 = vpack.c.b16 %v1185_v29, %v1184_v27  ;;  %v1131_v32 = vpack.c.bf16 %v1121_v30, %v1121_v30  ;;  %v2540_v27 = vld [vmem:[%s3386_s5] ss:$0 sm:$0xff]  ;;  %v1366_v29 = vand.u32 2147483648, %v1339_v4 }
 0x3c6   : > { %v1253_v34 = vunpack.c.l.b16 %v1131_v32  ;;  %2200 = vmatmul.msk.bf16.vlgmr.msra.gmra.mxu2 %vm796_vm13, %v1186_v31  ;;  %v1359_v31 = vadd.f32 %v2582_v9, %v1358_v23  ;;  %v1364_v32 = vand.u32 2147483647, %v1339_v4  ;;  %v2400_v4 = vld [vmem:[#allocation11 + $0x54] sm:$0xf0]  ;;  %v2247_v23 = vld [vmem:[#allocation11 + $0x38] sm:$0xf0] }
 0x3c7   : > { %v1093_v37 = vpop.f32.mrf.mxu3  ;;  %v2262_v6 = vor.u32 %v2400_v4, %v2261_v3 }
 0x3c8   : > { %v1254_v38 = vpack.c.b16 %v1253_v34, %v1252_v33  ;;  %v1128_v11 = vpack.c.bf16 %v1093_v37, %v1093_v37  ;;  %v1354_v37 = vmul.f32 %v1353_v28, %v3183_v36  ;;  %vm1365_vm10 = vcmp.eq.f32.partialorder %v1364_v32, 8.507059e+37  ;;  %v2393_v28 = vld [vmem:[#allocation11 + $0x24] sm:$0xf] }
 0x3ca   : > { %2218 = vmatmul.msk.bf16.vlgmr.msrb.gmra.mxu0 %vm796_vm13, %v1254_v38  ;;  %v1218_v40 = vunpack.c.l.b16 %v1128_v11  ;;  %v1367_v11 = vor.u32 1.1754944e-38, %v1366_v29  ;;  %v2239_v29 = vld [vmem:[#allocation11 + $0x28] sm:$0xf0] }
 0x3cf   : > { %v1095_v15 = vpop.f32.mrf.mxu3 }
 0x3d0   : > { %v1129_v39 = vpack.c.bf16 %v1095_v15, %v1095_v15 }
 0x3d1   : > { %v1177_v19 = vpop.f32.mrf.mxu1 }
 0x3d2   : > { %v1219_v41 = vunpack.c.l.b16 %v1129_v39 }
 0x3d4   : > { %v1220_v42 = vpack.c.b16 %v1219_v41, %v1218_v40  ;;  %v1363_v40 = vsel %vm1362_vm9, %v2582_v9, %v1359_v31  ;;  %v2253_v9 = vld [vmem:[#allocation11 + $0x40] sm:$0xf] }
 0x3d5   : > { %v1368_v1 = vsel %vm1365_vm10, %v1367_v11, %v1363_v40  ;;  %v2254_v17 = vor.u32 %v2398_v10, %v2253_v9 }
 0x3d6   : > { %2209 = vmatmul.msk.bf16.vlgmr.msra.gmra.mxu3 %vm796_vm13, %v1220_v42  ;;  %v1369_v45 = vmul.f32 %v1368_v1, %v3180_v35  ;;  %v2277_v35 = vld [vmem:[#allocation11 + $0x70] sm:$0xf]  ;;  %v2390_v1 = vld [vmem:[#allocation11 + $0x4] sm:$0xf0] }
 0x3d7   : > { %v2278_v56 = vor.u32 %v2404_v54, %v2277_v35 }
 0x3d9   : > { %v1179_v38 = vpop.f32.mrf.mxu1  ;;  %1541 = vmatpush.bf16.msrb.mxu1 %v2278_v56 }
 0x3dd   : > { %1542 = vmatpush.bf16.msrb.mxu1 %v2270_v62 }
 0x3e1   : > { %1543 = vmatpush.bf16.msrb.mxu1 %v2262_v6 }
 0x3e5   : > { %1544 = vmatpush.bf16.msrb.mxu1 %v2254_v17 }
 0x447   : > { %v1279_v24 = vpop.f32.mrf.mxu0 }
 0x449   : > { %v1211_v13 = vpop.f32.mrf.mxu2 }
 0x44a   : > { %v1284_v21 = vadd.f32 %v1211_v13, %v1177_v19  ;;  %v2397_v13 = vld [vmem:[#allocation11 + $0x44] sm:$0xf] }
 0x44b   : > { %v2258_v19 = vor.u32 %v2397_v13, %v2255_v14 }
 0x44d   : > { %1558 = vmatpush.bf16.msrb.mxu2 %v2258_v19 }
 0x44f   : > { %v1281_v43 = vpop.f32.mrf.mxu0 }
 0x451   : > { %v1213_v33 = vpop.f32.mrf.mxu2 }
 0x452   : > { %v1287_v15 = vadd.f32 %v1213_v33, %v1179_v38  ;;  %v2392_v38 = vld [vmem:[#allocation11 + $0x14] sm:$0xf0] }
 0x459   : > { %v1245_v25 = vpop.f32.mrf.mxu3 }
 0x45a   : > { %v1285_v26 = vadd.f32 %v1284_v21, %v1245_v25  ;;  %v2396_v21 = vld [vmem:[#allocation11 + $0x34] sm:$0xf0]  ;;  %v2250_v25 = vor.u32 %v2395_v22, %v2247_v23 }
 0x45c   : > { %v1286_v30 = vadd.f32 %v1285_v26, %v1279_v24  ;;  %v2246_v24 = vor.u32 %v2396_v21, %v2245_v20  ;;  %v2237_v26 = vld [vmem:[#allocation11 + $0x20] sm:$0xf]  ;;  %1559 = vmatpush.bf16.msrb.mxu2 %v2250_v25 }
 0x45e   : > { %v1294_v34 = vadd.f32 %v2540_v27, %v1286_v30  ;;  %1545 = vmatpush.bf16.msrb.mxu1 %v2246_v24 }
 0x460   : > { %v1370_v39 = vadd.f32 %v1354_v37, %v1294_v34  ;;  %v2242_v34 = vor.u32 %v2393_v28, %v2239_v29  ;;  %v2229_v37 = vld [vmem:[#allocation11 + $0x10] sm:$0xf]  ;;  %v2905_v29 = vmov 1.4142135  }
 0x461   : > { %v1247_v41 = vpop.f32.mrf.mxu3 }
 0x462   : > { %v1288_v42 = vadd.f32 %v1287_v15, %v1247_v41  ;;  %1372 = vadd.xlane.f32.xlu0 %v1370_v39  ;;  %v2391_v15 = vld [vmem:[#allocation11 + $0x14] sm:$0xf]  ;;  %v2230_v41 = vor.u32 %v2392_v38, %v2229_v37  ;;  %1560 = vmatpush.bf16.msrb.mxu2 %v2242_v34 }
 0x464   : > { %v1289_v0 = vadd.f32 %v1288_v42, %v1281_v43  ;;  %v2221_v43 = vld [vmem:[#allocation11] sm:$0xf] }
 0x466   : > { %v1295_v44 = vadd.f32 %v2540_v27, %v1289_v0  ;;  %v2394_v27 = vld [vmem:[#allocation11 + $0x24] sm:$0xf0] }
 0x467   : > { %v2238_v31 = vor.u32 %v2394_v27, %v2237_v26 }
 0x468   : > { %v1371_v46 = vadd.f32 %v1369_v45, %v1295_v44  ;;  %v2389_v44 = vld [vmem:[#allocation11 + $0x4] sm:$0xf]  ;;  %v2223_v45 = vld [vmem:[#allocation11 + $0x8] sm:$0xf0] }
 0x469   : > { %1546 = vmatpush.bf16.msrb.mxu1 %v2238_v31 }
 0x46a   : > { %1374 = vadd.xlane.f32.xlu2 %v1371_v46 }
 0x46d   : > { %1547 = vmatpush.bf16.msrb.mxu1 %v2230_v41 }
 0x4d5   : > { %v1373_v47 = vpop.xlane.xlu0 %1372 }
 0x4d6   : > { %v1376_v36 = vmul.f32 %v1373_v47, %v3130_v8 }
 0x4d8   : > { %v3214_v48 = vsub.f32 %v1370_v39, %v1376_v36  ;;  %v2231_v39 = vld [vmem:[#allocation11 + $0x18] sm:$0xf0]  ;;  %v2226_v36 = vor.u32 %v2389_v44, %v2223_v45  ;;  %v2411_v45 = vld [vmem:[#allocation13 + $0x30] sm:$0xff] }
 0x4d9   : > { %v2234_v42 = vor.u32 %v2391_v15, %v2231_v39  ;;  %v2412_v15 = vld [vmem:[#allocation13 + $0x38] sm:$0xff] }
 0x4da   : > { %v1380_v49 = vmul.f32 %v3214_v48, %v3214_v48  ;;  %1882 = vmatpush.bf16.msrb.mxu3 %v2412_v15 }
 0x4db   : > { %1561 = vmatpush.bf16.msrb.mxu2 %v2234_v42 }
 0x4dc   : > { %1382 = vadd.xlane.f32.xlu1 %v1380_v49 }
 0x4dd   : > { %v1375_v50 = vpop.xlane.xlu2 %1374 }
 0x4de   : > { %v1377_v51 = vmul.f32 %v1375_v50, %v3130_v8  ;;  %1883 = vmatpush.bf16.msrb.mxu3 %v2411_v45 }
 0x4df   : > { %1562 = vmatpush.bf16.msrb.mxu2 %v2226_v36  ;;  %v2420_v36 = vld [vmem:[#allocation13 + $0x78] sm:$0xff] }
 0x4e0   : > { %v3219_v52 = vsub.f32 %v1371_v46, %v1377_v51  ;;  %1896 = vmatpush.bf16.msra.mxu0 %v2420_v36 }
 0x4e2   : > { %v1381_v53 = vmul.f32 %v3219_v52, %v3219_v52 }
 0x4e4   : > { %1384 = vadd.xlane.f32.xlu0 %v1381_v53 }
 0x54f   : > { %v1383_v16 = vpop.xlane.xlu1 %1382 }
 0x550   : > { %v1386_v18 = vmul.f32 %v1383_v16, %v3130_v8 }
 0x552   : > { %2583 = vrsqrt.f32 %v1386_v18  ;;  %vm1395_vm11 = vcmp.eq.f32.partialorder %v1386_v18, inf  ;;  %v1398_v35 = vand.u32 2147483648, %v1386_v18  ;;  %vm1397_vm12 = vcmp.eq.f32.partialorder %v1386_v18, 0.0 }
 0x557   : > { %v1385_v30 = vpop.xlane.xlu0 %1384 }
 0x558   : > { %v2584_v32 = vpop.eup %2583  ;;  %v1387_v33 = vmul.f32 %v1385_v30, %v3130_v8  ;;  %v2222_v8 = vor.u32 %v2390_v1, %v2221_v43 }
 0x559   : > { %v1389_v11 = vmul.f32 %v2584_v32, %v1386_v18 }
 0x55a   : > { %2585 = vrsqrt.f32 %v1387_v33  ;;  %1548 = vmatpush.bf16.msrb.mxu1 %v2222_v8  ;;  %vm1407_vm13 = vcmp.eq.f32.partialorder %v1387_v33, inf  ;;  %v1410_v61 = vand.u32 2147483648, %v1387_v33  ;;  %vm1409_vm14 = vcmp.eq.f32.partialorder %v1387_v33, 0.0 }
 0x55b   : > { %v1390_v40 = vmul.f32 %v2584_v32, %v1389_v11 }
 0x55d   : > { %v1391_v0 = vmul.f32 0.5, %v1390_v40 }
 0x55f   : > { %v1392_v46 = vsub.f32 1.5, %v1391_v0 }
 0x560   : > { %v2586_v47 = vpop.eup %2585 }
 0x561   : > { %v1393_v49 = vmul.f32 %v2584_v32, %v1392_v46  ;;  %v1401_v50 = vmul.f32 %v2586_v47, %v1387_v33 }
 0x563   : > { %v1394_v51 = vmul.f32 %v1393_v49, %v1386_v18  ;;  %v1402_v53 = vmul.f32 %v2586_v47, %v1401_v50 }
 0x565   : > { %v1396_v54 = vsel %vm1395_vm11, %v1386_v18, %v1394_v51  ;;  %v1403_v55 = vmul.f32 0.5, %v1402_v53 }
 0x566   : > { %v1399_v56 = vsel %vm1397_vm12, %v1398_v35, %v1396_v54 }
 0x567   : > { %v1404_v57 = vsub.f32 1.5, %v1403_v55  ;;  %v1412_v58 = vadd.f32 0.001, %v1399_v56  ;;  %v2410_v55 = vld [vmem:[#allocation13 + $0x28] sm:$0xff] }
 0x568   : > { %1884 = vmatpush.bf16.msrb.mxu3 %v2410_v55 }
 0x569   : > { %v1405_v59 = vmul.f32 %v2586_v47, %v1404_v57  ;;  %2587 = vrcp.f32 %v1412_v58  ;;  %v1425_v12 = vand.u32 2147483648, %v1412_v58  ;;  %vm1419_vm0 = vweird.f32 %v1412_v58 }
 0x56a   : > { %v1423_v13 = vand.u32 2147483647, %v1412_v58 }
 0x56b   : > { %v1406_v60 = vmul.f32 %v1405_v59, %v1387_v33  ;;  %v1426_v20 = vor.u32 1.1754944e-38, %v1425_v12  ;;  %v2418_v12 = vld [vmem:[#allocation13 + $0x68] sm:$0xff] }
 0x56c   : > { %vm1424_vm3 = vcmp.eq.f32.partialorder %v1423_v13, 8.507059e+37 }
 0x56d   : > { %v1408_v62 = vsel %vm1407_vm13, %v1387_v33, %v1406_v60 }
 0x56e   : > { %v1411_v63 = vsel %vm1409_vm14, %v1410_v61, %v1408_v62 }
 0x56f   : > { %v2588_v2 = vpop.eup %2587  ;;  %v1413_v3 = vadd.f32 0.001, %v1411_v63 }
 0x570   : > { %v1415_v4 = vmul.f32 %v2588_v2, %v1412_v58  ;;  %vm1420_vm15 = vweird.f32 %v2588_v2  ;;  %v2419_v58 = vld [vmem:[#allocation13 + $0x70] sm:$0xff] }
 0x571   : > { %2589 = vrcp.f32 %v1413_v3  ;;  %vm1421_vm1 = vmor %vm1419_vm0, %vm1420_vm15  ;;  %v1440_v16 = vand.u32 2147483648, %v1413_v3  ;;  %v1438_v19 = vand.u32 2147483647, %v1413_v3  ;;  %vm1434_vm4 = vweird.f32 %v1413_v3  ;;  %1897 = vmatpush.bf16.msra.mxu0 %v2419_v58 }
 0x572   : > { %v1416_v5 = vsub.f32 1.0, %v1415_v4  ;;  %2591 = vrcp.f32 %v2905_v29 }
 0x573   : > { %v1441_v23 = vor.u32 1.1754944e-38, %v1440_v16  ;;  %vm1439_vm6 = vcmp.eq.f32.partialorder %v1438_v19, 8.507059e+37 }
 0x574   : > { %v1417_v6 = vmul.f32 %v2588_v2, %v1416_v5 }
 0x575   : > { %1898 = vmatpush.bf16.msra.mxu0 %v2418_v12 }
 0x576   : > { %v1418_v9 = vadd.f32 %v2588_v2, %v1417_v6 }
 0x577   : > { %v2590_v7 = vpop.eup %2589 }
 0x578   : > { %v1430_v10 = vmul.f32 %v2590_v7, %v1413_v3  ;;  %v1422_v17 = vsel %vm1421_vm1, %v2588_v2, %v1418_v9  ;;  %vm1435_vm2 = vweird.f32 %v2590_v7  ;;  %v2592_v30 = vpop.eup %2591  ;;  %v2409_v3 = vld [vmem:[#allocation13 + $0x20] sm:$0xff] }
 0x579   : > { %v1427_v22 = vsel %vm1424_vm3, %v1426_v20, %v1422_v17  ;;  %vm1436_vm5 = vmor %vm1434_vm4, %vm1435_vm2  ;;  %v1574_v31 = vmul.f32 1.4142135, %v2592_v30  ;;  %vm1578_vm7 = vweird.f32 %v2592_v30  ;;  %1885 = vmatpush.bf16.msrb.mxu3 %v2409_v3  ;;  %v2408_v20 = vld [vmem:[#allocation13 + $0x18] sm:$0xff]  ;;  %v2405_v3 = vld [vmem:[#allocation13] sm:$0xff] }
 0x57a   : > { %v1431_v14 = vsub.f32 1.0, %v1430_v10  ;;  %v3226_v26 = vmul.f32 %v1427_v22, %v3214_v48 }
 0x57b   : > { %v1575_v32 = vsub.f32 1.0, %v1574_v31 }
 0x57c   : > { %v1432_v18 = vmul.f32 %v2590_v7, %v1431_v14 }
 0x57d   : > { %v1576_v33 = vmul.f32 %v2592_v30, %v1575_v32  ;;  %1886 = vmatpush.bf16.msrb.mxu3 %v2408_v20 }
 0x57e   : > { %v1433_v21 = vadd.f32 %v2590_v7, %v1432_v18 }
 0x57f   : > { %v1577_v34 = vadd.f32 %v2592_v30, %v1576_v33 }
 0x580   : > { %v1437_v24 = vsel %vm1436_vm5, %v2590_v7, %v1433_v21 }
 0x581   : > { %v1442_v25 = vsel %vm1439_vm6, %v1441_v23, %v1437_v24  ;;  %v1579_v37 = vsel %vm1578_vm7, %v2592_v30, %v1577_v34  ;;  %v2417_v30 = vld [vmem:[#allocation13 + $0x60] sm:$0xff] }
 0x582   : > { %v3229_v27 = vmul.f32 %v1442_v25, %v3219_v52  ;;  %1899 = vmatpush.bf16.msra.mxu0 %v2417_v30 }
 0x584   : > { %v1444_v28 = vpack.c.bf16 %v3229_v27, %v3226_v26 }
 0x586   : > { %1549 = vmatmul.bf16.vlgmr.msrb.gmra.mxu1 %v1444_v28  ;;  %1563 = vmatmul.bf16.vlgmr.msrb.gmra.mxu2 %v1444_v28 }
 0x603   : > { %v3233_v38 = vpop.f32.mrf.mxu1 }
 0x604   : > { %v3236_v48 = vmul.f32 %v1579_v37, %v3233_v38 }
 0x606   : > { %v1584_v52 = vmul.f32 %v3236_v48, %v3236_v48 }
 0x608   : > { %v3240_v11 = vmin.f32 %v1584_v52, 16.0  ;;  %v2407_v52 = vld [vmem:[#allocation13 + $0x10] sm:$0xff] }
 0x609   : > { %v3242_v39 = vpop.f32.mrf.mxu2  ;;  %1887 = vmatpush.bf16.msrb.mxu3 %v2407_v52 }
 0x60a   : > { %v1586_v40 = vmul.f32 2.1237322e-06, %v3240_v11  ;;  %v1597_v41 = vmul.f32 3.8918573e-05, %v3240_v11  ;;  %v3247_v42 = vmul.f32 %v1579_v37, %v3242_v39 }
 0x60b   : > { %v3249_v43 = vpop.f32.mrf.mxu1 }
 0x60c   : > { %v1587_v1 = vadd.f32 0.00028619796, %v1586_v40  ;;  %v1598_v0 = vadd.f32 0.001143296, %v1597_v41  ;;  %v1624_v44 = vmul.f32 %v3247_v42, %v3247_v42  ;;  %v3254_v46 = vmul.f32 %v1579_v37, %v3249_v43 }
 0x60e   : > { %v1599_v8 = vmul.f32 %v1598_v0, %v3240_v11  ;;  %v3257_v47 = vmin.f32 %v1624_v44, 16.0  ;;  %v1664_v49 = vmul.f32 %v3254_v46, %v3254_v46  ;;  %v1588_v50 = vmul.f32 %v1587_v1, %v3240_v11  ;;  %v2416_v44 = vld [vmem:[#allocation13 + $0x58] sm:$0xff] }
 0x60f   : > { %1900 = vmatpush.bf16.msra.mxu0 %v2416_v44 }
 0x610   : > { %v1600_v51 = vadd.f32 0.014752088, %v1599_v8  ;;  %v1637_v53 = vmul.f32 3.8918573e-05, %v3257_v47  ;;  %v3263_v35 = vmin.f32 %v1664_v49, 16.0  ;;  %v2406_v49 = vld [vmem:[#allocation13 + $0x8] sm:$0xff] }
 0x611   : > { %v3265_v54 = vpop.f32.mrf.mxu2  ;;  %v1626_v57 = vmul.f32 2.1237322e-06, %v3257_v47  ;;  %v1589_v63 = vadd.f32 0.0036580483, %v1588_v50  ;;  %1888 = vmatpush.bf16.msrb.mxu3 %v2406_v49 }
 0x612   : > { %v1601_v56 = vmul.f32 %v1600_v51, %v3240_v11  ;;  %v1638_v59 = vadd.f32 0.001143296, %v1637_v53  ;;  %v1666_v60 = vmul.f32 2.1237322e-06, %v3263_v35  ;;  %v1677_v61 = vmul.f32 3.8918573e-05, %v3263_v35 }
 0x613   : > { %v3272_v62 = vmul.f32 %v1579_v37, %v3265_v54  ;;  %v1627_v10 = vadd.f32 0.00028619796, %v1626_v57  ;;  %v1590_v18 = vmul.f32 %v1589_v63, %v3240_v11 }
 0x614   : > { %v1602_v2 = vadd.f32 0.112945676, %v1601_v56  ;;  %v1639_v4 = vmul.f32 %v1638_v59, %v3257_v47  ;;  %v1667_v5 = vadd.f32 0.00028619796, %v1666_v60  ;;  %v1678_v6 = vadd.f32 0.001143296, %v1677_v61 }
 0x615   : > { %v1704_v7 = vmul.f32 %v3272_v62, %v3272_v62  ;;  %v1628_v28 = vmul.f32 %v1627_v10, %v3257_v47  ;;  %v1591_v33 = vadd.f32 0.05243302, %v1590_v18  ;;  %v2415_v59 = vld [vmem:[#allocation13 + $0x50] sm:$0xff]  ;;  %v2414_v10 = vld [vmem:[#allocation13 + $0x48] sm:$0xff]  ;;  %1889 = vmatpush.bf16.msrb.mxu3 %v2405_v3 }
 0x616   : > { %v1603_v9 = vmul.f32 %v1602_v2, %v3240_v11  ;;  %v1640_v13 = vadd.f32 0.014752088, %v1639_v4  ;;  %v1668_v14 = vmul.f32 %v1667_v5, %v3263_v35  ;;  %v1679_v16 = vmul.f32 %v1678_v6, %v3263_v35  ;;  %1901 = vmatpush.bf16.msra.mxu0 %v2415_v59 }
 0x617   : > { %v3280_v17 = vmin.f32 %v1704_v7, 16.0  ;;  %v1629_v0 = vadd.f32 0.0036580483, %v1628_v28  ;;  %v1592_v50 = vmul.f32 %v1591_v33, %v3240_v11 }
 0x618   : > { %v1604_v19 = vadd.f32 0.4994258, %v1603_v9  ;;  %v1641_v21 = vmul.f32 %v1640_v13, %v3257_v47  ;;  %v1669_v22 = vadd.f32 0.0036580483, %v1668_v14  ;;  %v1680_v23 = vadd.f32 0.014752088, %v1679_v16 }
 0x619   : > { %v1706_v24 = vmul.f32 2.1237322e-06, %v3280_v17  ;;  %v1717_v29 = vmul.f32 3.8918573e-05, %v3280_v17  ;;  %v1630_v56 = vmul.f32 %v1629_v0, %v3257_v47  ;;  %v1593_v4 = vadd.f32 0.18741608, %v1592_v50 }
 0x61a   : > { %v1605_v25 = vmul.f32 %v1604_v19, %v3240_v11  ;;  %v1642_v31 = vadd.f32 0.112945676, %v1641_v21  ;;  %v1681_v32 = vmul.f32 %v1680_v23, %v3263_v35  ;;  %v1670_v40 = vmul.f32 %v1669_v22, %v3263_v35  ;;  %1902 = vmatpush.bf16.msra.mxu0 %v2414_v10  ;;  %v2413_v23 = vld [vmem:[#allocation13 + $0x40] sm:$0xff] }
 0x61b   : > { %v1718_v37 = vadd.f32 0.001143296, %v1717_v29  ;;  %v1707_v1 = vadd.f32 0.00028619796, %v1706_v24  ;;  %v1631_v7 = vadd.f32 0.05243302, %v1630_v56  ;;  %v1594_v16 = vmul.f32 %v1593_v4, %v3240_v11 }
 0x61c   : > { %v3289_v34 = vadd.f32 1.0, %v1605_v25  ;;  %v1643_v15 = vmul.f32 %v1642_v31, %v3257_v47  ;;  %v1682_v41 = vadd.f32 0.112945676, %v1681_v32  ;;  %v1671_v53 = vadd.f32 0.05243302, %v1670_v40 }
 0x61d   : > { %v1719_v36 = vmul.f32 %v1718_v37, %v3280_v17  ;;  %v1708_v55 = vmul.f32 %v1707_v1, %v3280_v17  ;;  %v1632_v20 = vmul.f32 %v1631_v7, %v3257_v47  ;;  %v1595_v30 = vadd.f32 1.1283791, %v1594_v16 }
 0x61e   : > { %2593 = vrcp.f32 %v3289_v34  ;;  %v1644_v45 = vadd.f32 0.4994258, %v1643_v15  ;;  %v1683_v8 = vmul.f32 %v1682_v41, %v3263_v35  ;;  %v1672_v9 = vmul.f32 %v1671_v53, %v3263_v35  ;;  %1903 = vmatpush.bf16.msra.mxu0 %v2413_v23 }
 0x61f   : > { %v1720_v58 = vadd.f32 0.014752088, %v1719_v36  ;;  %v1709_v6 = vadd.f32 0.0036580483, %v1708_v55  ;;  %v1618_v28 = vand.u32 2147483648, %v3289_v34  ;;  %vm1612_vm9 = vweird.f32 %v3289_v34 }
 0x620   : > { %v1645_v51 = vmul.f32 %v1644_v45, %v3257_v47  ;;  %v1684_v57 = vadd.f32 0.4994258, %v1683_v8  ;;  %v1673_v21 = vadd.f32 0.18741608, %v1672_v9  ;;  %v1616_v11 = vand.u32 2147483647, %v3289_v34 }
 0x621   : > { %v1721_v2 = vmul.f32 %v1720_v58, %v3280_v17  ;;  %v1710_v19 = vmul.f32 %v1709_v6, %v3280_v17  ;;  %v1633_v37 = vadd.f32 0.18741608, %v1632_v20  ;;  %v1619_v41 = vor.u32 1.1754944e-38, %v1618_v28 }
 0x622   : > { %v3300_v60 = vadd.f32 1.0, %v1645_v51  ;;  %v1685_v63 = vmul.f32 %v1684_v57, %v3263_v35  ;;  %v1674_v15 = vmul.f32 %v1673_v21, %v3263_v35  ;;  %vm1617_vm11 = vcmp.eq.f32.partialorder %v1616_v11, 8.507059e+37 }
 0x623   : > { %v1722_v14 = vadd.f32 0.112945676, %v1721_v2  ;;  %v1711_v31 = vadd.f32 0.05243302, %v1710_v19  ;;  %v1596_v36 = vmul.f32 %v1595_v30, %v3236_v48  ;;  %v1634_v49 = vmul.f32 %v1633_v37, %v3257_v47 }
 0x624   : > { %v2594_v61 = vpop.eup %2593  ;;  %2595 = vrcp.f32 %v3300_v60  ;;  %v3307_v13 = vadd.f32 1.0, %v1685_v63  ;;  %v1675_v50 = vadd.f32 1.1283791, %v1674_v15  ;;  %vm1652_vm14 = vweird.f32 %v3300_v60 }
 0x625   : > { %v1608_v5 = vmul.f32 %v2594_v61, %v3289_v34  ;;  %vm1613_vm8 = vweird.f32 %v2594_v61  ;;  %v1723_v22 = vmul.f32 %v1722_v14, %v3280_v17  ;;  %v1712_v45 = vmul.f32 %v1711_v31, %v3280_v17 }
 0x626   : > { %2597 = vrcp.f32 %v3307_v13  ;;  %vm1614_vm10 = vmor %vm1612_vm9, %vm1613_vm8  ;;  %v1696_v35 = vand.u32 2147483647, %v3307_v13  ;;  %v1698_v53 = vand.u32 2147483648, %v3307_v13  ;;  %v1658_v58 = vand.u32 2147483648, %v3300_v60 }
 0x627   : > { %v1609_v12 = vsub.f32 1.0, %v1608_v5  ;;  %v1724_v32 = vadd.f32 0.4994258, %v1723_v22  ;;  %v1713_v59 = vadd.f32 0.18741608, %v1712_v45  ;;  %vm1692_vm0 = vweird.f32 %v3307_v13 }
 0x628   : > { %v1656_v47 = vand.u32 2147483647, %v3300_v60  ;;  %v1635_v63 = vadd.f32 1.1283791, %v1634_v49  ;;  %v1676_v2 = vmul.f32 %v1675_v50, %v3254_v46  ;;  %v1699_v3 = vor.u32 1.1754944e-38, %v1698_v53 }
 0x629   : > { %v1610_v18 = vmul.f32 %v2594_v61, %v1609_v12  ;;  %v1725_v1 = vmul.f32 %v1724_v32, %v3280_v17  ;;  %vm1697_vm2 = vcmp.eq.f32.partialorder %v1696_v35, 8.507059e+37  ;;  %v1659_v9 = vor.u32 1.1754944e-38, %v1658_v58 }
 0x62a   : > { %v2596_v24 = vpop.eup %2595  ;;  %v1714_v12 = vmul.f32 %v1713_v59, %v3280_v17  ;;  %vm1657_vm3 = vcmp.eq.f32.partialorder %v1656_v47, 8.507059e+37  ;;  %v1571_v21 = vmul.f32 0.5, %v3249_v43 }
 0x62b   : > { %v1611_v25 = vadd.f32 %v2594_v61, %v1610_v18  ;;  %v1648_v29 = vmul.f32 %v2596_v24, %v3300_v60  ;;  %v1726_v8 = vadd.f32 1.0, %v1725_v1  ;;  %vm1653_vm12 = vweird.f32 %v2596_v24 }
 0x62c   : > { %v2598_v40 = vpop.eup %2597  ;;  %vm3328_vm15 = vmor %vm1652_vm14, %vm1653_vm12  ;;  %v1636_v18 = vmul.f32 %v1635_v63, %v3247_v42  ;;  %v1715_v22 = vadd.f32 1.1283791, %v1714_v12 }
 0x62d   : > { %v1615_v33 = vsel %vm1614_vm10, %v2594_v61, %v1611_v25  ;;  %v1649_v52 = vsub.f32 1.0, %v1648_v29  ;;  %v1688_v34 = vmul.f32 %v2598_v40, %v3307_v13  ;;  %2599 = vrcp.f32 %v1726_v8 }
 0x62e   : > { %v1620_v44 = vsel %vm1617_vm11, %v1619_v41, %v1615_v33  ;;  %vm1693_vm13 = vweird.f32 %v2598_v40  ;;  %v1569_v13 = vmul.f32 0.5, %v3233_v38  ;;  %v1736_v23 = vand.u32 2147483647, %v1726_v8 }
 0x62f   : > { %v1650_v0 = vmul.f32 %v2596_v24, %v1649_v52  ;;  %v1689_v51 = vsub.f32 1.0, %v1688_v34  ;;  %v1621_v55 = vmul.f32 %v1620_v44, %v1596_v36  ;;  %vm1694_vm1 = vmor %vm1692_vm0, %vm1693_vm13  ;;  %vm1732_vm5 = vweird.f32 %v1726_v8 }
 0x630   : > { %v1716_v38 = vmul.f32 %v1715_v22, %v3272_v62  ;;  %vm1737_vm7 = vcmp.eq.f32.partialorder %v1736_v23, 8.507059e+37  ;;  %v1572_v41 = vmul.f32 0.5, %v3265_v54 }
 0x631   : > { %v1651_v56 = vadd.f32 %v2596_v24, %v1650_v0  ;;  %v1690_v57 = vmul.f32 %v2598_v40, %v1689_v51  ;;  %v2283_v4 = vclamps-f32 %v1621_v55, 1.0 }
 0x633   : > { %v1691_v61 = vadd.f32 %v2598_v40, %v1690_v57  ;;  %v1655_v5 = vsel %vm3328_vm15, %v2596_v24, %v1651_v56  ;;  %v2600_v7 = vpop.eup %2599  ;;  %v1744_v46 = vadd.f32 1.0, %v2283_v4  ;;  %v1738_v24 = vand.u32 2147483648, %v1726_v8 }
 0x634   : > { %v1728_v14 = vmul.f32 %v2600_v7, %v1726_v8  ;;  %v1660_v16 = vsel %vm1657_vm3, %v1659_v9, %v1655_v5  ;;  %vm1733_vm4 = vweird.f32 %v2600_v7 }
 0x635   : > { %v1695_v6 = vsel %vm1694_vm1, %v2598_v40, %v1691_v61  ;;  %v1661_v25 = vmul.f32 %v1660_v16, %v1636_v18  ;;  %v1748_v17 = vmul.f32 %v1744_v46, %v1569_v13  ;;  %vm1734_vm6 = vmor %vm1732_vm5, %vm1733_vm4  ;;  %v1739_v31 = vor.u32 1.1754944e-38, %v1738_v24 }
 0x636   : > { %v1700_v10 = vsel %vm1697_vm2, %v1699_v3, %v1695_v6  ;;  %v1729_v20 = vsub.f32 1.0, %v1728_v14  ;;  %v1570_v40 = vmul.f32 0.5, %v3242_v39 }
 0x637   : > { %v1701_v60 = vmul.f32 %v1700_v10, %v1676_v2  ;;  %v2284_v42 = vclamps-f32 %v1661_v25, 1.0 }
 0x638   : > { %v1730_v11 = vmul.f32 %v2600_v7, %v1729_v20 }
 0x639   : > { %v2285_v19 = vclamps-f32 %v1701_v60, 1.0  ;;  %v1745_v52 = vadd.f32 1.0, %v2284_v42 }
 0x63a   : > { %v1731_v30 = vadd.f32 %v2600_v7, %v1730_v11 }
 0x63b   : > { %v1746_v28 = vadd.f32 1.0, %v2285_v19  ;;  %v1749_v0 = vmul.f32 %v1745_v52, %v1570_v40 }
 0x63c   : > { %v1735_v33 = vsel %vm1734_vm6, %v2600_v7, %v1731_v30 }
 0x63d   : > { %v1750_v29 = vmul.f32 %v1746_v28, %v1571_v21  ;;  %v1740_v43 = vsel %vm1737_vm7, %v1739_v31, %v1735_v33 }
 0x63e   : > { %v1741_v37 = vmul.f32 %v1740_v43, %v1716_v38 }
 0x63f   : > { %v1752_v32 = vpack.c.bf16 %v1750_v29, %v1748_v17 }
 0x640   : > { %v2286_v15 = vclamps-f32 %v1741_v37, 1.0 }
 0x641   : > { %1890 = vmatmul.bf16.vlgmr.msrb.gmra.mxu3 %v1752_v32 }
 0x642   : > { %v1747_v1 = vadd.f32 1.0, %v2286_v15 }
 0x644   : > { %v1751_v62 = vmul.f32 %v1747_v1, %v1572_v41 }
 0x646   : > { %v1753_v34 = vpack.c.bf16 %v1751_v62, %v1749_v0 }
 0x648   : > { %1904 = vmatmul.bf16.vlgmr.msra.gmra.mxu0 %v1753_v34 }
 0x6c4   : > { %v1891_v44 = vpop.f32.mrf.mxu3 }
 0x6c5   : > { %v1892_v45 = vadd.f32 %v1891_v44, %v3226_v26  ;;  %v1905_v8 = vpop.f32.mrf.mxu0 }
 0x6c7   : > { %v1906_v36 = vadd.f32 %v1905_v8, %v1892_v45 }
 0x6c9   : > { %1910 = vst [vmem:[%s424_s16] sm:$0xff] %v1906_v36 }
 0x6cc   : > { %v1893_v39 = vpop.f32.mrf.mxu3 }
 0x6cd   : > { %v1894_v54 = vadd.f32 %v1893_v39, %v3229_v27  ;;  %v1907_v49 = vpop.f32.mrf.mxu0 }
 0x6cf   : > { %v1908_v26 = vadd.f32 %v1907_v49, %v1894_v54 }
 0x6d1   : > { %1911 = vst [vmem:[%s424_s16 + $0x8] sm:$0xff] %v1908_v26 }
 0x6d2   : > { %2838 = shalt.err (!%p2835_p9)
}
 0x6d3   : > { %s2906_s22 = smov 128   ;;  %s2907_s25 = smov 8  }
 0x6d4   : > { %2448 = dma.vmem_to_hbm [thread:$0]  (%p3068_p4), %s1926_s26, 256, %s1928_s23, %s1913_s12, %s2906_s22, %s2906_s22, %s2907_s25  }
 0x6d5 PF: > { %s1942_s15 = sand.u32 1, %s2877_s27   ;;  %p3409_p10 = scmp.ge.s32.totalorder %s2889_s30, 2 }
 0x6d6   : > { %s1943_s16 = scalar_lea.sflag [#allocation4], %s1942_s15 }
 0x6d7   : > { %p2474_p13 = pnand %p3409_p10, %p3072_p6 }
 0x6d9   : > { %p2475_p11 = pneg %p2474_p13 }
 0x6db   : > { %2872 = dma.done.wait (%p2475_p11), %s1943_s16, 256  }
 0x6dc   : > { %2874 = vsyncadd (%p2475_p11), %s1943_s16, 4294967040  ;;  %p24_p0 = scmp.ge.s32.totalorder %s3042_s18, 4   ;;  %s3410_s27 = smov %s2881_s28 }
 0x6dd   : > { %s3411_s28 = smov %s2885_s29  ;;  %s3412_s29 = smov %s3053_s24 }
 0x6de   : > { %s3413_s30 = smov %s3042_s18  ;;  %26 = sbr.rel (!%p24_p0) target bundleno = 12 (0xc), region = 121 }
 0x6e3   :  { %1949 = vsyncpa [#allocation3], 1 }
 0x6e4   :  { %1951 = vsyncpa [#allocation3 + $0x1], 1 }
 0x6e5   :  { %1952 = vsyncpa [#allocation6], 1 }
 0x6e6   :  { %1953 = vsyncpa [#allocation9], 1 }
 0x6e7   :  { %1954 = vsyncpa [#allocation12], 1 }
 0x6e8   :  { %1955 = vsyncpa [#allocation4], 1 }
 0x6e9   :  { %1957 = vsyncpa [#allocation4 + $0x1], 1 }

</bundles_post_ra>
